<compile_context>
chip_gen: v5e
topology: v5e:2x2
jax: 0.10.0
libtpu: 0.0.40
codegen_flags: <defaults>
</compile_context>

<pallas_src>
import jax
import jax.numpy as jnp
from jax.experimental import pallas as pl
from jax.experimental.pallas import tpu as pltpu

LANE = 128
TB = 8  # timesteps per grid block (multiple of 8 -> dense (8,128) out tiles)


def _round_up(x, m):
    return ((x + m - 1) // m) * m


def lstm_block_kernel(t_valid_ref, x_ref, h0_ref, c0_ref,
                      w_ih_ref, w_hh_ref, b_ref,
                      out_ref, h_out_ref, c_out_ref):
    """One grid step == TB LSTM timesteps.

    t_valid_ref : (1,) SMEM       true number of timesteps (scalar prefetch)
    x_ref       : (TB, Hp)        inputs for this block (pipelined over grid)
    h0_ref,c0_ref: (1, Hp)        initial hidden / cell (resident)
    w_ih_ref    : (Hp, 4*Hp)      gate-padded W_ih^T (resident)
    w_hh_ref    : (Hp, 4*Hp)      gate-padded W_hh^T (resident)
    b_ref       : (1, 4*Hp)       gate-padded b_ih + b_hh (resident)
    out_ref     : (TB, Hp)        per-step h for this block (pipelined)
    h_out_ref   : (1, Hp)         recurrent h carry (resident output block)
    c_out_ref   : (1, Hp)         recurrent c carry (resident output block)
    """
    Hp = h0_ref.shape[1]
    tb = x_ref.shape[0]
    blk = pl.program_id(0)

    # Load the carries from h0/c0 on the first block only.
    @pl.when(blk == 0)
    def _():
        h_out_ref[...] = h0_ref[...]
        c_out_ref[...] = c0_ref[...]

    # Phase A (off the recurrence chain): batched input projection + bias for
    # the whole block in ONE MXU pass: (TB, Hp) @ (Hp, 4*Hp).
    xproj = jnp.dot(x_ref[...], w_ih_ref[...],
                    preferred_element_type=jnp.float32) + b_ref[...]

    w_hh = w_hh_ref[...]
    t_valid = t_valid_ref[0]
    t_base = blk * tb

    h = h_out_ref[...]           # (1, Hp)
    c = c_out_ref[...]           # (1, Hp)

    # Phase B: serial recurrence over the block.  TB is a small static
    # constant, so unroll with a Python loop (all slices/stores static).
    for t in range(tb):
        gates = xproj[t:t + 1, :] + jnp.dot(
            h, w_hh, preferred_element_type=jnp.float32)   # (1, 4*Hp)

        # Gate slices land on 128-lane boundaries (Hp is a multiple of 128).
        i_g = jax.nn.sigmoid(gates[:, 0 * Hp:1 * Hp])
        f_g = jax.nn.sigmoid(gates[:, 1 * Hp:2 * Hp])
        g_g = jnp.tanh(gates[:, 2 * Hp:3 * Hp])
        o_g = jax.nn.sigmoid(gates[:, 3 * Hp:4 * Hp])

        c_new = f_g * c + i_g * g_g
        h_new = o_g * jnp.tanh(c_new)

        out_ref[t:t + 1, :] = h_new          # row of a dense (TB, Hp) tile

        # Freeze the carries on padded (invalid) timesteps of the last block.
        valid = (t_base + t) < t_valid
        h = jnp.where(valid, h_new, h)
        c = jnp.where(valid, c_new, c)

    h_out_ref[...] = h
    c_out_ref[...] = c


def lstm_sequence_pallas(x_pad, h0, c0, w_ih_cat, w_hh_cat, bias, t_valid):
    """Run ceil(T/TB)*TB LSTM steps in a single kernel launch.

    x_pad    : (T_pad, Hp)   lane-padded inputs, T_pad a multiple of TB
    h0, c0   : (1, Hp)
    w_ih_cat : (Hp, 4*Hp)    gate-padded W_ih^T
    w_hh_cat : (Hp, 4*Hp)    gate-padded W_hh^T
    bias     : (1, 4*Hp)
    t_valid  : int           true number of timesteps (<= T_pad)
    Returns (out_seq (T_pad, Hp), h_T (1, Hp), c_T (1, Hp)).
    """
    T_pad, Hp = x_pad.shape
    nblk = T_pad // TB

    def resident(shape):
        return pl.BlockSpec(shape, lambda b, tv: (0, 0))

    out_shapes = (
        jax.ShapeDtypeStruct((T_pad, Hp), jnp.float32),   # per-step h
        jax.ShapeDtypeStruct((1, Hp), jnp.float32),       # final h
        jax.ShapeDtypeStruct((1, Hp), jnp.float32),       # final c
    )
    grid_spec = pltpu.PrefetchScalarGridSpec(
        num_scalar_prefetch=1,
        grid=(nblk,),
        in_specs=[
            pl.BlockSpec((TB, Hp), lambda b, tv: (b, 0)),   # x block
            resident((1, Hp)),                              # h0
            resident((1, Hp)),                              # c0
            resident((Hp, 4 * Hp)),                         # W_ih^T (fused)
            resident((Hp, 4 * Hp)),                         # W_hh^T (fused)
            resident((1, 4 * Hp)),                          # bias
        ],
        out_specs=(
            pl.BlockSpec((TB, Hp), lambda b, tv: (b, 0)),   # h per block
            resident((1, Hp)),                              # final h (carry)
            resident((1, Hp)),                              # final c (carry)
        ),
    )
    return pl.pallas_call(
        lstm_block_kernel,
        out_shape=out_shapes,
        grid_spec=grid_spec,
        compiler_params=pltpu.CompilerParams(
            dimension_semantics=("arbitrary",)),            # recurrence: serial
    )(jnp.array([t_valid], jnp.int32),
      x_pad, h0, c0, w_ih_cat, w_hh_cat, bias)


class RNN:
    """JAX/Pallas equivalent of the PyTorch RNN module (single-layer LSTM)."""

    def __init__(self, hidden_size, key):
        self.H = hidden_size
        self.Hp = _round_up(max(hidden_size, LANE), LANE)
        k1, k2, k3, k4 = jax.random.split(key, 4)
        bound = 1.0 / jnp.sqrt(hidden_size)
        # PyTorch stores W_ih, W_hh as (4H, H); keep transposed (H, 4H) here.
        w_ih_t = jax.random.uniform(k1, (hidden_size, 4 * hidden_size),
                                    jnp.float32, -bound, bound)
        w_hh_t = jax.random.uniform(k2, (hidden_size, 4 * hidden_size),
                                    jnp.float32, -bound, bound)
        b_ih = jax.random.uniform(k3, (4 * hidden_size,), jnp.float32,
                                  -bound, bound)
        b_hh = jax.random.uniform(k4, (4 * hidden_size,), jnp.float32,
                                  -bound, bound)
        self.w_ih_t, self.w_hh_t = w_ih_t, w_hh_t
        self.bias = (b_ih + b_hh).reshape(1, 4 * hidden_size)

        # Lane-padded parameters for the kernel: gate g of each matrix lands
        # at columns [g*Hp : g*Hp+H]; zeros elsewhere keep padded lanes of
        # h/c exactly zero across steps.
        H, Hp = self.H, self.Hp
        w_ih_cat = jnp.zeros((Hp, 4 * Hp), jnp.float32)
        w_hh_cat = jnp.zeros((Hp, 4 * Hp), jnp.float32)
        b_pad = jnp.zeros((1, 4 * Hp), jnp.float32)
        for g in range(4):
            w_ih_cat = w_ih_cat.at[0:H, g * Hp:g * Hp + H].set(
                w_ih_t[:, g * H:(g + 1) * H])
            w_hh_cat = w_hh_cat.at[0:H, g * Hp:g * Hp + H].set(
                w_hh_t[:, g * H:(g + 1) * H])
            b_pad = b_pad.at[0, g * Hp:g * Hp + H].set(
                self.bias[0, g * H:(g + 1) * H])
        self.w_ih_cat = w_ih_cat
        self.w_hh_cat = w_hh_cat
        self.bias_pad = b_pad
        # TODO(synk): on v6e/v7x the matmul operands could be bf16 (f32
        # accumulation); kept f32 here to stay bit-close to the reference.

    def _pad_vec(self, v):
        return jnp.zeros((1, self.Hp), jnp.float32).at[0, :self.H].set(
            v.reshape(-1).astype(jnp.float32))

    def forward(self, inp, hidden):
        """Single LSTM step: matches the PyTorch module's forward()."""
        out_seq, (h1, c1) = self.forward_sequence(inp.reshape(1, self.H),
                                                  hidden)
        return out_seq.reshape(-1), (h1, c1)

    def forward_sequence(self, inp_seq, hidden):
        """Run T steps in ONE pallas_call (weights resident, h/c in VMEM)."""
        T = inp_seq.shape[0]
        h0, c0 = hidden
        T_pad = _round_up(max(T, TB), TB)
        x_pad = jnp.zeros((T_pad, self.Hp), jnp.float32)
        x_pad = x_pad.at[:T, :self.H].set(
            inp_seq.reshape(T, self.H).astype(jnp.float32))
        out_seq, h1, c1 = lstm_sequence_pallas(
            x_pad, self._pad_vec(h0), self._pad_vec(c0),
            self.w_ih_cat, self.w_hh_cat, self.bias_pad, T)
        out = out_seq[:T, :self.H]                         # (T, H)
        h1 = h1[:, :self.H].reshape(1, 1, self.H)
        c1 = c1[:, :self.H].reshape(1, 1, self.H)
        return out, (h1, c1)


def lstm_step_ref(x, h, c, w_ih_t, w_hh_t, bias):
    """Pure-JAX single-step reference for correctness check."""
    H = x.shape[1]
    gates = x @ w_ih_t + h @ w_hh_t + bias
    i = jax.nn.sigmoid(gates[:, 0 * H:1 * H])
    f = jax.nn.sigmoid(gates[:, 1 * H:2 * H])
    g = jnp.tanh(gates[:, 2 * H:3 * H])
    o = jax.nn.sigmoid(gates[:, 3 * H:4 * H])
    c_new = f * c + i * g
    h_new = o * jnp.tanh(c_new)
    return h_new, c_new


if __name__ == "__main__":
    # Synthetic vocab sizes: C chords + N notes -> hidden size H = C + N = 32.
    C_, N_ = 20, 12
    H = C_ + N_

    key = jax.random.PRNGKey(0)
    k_model, k_inp, k_seq = jax.random.split(key, 3)

    model = RNN(H, k_model)

    # ---- single-step forward (matches the PyTorch module exactly) ----------
    inp = jax.random.normal(k_inp, (H,), jnp.float32)
    init_hidden = (jnp.zeros((1, 1, H), jnp.float32),
                   jnp.zeros((1, 1, H), jnp.float32))
    out, (h1, c1) = model.forward(inp, init_hidden)
    out = jax.block_until_ready(out)
    h1 = jax.block_until_ready(h1)
    c1 = jax.block_until_ready(c1)

    h_ref, c_ref = lstm_step_ref(inp.reshape(1, H), jnp.zeros((1, H)),
                                 jnp.zeros((1, H)),
                                 model.w_ih_t, model.w_hh_t, model.bias)
    assert out.shape == (H,)
    assert h1.shape == (1, 1, H) and c1.shape == (1, 1, H)
    assert jnp.allclose(out, h_ref.reshape(-1), atol=1e-5)
    assert jnp.allclose(h1.reshape(-1), h_ref.reshape(-1), atol=1e-5)
    assert jnp.allclose(c1.reshape(-1), c_ref.reshape(-1), atol=1e-5)

    # ---- multi-step path: T timesteps (not a multiple of TB) ---------------
    T = 12
    inp_seq = jax.random.normal(k_seq, (T, H), jnp.float32)
    out_seq, (hT, cT) = model.forward_sequence(inp_seq, init_hidden)
    out_seq = jax.block_until_ready(out_seq)
    hT = jax.block_until_ready(hT)
    cT = jax.block_until_ready(cT)

    # Reference: loop the single-step pure-JAX cell.
    h_r = jnp.zeros((1, H), jnp.float32)
    c_r = jnp.zeros((1, H), jnp.float32)
    outs_r = []
    for t in range(T):
        h_r, c_r = lstm_step_ref(inp_seq[t].reshape(1, H), h_r, c_r,
                                 model.w_ih_t, model.w_hh_t, model.bias)
        outs_r.append(h_r[0])
    outs_r = jnp.stack(outs_r)

    assert out_seq.shape == (T, H)
    assert jnp.allclose(out_seq, outs_r, atol=1e-4)
    assert jnp.allclose(hT.reshape(-1), h_r.reshape(-1), atol=1e-4)
    assert jnp.allclose(cT.reshape(-1), c_r.reshape(-1), atol=1e-4)

    print("KERNEL_OK")
</pallas_src>

<mosaic_0001>
module attributes {stable_mosaic.version = 11 : i64} {
  func.func @lstm_block_kernel(%arg0: i32, %arg1: memref<1xi32, #tpu.memory_space<smem>>, %arg2: memref<8x128xf32, #tpu.memory_space<vmem>>, %arg3: memref<1x128xf32, #tpu.memory_space<vmem>>, %arg4: memref<1x128xf32, #tpu.memory_space<vmem>>, %arg5: memref<128x512xf32, #tpu.memory_space<vmem>>, %arg6: memref<128x512xf32, #tpu.memory_space<vmem>>, %arg7: memref<1x512xf32, #tpu.memory_space<vmem>>, %arg8: memref<8x128xf32, #tpu.memory_space<vmem>>, %arg9: memref<1x128xf32, #tpu.memory_space<vmem>>, %arg10: memref<1x128xf32, #tpu.memory_space<vmem>>) attributes {dimension_semantics = [#tpu.dimension_semantics<arbitrary>], iteration_bounds = array<i64: 1>, scalar_prefetch = 1 : i64, scratch_operands = 0 : i64, tpu.core_type = #tpu.core_type<tc>, window_params = [{transform_indices = @transform_0, window_bounds = array<i64: 8, 128>}, {pipeline_mode = #tpu.pipeline_mode<synchronous>, transform_indices = @transform_1, window_bounds = array<i64: 1, 128>}, {pipeline_mode = #tpu.pipeline_mode<synchronous>, transform_indices = @transform_2, window_bounds = array<i64: 1, 128>}, {pipeline_mode = #tpu.pipeline_mode<synchronous>, transform_indices = @transform_3, window_bounds = array<i64: 128, 512>}, {pipeline_mode = #tpu.pipeline_mode<synchronous>, transform_indices = @transform_4, window_bounds = array<i64: 128, 512>}, {pipeline_mode = #tpu.pipeline_mode<synchronous>, transform_indices = @transform_5, window_bounds = array<i64: 1, 512>}, {transform_indices = @transform_6, window_bounds = array<i64: 8, 128>}, {pipeline_mode = #tpu.pipeline_mode<synchronous>, transform_indices = @transform_7, window_bounds = array<i64: 1, 128>}, {pipeline_mode = #tpu.pipeline_mode<synchronous>, transform_indices = @transform_8, window_bounds = array<i64: 1, 128>}]} {
    %c0_i32 = arith.constant 0 : i32
    %0 = arith.cmpi eq, %arg0, %c0_i32 : i32
    %1 = arith.extui %0 : i1 to i32
    %c0_i32_0 = arith.constant 0 : i32
    %2 = arith.cmpi ne, %1, %c0_i32_0 : i32
    scf.if %2 {
      %c0_59 = arith.constant 0 : index
      %c0_60 = arith.constant 0 : index
      %280 = vector.load %arg3[%c0_59, %c0_60] : memref<1x128xf32, #tpu.memory_space<vmem>>, vector<1x128xf32>
      %c0_61 = arith.constant 0 : index
      %c0_62 = arith.constant 0 : index
      %281 = vector.load %arg9[%c0_61, %c0_62] : memref<1x128xf32, #tpu.memory_space<vmem>>, vector<1x128xf32>
      tpu.vector_store %arg9[%c0_61, %c0_62], %280 {strides = array<i32>} : memref<1x128xf32, #tpu.memory_space<vmem>>, vector<1x128xf32>,
      %c0_63 = arith.constant 0 : index
      %c0_64 = arith.constant 0 : index
      %282 = vector.load %arg4[%c0_63, %c0_64] : memref<1x128xf32, #tpu.memory_space<vmem>>, vector<1x128xf32>
      %c0_65 = arith.constant 0 : index
      %c0_66 = arith.constant 0 : index
      %283 = vector.load %arg10[%c0_65, %c0_66] : memref<1x128xf32, #tpu.memory_space<vmem>>, vector<1x128xf32>
      tpu.vector_store %arg10[%c0_65, %c0_66], %282 {strides = array<i32>} : memref<1x128xf32, #tpu.memory_space<vmem>>, vector<1x128xf32>,
    } else {
    }
    %c0 = arith.constant 0 : index
    %c0_1 = arith.constant 0 : index
    %3 = vector.load %arg2[%c0, %c0_1] : memref<8x128xf32, #tpu.memory_space<vmem>>, vector<8x128xf32>
    %c0_2 = arith.constant 0 : index
    %c0_3 = arith.constant 0 : index
    %4 = vector.load %arg5[%c0_2, %c0_3] : memref<128x512xf32, #tpu.memory_space<vmem>>, vector<128x512xf32>
    %cst = arith.constant dense<0.000000e+00> : vector<8x512xf32>
    %5 = tpu.matmul %3, %4, %cst {dimension_numbers = #tpu.dot_dimension_numbers<[1], [0], [0], [1], [0, 0, 1, 1], [], []>} : vector<8x128xf32>, vector<128x512xf32>, vector<8x512xf32> -> vector<8x512xf32>
    %c0_4 = arith.constant 0 : index
    %c0_5 = arith.constant 0 : index
    %6 = vector.load %arg7[%c0_4, %c0_5] : memref<1x512xf32, #tpu.memory_space<vmem>>, vector<1x512xf32>
    %7 = vector.broadcast %6 : vector<1x512xf32> to vector<8x512xf32>
    %8 = arith.addf %5, %7 : vector<8x512xf32>
    %c0_6 = arith.constant 0 : index
    %c0_7 = arith.constant 0 : index
    %9 = vector.load %arg6[%c0_6, %c0_7] : memref<128x512xf32, #tpu.memory_space<vmem>>, vector<128x512xf32>
    %c0_8 = arith.constant 0 : index
    %10 = memref.load %arg1[%c0_8] : memref<1xi32, #tpu.memory_space<smem>>
    %c8_i32 = arith.constant 8 : i32
    %11 = arith.muli %arg0, %c8_i32 : i32
    %c0_9 = arith.constant 0 : index
    %c0_10 = arith.constant 0 : index
    %12 = vector.load %arg9[%c0_9, %c0_10] : memref<1x128xf32, #tpu.memory_space<vmem>>, vector<1x128xf32>
    %c0_11 = arith.constant 0 : index
    %c0_12 = arith.constant 0 : index
    %13 = vector.load %arg10[%c0_11, %c0_12] : memref<1x128xf32, #tpu.memory_space<vmem>>, vector<1x128xf32>
    %14 = vector.extract_strided_slice %8 {offsets = [0, 0], sizes = [1, 512], strides = [1, 1]} : vector<8x512xf32> to vector<1x512xf32>
    %cst_13 = arith.constant dense<0.000000e+00> : vector<1x512xf32>
    %15 = tpu.matmul %12, %9, %cst_13 {dimension_numbers = #tpu.dot_dimension_numbers<[1], [0], [0], [1], [0, 0, 1, 1], [], []>} : vector<1x128xf32>, vector<128x512xf32>, vector<1x512xf32> -> vector<1x512xf32>
    %16 = arith.addf %14, %15 : vector<1x512xf32>
    %17 = vector.extract_strided_slice %16 {offsets = [0, 0], sizes = [1, 128], strides = [1, 1]} : vector<1x512xf32> to vector<1x128xf32>
    %18 = arith.negf %17 : vector<1x128xf32>
    %19 = math.exp %18 : vector<1x128xf32>
    %cst_14 = arith.constant 1.000000e+00 : f32
    %20 = vector.broadcast %cst_14 : f32 to vector<1x128xf32>
    %21 = arith.addf %20, %19 : vector<1x128xf32>
    %22 = arith.divf %20, %21 : vector<1x128xf32>
    %23 = vector.extract_strided_slice %16 {offsets = [0, 128], sizes = [1, 128], strides = [1, 1]} : vector<1x512xf32> to vector<1x128xf32>
    %24 = arith.negf %23 : vector<1x128xf32>
    %25 = math.exp %24 : vector<1x128xf32>
    %cst_15 = arith.constant 1.000000e+00 : f32
    %26 = vector.broadcast %cst_15 : f32 to vector<1x128xf32>
    %27 = arith.addf %26, %25 : vector<1x128xf32>
    %28 = arith.divf %26, %27 : vector<1x128xf32>
    %29 = vector.extract_strided_slice %16 {offsets = [0, 256], sizes = [1, 128], strides = [1, 1]} : vector<1x512xf32> to vector<1x128xf32>
    %30 = math.tanh %29 : vector<1x128xf32>
    %31 = vector.extract_strided_slice %16 {offsets = [0, 384], sizes = [1, 128], strides = [1, 1]} : vector<1x512xf32> to vector<1x128xf32>
    %32 = arith.negf %31 : vector<1x128xf32>
    %33 = math.exp %32 : vector<1x128xf32>
    %cst_16 = arith.constant 1.000000e+00 : f32
    %34 = vector.broadcast %cst_16 : f32 to vector<1x128xf32>
    %35 = arith.addf %34, %33 : vector<1x128xf32>
    %36 = arith.divf %34, %35 : vector<1x128xf32>
    %37 = arith.mulf %28, %13 : vector<1x128xf32>
    %38 = arith.mulf %22, %30 : vector<1x128xf32>
    %39 = arith.addf %37, %38 : vector<1x128xf32>
    %40 = math.tanh %39 : vector<1x128xf32>
    %41 = arith.mulf %36, %40 : vector<1x128xf32>
    %c0_17 = arith.constant 0 : index
    %c0_18 = arith.constant 0 : index
    %42 = vector.load %arg8[%c0_17, %c0_18] : memref<8x128xf32, #tpu.memory_space<vmem>>, vector<1x128xf32>
    tpu.vector_store %arg8[%c0_17, %c0_18], %41 {strides = array<i32>} : memref<8x128xf32, #tpu.memory_space<vmem>>, vector<1x128xf32>,
    %c0_i32_19 = arith.constant 0 : i32
    %43 = arith.addi %11, %c0_i32_19 : i32
    %44 = arith.cmpi slt, %43, %10 : i32
    %45 = arith.select %44, %41, %12 : vector<1x128xf32>
    %46 = arith.select %44, %39, %13 : vector<1x128xf32>
    %47 = vector.extract_strided_slice %8 {offsets = [1, 0], sizes = [1, 512], strides = [1, 1]} : vector<8x512xf32> to vector<1x512xf32>
    %cst_20 = arith.constant dense<0.000000e+00> : vector<1x512xf32>
    %48 = tpu.matmul %45, %9, %cst_20 {dimension_numbers = #tpu.dot_dimension_numbers<[1], [0], [0], [1], [0, 0, 1, 1], [], []>} : vector<1x128xf32>, vector<128x512xf32>, vector<1x512xf32> -> vector<1x512xf32>
    %49 = arith.addf %47, %48 : vector<1x512xf32>
    %50 = vector.extract_strided_slice %49 {offsets = [0, 0], sizes = [1, 128], strides = [1, 1]} : vector<1x512xf32> to vector<1x128xf32>
    %51 = arith.negf %50 : vector<1x128xf32>
    %52 = math.exp %51 : vector<1x128xf32>
    %cst_21 = arith.constant 1.000000e+00 : f32
    %53 = vector.broadcast %cst_21 : f32 to vector<1x128xf32>
    %54 = arith.addf %53, %52 : vector<1x128xf32>
    %55 = arith.divf %53, %54 : vector<1x128xf32>
    %56 = vector.extract_strided_slice %49 {offsets = [0, 128], sizes = [1, 128], strides = [1, 1]} : vector<1x512xf32> to vector<1x128xf32>
    %57 = arith.negf %56 : vector<1x128xf32>
    %58 = math.exp %57 : vector<1x128xf32>
    %cst_22 = arith.constant 1.000000e+00 : f32
    %59 = vector.broadcast %cst_22 : f32 to vector<1x128xf32>
    %60 = arith.addf %59, %58 : vector<1x128xf32>
    %61 = arith.divf %59, %60 : vector<1x128xf32>
    %62 = vector.extract_strided_slice %49 {offsets = [0, 256], sizes = [1, 128], strides = [1, 1]} : vector<1x512xf32> to vector<1x128xf32>
    %63 = math.tanh %62 : vector<1x128xf32>
    %64 = vector.extract_strided_slice %49 {offsets = [0, 384], sizes = [1, 128], strides = [1, 1]} : vector<1x512xf32> to vector<1x128xf32>
    %65 = arith.negf %64 : vector<1x128xf32>
    %66 = math.exp %65 : vector<1x128xf32>
    %cst_23 = arith.constant 1.000000e+00 : f32
    %67 = vector.broadcast %cst_23 : f32 to vector<1x128xf32>
    %68 = arith.addf %67, %66 : vector<1x128xf32>
    %69 = arith.divf %67, %68 : vector<1x128xf32>
    %70 = arith.mulf %61, %46 : vector<1x128xf32>
    %71 = arith.mulf %55, %63 : vector<1x128xf32>
    %72 = arith.addf %70, %71 : vector<1x128xf32>
    %73 = math.tanh %72 : vector<1x128xf32>
    %74 = arith.mulf %69, %73 : vector<1x128xf32>
    %c1 = arith.constant 1 : index
    %c0_24 = arith.constant 0 : index
    %75 = vector.load %arg8[%c1, %c0_24] : memref<8x128xf32, #tpu.memory_space<vmem>>, vector<1x128xf32>
    tpu.vector_store %arg8[%c1, %c0_24], %74 {strides = array<i32>} : memref<8x128xf32, #tpu.memory_space<vmem>>, vector<1x128xf32>,
    %c1_i32 = arith.constant 1 : i32
    %76 = arith.addi %11, %c1_i32 : i32
    %77 = arith.cmpi slt, %76, %10 : i32
    %78 = arith.select %77, %74, %45 : vector<1x128xf32>
    %79 = arith.select %77, %72, %46 : vector<1x128xf32>
    %80 = vector.extract_strided_slice %8 {offsets = [2, 0], sizes = [1, 512], strides = [1, 1]} : vector<8x512xf32> to vector<1x512xf32>
    %cst_25 = arith.constant dense<0.000000e+00> : vector<1x512xf32>
    %81 = tpu.matmul %78, %9, %cst_25 {dimension_numbers = #tpu.dot_dimension_numbers<[1], [0], [0], [1], [0, 0, 1, 1], [], []>} : vector<1x128xf32>, vector<128x512xf32>, vector<1x512xf32> -> vector<1x512xf32>
    %82 = arith.addf %80, %81 : vector<1x512xf32>
    %83 = vector.extract_strided_slice %82 {offsets = [0, 0], sizes = [1, 128], strides = [1, 1]} : vector<1x512xf32> to vector<1x128xf32>
    %84 = arith.negf %83 : vector<1x128xf32>
    %85 = math.exp %84 : vector<1x128xf32>
    %cst_26 = arith.constant 1.000000e+00 : f32
    %86 = vector.broadcast %cst_26 : f32 to vector<1x128xf32>
    %87 = arith.addf %86, %85 : vector<1x128xf32>
    %88 = arith.divf %86, %87 : vector<1x128xf32>
    %89 = vector.extract_strided_slice %82 {offsets = [0, 128], sizes = [1, 128], strides = [1, 1]} : vector<1x512xf32> to vector<1x128xf32>
    %90 = arith.negf %89 : vector<1x128xf32>
    %91 = math.exp %90 : vector<1x128xf32>
    %cst_27 = arith.constant 1.000000e+00 : f32
    %92 = vector.broadcast %cst_27 : f32 to vector<1x128xf32>
    %93 = arith.addf %92, %91 : vector<1x128xf32>
    %94 = arith.divf %92, %93 : vector<1x128xf32>
    %95 = vector.extract_strided_slice %82 {offsets = [0, 256], sizes = [1, 128], strides = [1, 1]} : vector<1x512xf32> to vector<1x128xf32>
    %96 = math.tanh %95 : vector<1x128xf32>
    %97 = vector.extract_strided_slice %82 {offsets = [0, 384], sizes = [1, 128], strides = [1, 1]} : vector<1x512xf32> to vector<1x128xf32>
    %98 = arith.negf %97 : vector<1x128xf32>
    %99 = math.exp %98 : vector<1x128xf32>
    %cst_28 = arith.constant 1.000000e+00 : f32
    %100 = vector.broadcast %cst_28 : f32 to vector<1x128xf32>
    %101 = arith.addf %100, %99 : vector<1x128xf32>
    %102 = arith.divf %100, %101 : vector<1x128xf32>
    %103 = arith.mulf %94, %79 : vector<1x128xf32>
    %104 = arith.mulf %88, %96 : vector<1x128xf32>
    %105 = arith.addf %103, %104 : vector<1x128xf32>
    %106 = math.tanh %105 : vector<1x128xf32>
    %107 = arith.mulf %102, %106 : vector<1x128xf32>
    %c2 = arith.constant 2 : index
    %c0_29 = arith.constant 0 : index
    %108 = vector.load %arg8[%c2, %c0_29] : memref<8x128xf32, #tpu.memory_space<vmem>>, vector<1x128xf32>
    tpu.vector_store %arg8[%c2, %c0_29], %107 {strides = array<i32>} : memref<8x128xf32, #tpu.memory_space<vmem>>, vector<1x128xf32>,
    %c2_i32 = arith.constant 2 : i32
    %109 = arith.addi %11, %c2_i32 : i32
    %110 = arith.cmpi slt, %109, %10 : i32
    %111 = arith.select %110, %107, %78 : vector<1x128xf32>
    %112 = arith.select %110, %105, %79 : vector<1x128xf32>
    %113 = vector.extract_strided_slice %8 {offsets = [3, 0], sizes = [1, 512], strides = [1, 1]} : vector<8x512xf32> to vector<1x512xf32>
    %cst_30 = arith.constant dense<0.000000e+00> : vector<1x512xf32>
    %114 = tpu.matmul %111, %9, %cst_30 {dimension_numbers = #tpu.dot_dimension_numbers<[1], [0], [0], [1], [0, 0, 1, 1], [], []>} : vector<1x128xf32>, vector<128x512xf32>, vector<1x512xf32> -> vector<1x512xf32>
    %115 = arith.addf %113, %114 : vector<1x512xf32>
    %116 = vector.extract_strided_slice %115 {offsets = [0, 0], sizes = [1, 128], strides = [1, 1]} : vector<1x512xf32> to vector<1x128xf32>
    %117 = arith.negf %116 : vector<1x128xf32>
    %118 = math.exp %117 : vector<1x128xf32>
    %cst_31 = arith.constant 1.000000e+00 : f32
    %119 = vector.broadcast %cst_31 : f32 to vector<1x128xf32>
    %120 = arith.addf %119, %118 : vector<1x128xf32>
    %121 = arith.divf %119, %120 : vector<1x128xf32>
    %122 = vector.extract_strided_slice %115 {offsets = [0, 128], sizes = [1, 128], strides = [1, 1]} : vector<1x512xf32> to vector<1x128xf32>
    %123 = arith.negf %122 : vector<1x128xf32>
    %124 = math.exp %123 : vector<1x128xf32>
    %cst_32 = arith.constant 1.000000e+00 : f32
    %125 = vector.broadcast %cst_32 : f32 to vector<1x128xf32>
    %126 = arith.addf %125, %124 : vector<1x128xf32>
    %127 = arith.divf %125, %126 : vector<1x128xf32>
    %128 = vector.extract_strided_slice %115 {offsets = [0, 256], sizes = [1, 128], strides = [1, 1]} : vector<1x512xf32> to vector<1x128xf32>
    %129 = math.tanh %128 : vector<1x128xf32>
    %130 = vector.extract_strided_slice %115 {offsets = [0, 384], sizes = [1, 128], strides = [1, 1]} : vector<1x512xf32> to vector<1x128xf32>
    %131 = arith.negf %130 : vector<1x128xf32>
    %132 = math.exp %131 : vector<1x128xf32>
    %cst_33 = arith.constant 1.000000e+00 : f32
    %133 = vector.broadcast %cst_33 : f32 to vector<1x128xf32>
    %134 = arith.addf %133, %132 : vector<1x128xf32>
    %135 = arith.divf %133, %134 : vector<1x128xf32>
    %136 = arith.mulf %127, %112 : vector<1x128xf32>
    %137 = arith.mulf %121, %129 : vector<1x128xf32>
    %138 = arith.addf %136, %137 : vector<1x128xf32>
    %139 = math.tanh %138 : vector<1x128xf32>
    %140 = arith.mulf %135, %139 : vector<1x128xf32>
    %c3 = arith.constant 3 : index
    %c0_34 = arith.constant 0 : index
    %141 = vector.load %arg8[%c3, %c0_34] : memref<8x128xf32, #tpu.memory_space<vmem>>, vector<1x128xf32>
    tpu.vector_store %arg8[%c3, %c0_34], %140 {strides = array<i32>} : memref<8x128xf32, #tpu.memory_space<vmem>>, vector<1x128xf32>,
    %c3_i32 = arith.constant 3 : i32
    %142 = arith.addi %11, %c3_i32 : i32
    %143 = arith.cmpi slt, %142, %10 : i32
    %144 = arith.select %143, %140, %111 : vector<1x128xf32>
    %145 = arith.select %143, %138, %112 : vector<1x128xf32>
    %146 = vector.extract_strided_slice %8 {offsets = [4, 0], sizes = [1, 512], strides = [1, 1]} : vector<8x512xf32> to vector<1x512xf32>
    %cst_35 = arith.constant dense<0.000000e+00> : vector<1x512xf32>
    %147 = tpu.matmul %144, %9, %cst_35 {dimension_numbers = #tpu.dot_dimension_numbers<[1], [0], [0], [1], [0, 0, 1, 1], [], []>} : vector<1x128xf32>, vector<128x512xf32>, vector<1x512xf32> -> vector<1x512xf32>
    %148 = arith.addf %146, %147 : vector<1x512xf32>
    %149 = vector.extract_strided_slice %148 {offsets = [0, 0], sizes = [1, 128], strides = [1, 1]} : vector<1x512xf32> to vector<1x128xf32>
    %150 = arith.negf %149 : vector<1x128xf32>
    %151 = math.exp %150 : vector<1x128xf32>
    %cst_36 = arith.constant 1.000000e+00 : f32
    %152 = vector.broadcast %cst_36 : f32 to vector<1x128xf32>
    %153 = arith.addf %152, %151 : vector<1x128xf32>
    %154 = arith.divf %152, %153 : vector<1x128xf32>
    %155 = vector.extract_strided_slice %148 {offsets = [0, 128], sizes = [1, 128], strides = [1, 1]} : vector<1x512xf32> to vector<1x128xf32>
    %156 = arith.negf %155 : vector<1x128xf32>
    %157 = math.exp %156 : vector<1x128xf32>
    %cst_37 = arith.constant 1.000000e+00 : f32
    %158 = vector.broadcast %cst_37 : f32 to vector<1x128xf32>
    %159 = arith.addf %158, %157 : vector<1x128xf32>
    %160 = arith.divf %158, %159 : vector<1x128xf32>
    %161 = vector.extract_strided_slice %148 {offsets = [0, 256], sizes = [1, 128], strides = [1, 1]} : vector<1x512xf32> to vector<1x128xf32>
    %162 = math.tanh %161 : vector<1x128xf32>
    %163 = vector.extract_strided_slice %148 {offsets = [0, 384], sizes = [1, 128], strides = [1, 1]} : vector<1x512xf32> to vector<1x128xf32>
    %164 = arith.negf %163 : vector<1x128xf32>
    %165 = math.exp %164 : vector<1x128xf32>
    %cst_38 = arith.constant 1.000000e+00 : f32
    %166 = vector.broadcast %cst_38 : f32 to vector<1x128xf32>
    %167 = arith.addf %166, %165 : vector<1x128xf32>
    %168 = arith.divf %166, %167 : vector<1x128xf32>
    %169 = arith.mulf %160, %145 : vector<1x128xf32>
    %170 = arith.mulf %154, %162 : vector<1x128xf32>
    %171 = arith.addf %169, %170 : vector<1x128xf32>
    %172 = math.tanh %171 : vector<1x128xf32>
    %173 = arith.mulf %168, %172 : vector<1x128xf32>
    %c4 = arith.constant 4 : index
    %c0_39 = arith.constant 0 : index
    %174 = vector.load %arg8[%c4, %c0_39] : memref<8x128xf32, #tpu.memory_space<vmem>>, vector<1x128xf32>
    tpu.vector_store %arg8[%c4, %c0_39], %173 {strides = array<i32>} : memref<8x128xf32, #tpu.memory_space<vmem>>, vector<1x128xf32>,
    %c4_i32 = arith.constant 4 : i32
    %175 = arith.addi %11, %c4_i32 : i32
    %176 = arith.cmpi slt, %175, %10 : i32
    %177 = arith.select %176, %173, %144 : vector<1x128xf32>
    %178 = arith.select %176, %171, %145 : vector<1x128xf32>
    %179 = vector.extract_strided_slice %8 {offsets = [5, 0], sizes = [1, 512], strides = [1, 1]} : vector<8x512xf32> to vector<1x512xf32>
    %cst_40 = arith.constant dense<0.000000e+00> : vector<1x512xf32>
    %180 = tpu.matmul %177, %9, %cst_40 {dimension_numbers = #tpu.dot_dimension_numbers<[1], [0], [0], [1], [0, 0, 1, 1], [], []>} : vector<1x128xf32>, vector<128x512xf32>, vector<1x512xf32> -> vector<1x512xf32>
    %181 = arith.addf %179, %180 : vector<1x512xf32>
    %182 = vector.extract_strided_slice %181 {offsets = [0, 0], sizes = [1, 128], strides = [1, 1]} : vector<1x512xf32> to vector<1x128xf32>
    %183 = arith.negf %182 : vector<1x128xf32>
    %184 = math.exp %183 : vector<1x128xf32>
    %cst_41 = arith.constant 1.000000e+00 : f32
    %185 = vector.broadcast %cst_41 : f32 to vector<1x128xf32>
    %186 = arith.addf %185, %184 : vector<1x128xf32>
    %187 = arith.divf %185, %186 : vector<1x128xf32>
    %188 = vector.extract_strided_slice %181 {offsets = [0, 128], sizes = [1, 128], strides = [1, 1]} : vector<1x512xf32> to vector<1x128xf32>
    %189 = arith.negf %188 : vector<1x128xf32>
    %190 = math.exp %189 : vector<1x128xf32>
    %cst_42 = arith.constant 1.000000e+00 : f32
    %191 = vector.broadcast %cst_42 : f32 to vector<1x128xf32>
    %192 = arith.addf %191, %190 : vector<1x128xf32>
    %193 = arith.divf %191, %192 : vector<1x128xf32>
    %194 = vector.extract_strided_slice %181 {offsets = [0, 256], sizes = [1, 128], strides = [1, 1]} : vector<1x512xf32> to vector<1x128xf32>
    %195 = math.tanh %194 : vector<1x128xf32>
    %196 = vector.extract_strided_slice %181 {offsets = [0, 384], sizes = [1, 128], strides = [1, 1]} : vector<1x512xf32> to vector<1x128xf32>
    %197 = arith.negf %196 : vector<1x128xf32>
    %198 = math.exp %197 : vector<1x128xf32>
    %cst_43 = arith.constant 1.000000e+00 : f32
    %199 = vector.broadcast %cst_43 : f32 to vector<1x128xf32>
    %200 = arith.addf %199, %198 : vector<1x128xf32>
    %201 = arith.divf %199, %200 : vector<1x128xf32>
    %202 = arith.mulf %193, %178 : vector<1x128xf32>
    %203 = arith.mulf %187, %195 : vector<1x128xf32>
    %204 = arith.addf %202, %203 : vector<1x128xf32>
    %205 = math.tanh %204 : vector<1x128xf32>
    %206 = arith.mulf %201, %205 : vector<1x128xf32>
    %c5 = arith.constant 5 : index
    %c0_44 = arith.constant 0 : index
    %207 = vector.load %arg8[%c5, %c0_44] : memref<8x128xf32, #tpu.memory_space<vmem>>, vector<1x128xf32>
    tpu.vector_store %arg8[%c5, %c0_44], %206 {strides = array<i32>} : memref<8x128xf32, #tpu.memory_space<vmem>>, vector<1x128xf32>,
    %c5_i32 = arith.constant 5 : i32
    %208 = arith.addi %11, %c5_i32 : i32
    %209 = arith.cmpi slt, %208, %10 : i32
    %210 = arith.select %209, %206, %177 : vector<1x128xf32>
    %211 = arith.select %209, %204, %178 : vector<1x128xf32>
    %212 = vector.extract_strided_slice %8 {offsets = [6, 0], sizes = [1, 512], strides = [1, 1]} : vector<8x512xf32> to vector<1x512xf32>
    %cst_45 = arith.constant dense<0.000000e+00> : vector<1x512xf32>
    %213 = tpu.matmul %210, %9, %cst_45 {dimension_numbers = #tpu.dot_dimension_numbers<[1], [0], [0], [1], [0, 0, 1, 1], [], []>} : vector<1x128xf32>, vector<128x512xf32>, vector<1x512xf32> -> vector<1x512xf32>
    %214 = arith.addf %212, %213 : vector<1x512xf32>
    %215 = vector.extract_strided_slice %214 {offsets = [0, 0], sizes = [1, 128], strides = [1, 1]} : vector<1x512xf32> to vector<1x128xf32>
    %216 = arith.negf %215 : vector<1x128xf32>
    %217 = math.exp %216 : vector<1x128xf32>
    %cst_46 = arith.constant 1.000000e+00 : f32
    %218 = vector.broadcast %cst_46 : f32 to vector<1x128xf32>
    %219 = arith.addf %218, %217 : vector<1x128xf32>
    %220 = arith.divf %218, %219 : vector<1x128xf32>
    %221 = vector.extract_strided_slice %214 {offsets = [0, 128], sizes = [1, 128], strides = [1, 1]} : vector<1x512xf32> to vector<1x128xf32>
    %222 = arith.negf %221 : vector<1x128xf32>
    %223 = math.exp %222 : vector<1x128xf32>
    %cst_47 = arith.constant 1.000000e+00 : f32
    %224 = vector.broadcast %cst_47 : f32 to vector<1x128xf32>
    %225 = arith.addf %224, %223 : vector<1x128xf32>
    %226 = arith.divf %224, %225 : vector<1x128xf32>
    %227 = vector.extract_strided_slice %214 {offsets = [0, 256], sizes = [1, 128], strides = [1, 1]} : vector<1x512xf32> to vector<1x128xf32>
    %228 = math.tanh %227 : vector<1x128xf32>
    %229 = vector.extract_strided_slice %214 {offsets = [0, 384], sizes = [1, 128], strides = [1, 1]} : vector<1x512xf32> to vector<1x128xf32>
    %230 = arith.negf %229 : vector<1x128xf32>
    %231 = math.exp %230 : vector<1x128xf32>
    %cst_48 = arith.constant 1.000000e+00 : f32
    %232 = vector.broadcast %cst_48 : f32 to vector<1x128xf32>
    %233 = arith.addf %232, %231 : vector<1x128xf32>
    %234 = arith.divf %232, %233 : vector<1x128xf32>
    %235 = arith.mulf %226, %211 : vector<1x128xf32>
    %236 = arith.mulf %220, %228 : vector<1x128xf32>
    %237 = arith.addf %235, %236 : vector<1x128xf32>
    %238 = math.tanh %237 : vector<1x128xf32>
    %239 = arith.mulf %234, %238 : vector<1x128xf32>
    %c6 = arith.constant 6 : index
    %c0_49 = arith.constant 0 : index
    %240 = vector.load %arg8[%c6, %c0_49] : memref<8x128xf32, #tpu.memory_space<vmem>>, vector<1x128xf32>
    tpu.vector_store %arg8[%c6, %c0_49], %239 {strides = array<i32>} : memref<8x128xf32, #tpu.memory_space<vmem>>, vector<1x128xf32>,
    %c6_i32 = arith.constant 6 : i32
    %241 = arith.addi %11, %c6_i32 : i32
    %242 = arith.cmpi slt, %241, %10 : i32
    %243 = arith.select %242, %239, %210 : vector<1x128xf32>
    %244 = arith.select %242, %237, %211 : vector<1x128xf32>
    %245 = vector.extract_strided_slice %8 {offsets = [7, 0], sizes = [1, 512], strides = [1, 1]} : vector<8x512xf32> to vector<1x512xf32>
    %cst_50 = arith.constant dense<0.000000e+00> : vector<1x512xf32>
    %246 = tpu.matmul %243, %9, %cst_50 {dimension_numbers = #tpu.dot_dimension_numbers<[1], [0], [0], [1], [0, 0, 1, 1], [], []>} : vector<1x128xf32>, vector<128x512xf32>, vector<1x512xf32> -> vector<1x512xf32>
    %247 = arith.addf %245, %246 : vector<1x512xf32>
    %248 = vector.extract_strided_slice %247 {offsets = [0, 0], sizes = [1, 128], strides = [1, 1]} : vector<1x512xf32> to vector<1x128xf32>
    %249 = arith.negf %248 : vector<1x128xf32>
    %250 = math.exp %249 : vector<1x128xf32>
    %cst_51 = arith.constant 1.000000e+00 : f32
    %251 = vector.broadcast %cst_51 : f32 to vector<1x128xf32>
    %252 = arith.addf %251, %250 : vector<1x128xf32>
    %253 = arith.divf %251, %252 : vector<1x128xf32>
    %254 = vector.extract_strided_slice %247 {offsets = [0, 128], sizes = [1, 128], strides = [1, 1]} : vector<1x512xf32> to vector<1x128xf32>
    %255 = arith.negf %254 : vector<1x128xf32>
    %256 = math.exp %255 : vector<1x128xf32>
    %cst_52 = arith.constant 1.000000e+00 : f32
    %257 = vector.broadcast %cst_52 : f32 to vector<1x128xf32>
    %258 = arith.addf %257, %256 : vector<1x128xf32>
    %259 = arith.divf %257, %258 : vector<1x128xf32>
    %260 = vector.extract_strided_slice %247 {offsets = [0, 256], sizes = [1, 128], strides = [1, 1]} : vector<1x512xf32> to vector<1x128xf32>
    %261 = math.tanh %260 : vector<1x128xf32>
    %262 = vector.extract_strided_slice %247 {offsets = [0, 384], sizes = [1, 128], strides = [1, 1]} : vector<1x512xf32> to vector<1x128xf32>
    %263 = arith.negf %262 : vector<1x128xf32>
    %264 = math.exp %263 : vector<1x128xf32>
    %cst_53 = arith.constant 1.000000e+00 : f32
    %265 = vector.broadcast %cst_53 : f32 to vector<1x128xf32>
    %266 = arith.addf %265, %264 : vector<1x128xf32>
    %267 = arith.divf %265, %266 : vector<1x128xf32>
    %268 = arith.mulf %259, %244 : vector<1x128xf32>
    %269 = arith.mulf %253, %261 : vector<1x128xf32>
    %270 = arith.addf %268, %269 : vector<1x128xf32>
    %271 = math.tanh %270 : vector<1x128xf32>
    %272 = arith.mulf %267, %271 : vector<1x128xf32>
    %c7 = arith.constant 7 : index
    %c0_54 = arith.constant 0 : index
    %273 = vector.load %arg8[%c7, %c0_54] : memref<8x128xf32, #tpu.memory_space<vmem>>, vector<1x128xf32>
    tpu.vector_store %arg8[%c7, %c0_54], %272 {strides = array<i32>} : memref<8x128xf32, #tpu.memory_space<vmem>>, vector<1x128xf32>,
    %c7_i32 = arith.constant 7 : i32
    %274 = arith.addi %11, %c7_i32 : i32
    %275 = arith.cmpi slt, %274, %10 : i32
    %276 = arith.select %275, %272, %243 : vector<1x128xf32>
    %277 = arith.select %275, %270, %244 : vector<1x128xf32>
    %c0_55 = arith.constant 0 : index
    %c0_56 = arith.constant 0 : index
    %278 = vector.load %arg9[%c0_55, %c0_56] : memref<1x128xf32, #tpu.memory_space<vmem>>, vector<1x128xf32>
    tpu.vector_store %arg9[%c0_55, %c0_56], %276 {strides = array<i32>} : memref<1x128xf32, #tpu.memory_space<vmem>>, vector<1x128xf32>,
    %c0_57 = arith.constant 0 : index
    %c0_58 = arith.constant 0 : index
    %279 = vector.load %arg10[%c0_57, %c0_58] : memref<1x128xf32, #tpu.memory_space<vmem>>, vector<1x128xf32>
    tpu.vector_store %arg10[%c0_57, %c0_58], %277 {strides = array<i32>} : memref<1x128xf32, #tpu.memory_space<vmem>>, vector<1x128xf32>,
    return
  }
  func.func @transform_0(%arg0: i32, %arg1: memref<1xi32, #tpu.memory_space<smem>>) -> (i32, i32) {
    %c0_i32 = arith.constant 0 : i32
    %c0_i32_0 = arith.constant 0 : i32
    return %arg0, %c0_i32 : i32, i32
  }
  func.func @transform_1(%arg0: i32, %arg1: memref<1xi32, #tpu.memory_space<smem>>) -> (i32, i32) {
    %c0_i32 = arith.constant 0 : i32
    %c0_i32_0 = arith.constant 0 : i32
    %c0_i32_1 = arith.constant 0 : i32
    return %c0_i32, %c0_i32_0 : i32, i32
  }
  func.func @transform_2(%arg0: i32, %arg1: memref<1xi32, #tpu.memory_space<smem>>) -> (i32, i32) {
    %c0_i32 = arith.constant 0 : i32
    %c0_i32_0 = arith.constant 0 : i32
    %c0_i32_1 = arith.constant 0 : i32
    return %c0_i32, %c0_i32_0 : i32, i32
  }
  func.func @transform_3(%arg0: i32, %arg1: memref<1xi32, #tpu.memory_space<smem>>) -> (i32, i32) {
    %c0_i32 = arith.constant 0 : i32
    %c0_i32_0 = arith.constant 0 : i32
    %c0_i32_1 = arith.constant 0 : i32
    return %c0_i32, %c0_i32_0 : i32, i32
  }
  func.func @transform_4(%arg0: i32, %arg1: memref<1xi32, #tpu.memory_space<smem>>) -> (i32, i32) {
    %c0_i32 = arith.constant 0 : i32
    %c0_i32_0 = arith.constant 0 : i32
    %c0_i32_1 = arith.constant 0 : i32
    return %c0_i32, %c0_i32_0 : i32, i32
  }
  func.func @transform_5(%arg0: i32, %arg1: memref<1xi32, #tpu.memory_space<smem>>) -> (i32, i32) {
    %c0_i32 = arith.constant 0 : i32
    %c0_i32_0 = arith.constant 0 : i32
    %c0_i32_1 = arith.constant 0 : i32
    return %c0_i32, %c0_i32_0 : i32, i32
  }
  func.func @transform_6(%arg0: i32, %arg1: memref<1xi32, #tpu.memory_space<smem>>) -> (i32, i32) {
    %c0_i32 = arith.constant 0 : i32
    %c0_i32_0 = arith.constant 0 : i32
    return %arg0, %c0_i32 : i32, i32
  }
  func.func @transform_7(%arg0: i32, %arg1: memref<1xi32, #tpu.memory_space<smem>>) -> (i32, i32) {
    %c0_i32 = arith.constant 0 : i32
    %c0_i32_0 = arith.constant 0 : i32
    %c0_i32_1 = arith.constant 0 : i32
    return %c0_i32, %c0_i32_0 : i32, i32
  }
  func.func @transform_8(%arg0: i32, %arg1: memref<1xi32, #tpu.memory_space<smem>>) -> (i32, i32) {
    %c0_i32 = arith.constant 0 : i32
    %c0_i32_0 = arith.constant 0 : i32
    %c0_i32_1 = arith.constant 0 : i32
    return %c0_i32, %c0_i32_0 : i32, i32
  }
}

</mosaic_0001>

<bundles_post_ra>
// kernel: tpu_custom_call.1
= control target key start
LH: loop header
LB: loop body
LE: loop exit
PB: predicated region body
PF: predicated region fallthrough
CT: control target
= control target key end

     0   :  { %16 = vsyncpa [#allocation5], 0  ;;  %s3218_s0 = inlined_call_operand.<no memory space> [shape: s32[1], index: 0, kind: input, shape index: {}]   ;;  %s3219_s1 = inlined_call_operand.hbm [shape: f32[8,128], index: 1, kind: input, shape index: {}]   ;;  %s3220_s2 = inlined_call_operand.vmem [shape: f32[1,128], index: 2, kind: input, shape index: {}]   ;;  %s3221_s3 = inlined_call_operand.vmem [shape: f32[1,128], index: 3, kind: input, shape index: {}]   ;;  %s3222_s4 = inlined_call_operand.hbm [shape: f32[128,512], index: 4, kind: input, shape index: {}]   ;;  %s3223_s5 = inlined_call_operand.hbm [shape: f32[128,512], index: 5, kind: input, shape index: {}]   ;;  %s3224_s6 = inlined_call_operand.vmem [shape: f32[1,512], index: 6, kind: input, shape index: {}]   ;;  %s3225_s7 = inlined_call_operand.hbm [shape: f32[8,128], index: 7, kind: output, shape index: {0}]   ;;  %s3226_s8 = inlined_call_operand.hbm [shape: f32[1,128], index: 8, kind: output, shape index: {1}]   ;;  %s3227_s9 = inlined_call_operand.hbm [shape: f32[1,128], index: 9, kind: output, shape index: {2}]  }
   0x1   :  { %17 = vsyncpa [#allocation8], 0 }
   0x2   :  { %18 = vsyncpa [#allocation6], 0  ;;  %s39_s11 = sshll.u32 %s3222_s4, 4  ;;  %s40_s11 = int_to_ptr.hbm [resolvable:$true] %s39_s11 }
   0x3   :  { %19 = vsyncpa [#allocation12], 0  ;;  %s2118_s12 = smov [#allocation7]   ;;  %s25_s16 = sshll.u32 %s3219_s1, 4  ;;  %s26_s16 = int_to_ptr.hbm [resolvable:$true] %s25_s16 }
   0x4   :  { %s41_s13 = sshll.u32 %s2118_s12, 4  ;;  %s2119_s17 = smov 512   ;;  %s42_s13 = int_to_ptr.vmem [resolvable:$true] %s41_s13 }
   0x5   :  { %s2120_s18 = smov 32   ;;  %s2121_s19 = smov [#allocation4]  }
   0x6   :  { %47 = dma.hbm_to_vmem [thread:$0]  %s40_s11, 8192, %s42_s13, [#allocation8], %s2119_s17, %s2119_s17, %s2120_s18  }
   0x7   :  { %s27_s20 = sshll.u32 %s2121_s19, 4  ;;  %s52_s23 = sshll.u32 %s3223_s5, 4  ;;  %s28_s20 = int_to_ptr.vmem [resolvable:$true] %s27_s20  ;;  %s53_s23 = int_to_ptr.hbm [resolvable:$true] %s52_s23 }
   0x8   :  { %30 = dma.hbm_to_vmem [thread:$0]  %s26_s16, 128, %s28_s20, [#allocation5]  }
   0x9   :  { %s2122_s4 = smov [#allocation9]  }
   0xa   :  { %s54_s24 = sshll.u32 %s2122_s4, 4  ;;  %s55_s24 = int_to_ptr.vmem [resolvable:$true] %s54_s24 }
   0xb   :  { %60 = dma.hbm_to_vmem [thread:$0]  %s53_s23, 8192, %s55_s24, [#allocation8], %s2119_s17, %s2119_s17, %s2120_s18  }
   0xc   :  { %2110 = dma.done.wait [#allocation5], 128  }
   0xd   :  { %2111 = vsyncadd [#allocation5], 4294967168 }
   0xe   :  { %2112 = dma.done.wait [#allocation8], 16384  }
   0xf   :  { %2113 = vsyncadd [#allocation8], 4294950912  ;;  %v144_v0 = vld [vmem:[#allocation7 + $0x1e0] sm:$0xff]  ;;  %v145_v1 = vld [vmem:[#allocation7 + $0x1e8] sm:$0xff]  ;;  %p1737_p0 = scmp.gt.s32.totalorder %s3218_s0, 0  ;;  %p1741_p1 = scmp.gt.s32.totalorder %s3218_s0, 1 }
  0x10   :  { %v147_v2 = vld [vmem:[#allocation7 + $0x1f8] sm:$0xff]  ;;  %158 = vmatpush.msra.mxu0 %v144_v0  ;;  %178 = vmatpush.msra.mxu1 %v145_v1  ;;  %v140_v3 = vld [vmem:[#allocation7 + $0x1c0] sm:$0xff]  ;;  %v141_v4 = vld [vmem:[#allocation7 + $0x1c8] sm:$0xff]  ;;  %p1745_p2 = scmp.gt.s32.totalorder %s3218_s0, 2  ;;  %p1749_p3 = scmp.gt.s32.totalorder %s3218_s0, 3 }
  0x11   :  { %v143_v5 = vld [vmem:[#allocation7 + $0x1d8] sm:$0xff]  ;;  %218 = vmatpush.msra.mxu3 %v147_v2  ;;  %v136_v6 = vld [vmem:[#allocation7 + $0x1a0] sm:$0xff]  ;;  %v137_v7 = vld [vmem:[#allocation7 + $0x1a8] sm:$0xff]  ;;  %s455_s28 = scalar_select %p1737_p0, 1, 0 }
  0x12   :  { %159 = vmatpush.msra.mxu0 %v140_v3  ;;  %179 = vmatpush.msra.mxu1 %v141_v4  ;;  %v139_v8 = vld [vmem:[#allocation7 + $0x1b8] sm:$0xff]  ;;  %v132_v9 = vld [vmem:[#allocation7 + $0x180] sm:$0xff]  ;;  %v133_v10 = vld [vmem:[#allocation7 + $0x188] sm:$0xff]  ;;  %s625_s10 = scalar_select %p1741_p1, 1, 0 }
  0x13   :  { %219 = vmatpush.msra.mxu3 %v143_v5  ;;  %v135_v11 = vld [vmem:[#allocation7 + $0x198] sm:$0xff]  ;;  %v146_v12 = vld [vmem:[#allocation7 + $0x1f0] sm:$0xff]  ;;  %v128_v13 = vld [vmem:[#allocation7 + $0x160] sm:$0xff]  ;;  %s801_s13 = scalar_select %p1745_p2, 1, 0 }
  0x14   :  { %160 = vmatpush.msra.mxu0 %v136_v6  ;;  %180 = vmatpush.msra.mxu1 %v137_v7  ;;  %v129_v14 = vld [vmem:[#allocation7 + $0x168] sm:$0xff]  ;;  %v142_v15 = vld [vmem:[#allocation7 + $0x1d0] sm:$0xff]  ;;  %v131_v16 = vld [vmem:[#allocation7 + $0x178] sm:$0xff]  ;;  %s976_s16 = scalar_select %p1749_p3, 1, 0 }
  0x15   :  { %220 = vmatpush.msra.mxu3 %v139_v8  ;;  %198 = vmatpush.msra.mxu2 %v146_v12  ;;  %v138_v17 = vld [vmem:[#allocation7 + $0x1b0] sm:$0xff]  ;;  %v124_v18 = vld [vmem:[#allocation7 + $0x140] sm:$0xff]  ;;  %v125_v19 = vld [vmem:[#allocation7 + $0x148] sm:$0xff]  ;;  %p1753_p4 = scmp.gt.s32.totalorder %s3218_s0, 4  ;;  %p1757_p5 = scmp.gt.s32.totalorder %s3218_s0, 5 }
  0x16   :  { %161 = vmatpush.msra.mxu0 %v132_v9  ;;  %181 = vmatpush.msra.mxu1 %v133_v10  ;;  %v127_v20 = vld [vmem:[#allocation7 + $0x158] sm:$0xff]  ;;  %v134_v21 = vld [vmem:[#allocation7 + $0x190] sm:$0xff]  ;;  %v120_v22 = vld [vmem:[#allocation7 + $0x120] sm:$0xff]  ;;  %p1761_p6 = scmp.gt.s32.totalorder %s3218_s0, 6  ;;  %p1765_p7 = scmp.gt.s32.totalorder %s3218_s0, 7 }
  0x17   :  { %221 = vmatpush.msra.mxu3 %v135_v11  ;;  %199 = vmatpush.msra.mxu2 %v142_v15  ;;  %v121_v23 = vld [vmem:[#allocation7 + $0x128] sm:$0xff]  ;;  %v123_v24 = vld [vmem:[#allocation7 + $0x138] sm:$0xff]  ;;  %v130_v25 = vld [vmem:[#allocation7 + $0x170] sm:$0xff]  ;;  %s1151_s19 = scalar_select %p1753_p4, 1, 0 }
  0x18   :  { %162 = vmatpush.msra.mxu0 %v128_v13  ;;  %182 = vmatpush.msra.mxu1 %v129_v14  ;;  %v116_v26 = vld [vmem:[#allocation7 + $0x100] sm:$0xff]  ;;  %v117_v27 = vld [vmem:[#allocation7 + $0x108] sm:$0xff]  ;;  %v119_v28 = vld [vmem:[#allocation7 + $0x118] sm:$0xff]  ;;  %s1326_s22 = scalar_select %p1757_p5, 1, 0 }
  0x19   :  { %222 = vmatpush.msra.mxu3 %v131_v16  ;;  %200 = vmatpush.msra.mxu2 %v138_v17  ;;  %v126_v29 = vld [vmem:[#allocation7 + $0x150] sm:$0xff]  ;;  %v112_v30 = vld [vmem:[#allocation7 + $0xe0] sm:$0xff]  ;;  %v113_v31 = vld [vmem:[#allocation7 + $0xe8] sm:$0xff]  ;;  %s1501_s24 = scalar_select %p1761_p6, 1, 0 }
  0x1a   :  { %163 = vmatpush.msra.mxu0 %v124_v18  ;;  %183 = vmatpush.msra.mxu1 %v125_v19  ;;  %v115_v32 = vld [vmem:[#allocation7 + $0xf8] sm:$0xff]  ;;  %v122_v33 = vld [vmem:[#allocation7 + $0x130] sm:$0xff]  ;;  %v108_v34 = vld [vmem:[#allocation7 + $0xc0] sm:$0xff]  ;;  %s2123_s0 = smov [#allocation10]   ;;  %s2125_s11 = smov [#allocation13]  }
  0x1b   :  { %223 = vmatpush.msra.mxu3 %v127_v20  ;;  %201 = vmatpush.msra.mxu2 %v134_v21  ;;  %v109_v35 = vld [vmem:[#allocation7 + $0xc8] sm:$0xff]  ;;  %v111_v36 = vld [vmem:[#allocation7 + $0xd8] sm:$0xff]  ;;  %v118_v37 = vld [vmem:[#allocation7 + $0x110] sm:$0xff]  ;;  %s1690_s25 = sshll.u32 %s2123_s0, 4  ;;  %s1712_s12 = sshll.u32 %s2125_s11, 4  ;;  %s1691_s25 = int_to_ptr.vmem [resolvable:$true] %s1690_s25  ;;  %s1713_s12 = int_to_ptr.vmem [resolvable:$true] %s1712_s12 }
  0x1c   :  { %164 = vmatpush.msra.mxu0 %v120_v22  ;;  %184 = vmatpush.msra.mxu1 %v121_v23  ;;  %v104_v38 = vld [vmem:[#allocation7 + $0xa0] sm:$0xff]  ;;  %v105_v39 = vld [vmem:[#allocation7 + $0xa8] sm:$0xff]  ;;  %v107_v40 = vld [vmem:[#allocation7 + $0xb8] sm:$0xff]  ;;  %s1714_s15 = sshll.u32 %s3227_s9, 4  ;;  %s1715_s15 = int_to_ptr.hbm [resolvable:$true] %s1714_s15 }
  0x1d   :  { %224 = vmatpush.msra.mxu3 %v123_v24  ;;  %202 = vmatpush.msra.mxu2 %v130_v25  ;;  %v114_v41 = vld [vmem:[#allocation7 + $0xf0] sm:$0xff]  ;;  %v100_v42 = vld [vmem:[#allocation7 + $0x80] sm:$0xff]  ;;  %v101_v43 = vld [vmem:[#allocation7 + $0x88] sm:$0xff] }
  0x1e   :  { %165 = vmatpush.msra.mxu0 %v116_v26  ;;  %185 = vmatpush.msra.mxu1 %v117_v27  ;;  %v103_v44 = vld [vmem:[#allocation7 + $0x98] sm:$0xff]  ;;  %v110_v45 = vld [vmem:[#allocation7 + $0xd0] sm:$0xff]  ;;  %v96_v46 = vld [vmem:[#allocation7 + $0x60] sm:$0xff] }
  0x1f   :  { %225 = vmatpush.msra.mxu3 %v119_v28  ;;  %203 = vmatpush.msra.mxu2 %v126_v29  ;;  %v97_v47 = vld [vmem:[#allocation7 + $0x68] sm:$0xff]  ;;  %v99_v48 = vld [vmem:[#allocation7 + $0x78] sm:$0xff]  ;;  %v106_v49 = vld [vmem:[#allocation7 + $0xb0] sm:$0xff] }
  0x20   :  { %166 = vmatpush.msra.mxu0 %v112_v30  ;;  %186 = vmatpush.msra.mxu1 %v113_v31  ;;  %v92_v50 = vld [vmem:[#allocation7 + $0x40] sm:$0xff]  ;;  %v93_v51 = vld [vmem:[#allocation7 + $0x48] sm:$0xff]  ;;  %v95_v52 = vld [vmem:[#allocation7 + $0x58] sm:$0xff] }
  0x21   :  { %226 = vmatpush.msra.mxu3 %v115_v32  ;;  %204 = vmatpush.msra.mxu2 %v122_v33  ;;  %v102_v53 = vld [vmem:[#allocation7 + $0x90] sm:$0xff]  ;;  %v88_v54 = vld [vmem:[#allocation7 + $0x20] sm:$0xff]  ;;  %v89_v55 = vld [vmem:[#allocation7 + $0x28] sm:$0xff] }
  0x22   :  { %167 = vmatpush.msra.mxu0 %v108_v34  ;;  %187 = vmatpush.msra.mxu1 %v109_v35  ;;  %v91_v56 = vld [vmem:[#allocation7 + $0x38] sm:$0xff]  ;;  %v98_v57 = vld [vmem:[#allocation7 + $0x70] sm:$0xff]  ;;  %v84_v58 = vld [vmem:[#allocation7] sm:$0xff] }
  0x23   :  { %227 = vmatpush.msra.mxu3 %v111_v36  ;;  %205 = vmatpush.msra.mxu2 %v118_v37  ;;  %v85_v59 = vld [vmem:[#allocation7 + $0x8] sm:$0xff]  ;;  %v87_v60 = vld [vmem:[#allocation7 + $0x18] sm:$0xff]  ;;  %v2185_v61 = vld [vmem:[#allocation9 + $0x1e0] sm:$0xff] }
  0x24   :  { %168 = vmatpush.msra.mxu0 %v104_v38  ;;  %188 = vmatpush.msra.mxu1 %v105_v39  ;;  %v2187_v62 = vld [vmem:[#allocation9 + $0x1e8] sm:$0xff]  ;;  %v2189_v63 = vld [vmem:[#allocation9 + $0x1f8] sm:$0xff]  ;;  %v2191_v0 = vld [vmem:[#allocation9 + $0x1c0] sm:$0xff] }
  0x25   :  { %228 = vmatpush.msra.mxu3 %v107_v40  ;;  %206 = vmatpush.msra.mxu2 %v114_v41  ;;  %v94_v1 = vld [vmem:[#allocation7 + $0x50] sm:$0xff]  ;;  %v2194_v2 = vld [vmem:[#allocation9 + $0x1c8] sm:$0xff]  ;;  %v2196_v3 = vld [vmem:[#allocation9 + $0x1d8] sm:$0xff] }
  0x26   :  { %169 = vmatpush.msra.mxu0 %v100_v42  ;;  %189 = vmatpush.msra.mxu1 %v101_v43  ;;  %v2200_v4 = vld [vmem:[#allocation9 + $0x1a0] sm:$0xff]  ;;  %v90_v5 = vld [vmem:[#allocation7 + $0x30] sm:$0xff]  ;;  %v2203_v6 = vld [vmem:[#allocation9 + $0x1a8] sm:$0xff] }
  0x27   :  { %229 = vmatpush.msra.mxu3 %v103_v44  ;;  %207 = vmatpush.msra.mxu2 %v110_v45  ;;  %v2205_v7 = vld [vmem:[#allocation9 + $0x1b8] sm:$0xff]  ;;  %v2209_v8 = vld [vmem:[#allocation9 + $0x180] sm:$0xff]  ;;  %v86_v9 = vld [vmem:[#allocation7 + $0x10] sm:$0xff] }
  0x28   :  { %170 = vmatpush.msra.mxu0 %v96_v46  ;;  %190 = vmatpush.msra.mxu1 %v97_v47  ;;  %v2212_v10 = vld [vmem:[#allocation9 + $0x188] sm:$0xff]  ;;  %v2214_v11 = vld [vmem:[#allocation9 + $0x198] sm:$0xff]  ;;  %v2218_v12 = vld [vmem:[#allocation9 + $0x160] sm:$0xff] }
  0x29   :  { %230 = vmatpush.msra.mxu3 %v99_v48  ;;  %208 = vmatpush.msra.mxu2 %v106_v49  ;;  %v2220_v13 = vld [vmem:[#allocation9 + $0x1f0] sm:$0xff]  ;;  %v2223_v14 = vld [vmem:[#allocation9 + $0x168] sm:$0xff]  ;;  %v2225_v15 = vld [vmem:[#allocation9 + $0x178] sm:$0xff] }
  0x2a   :  { %171 = vmatpush.msra.mxu0 %v92_v50  ;;  %191 = vmatpush.msra.mxu1 %v93_v51  ;;  %v2229_v16 = vld [vmem:[#allocation9 + $0x140] sm:$0xff]  ;;  %v2231_v17 = vld [vmem:[#allocation9 + $0x1d0] sm:$0xff]  ;;  %v2235_v18 = vld [vmem:[#allocation9 + $0x148] sm:$0xff] }
  0x2b   :  { %231 = vmatpush.msra.mxu3 %v95_v52  ;;  %209 = vmatpush.msra.mxu2 %v102_v53  ;;  %v2237_v19 = vld [vmem:[#allocation9 + $0x158] sm:$0xff]  ;;  %v2241_v20 = vld [vmem:[#allocation9 + $0x120] sm:$0xff]  ;;  %v2243_v21 = vld [vmem:[#allocation9 + $0x1b0] sm:$0xff] }
  0x2c   :  { %172 = vmatpush.msra.mxu0 %v88_v54  ;;  %192 = vmatpush.msra.mxu1 %v89_v55  ;;  %v79_v22 = vld [vmem:[%s3220_s2] sm:$0x1]  ;;  %v2250_v23 = vld [vmem:[#allocation9 + $0x128] sm:$0xff]  ;;  %v2256_v25 = vld [vmem:[#allocation9 + $0x100] sm:$0xff]  ;;  %s1676_s2 = scalar_select %p1765_p7, 1, 0 }
  0x2d   :  { %232 = vmatpush.msra.mxu3 %v91_v56  ;;  %210 = vmatpush.msra.mxu2 %v98_v57  ;;  %v2252_v24 = vld [vmem:[#allocation9 + $0x138] sm:$0xff]  ;;  %80 = vst [vmem:[#allocation11] sm:$0x1] %v79_v22  ;;  %v2258_v26 = vld [vmem:[#allocation9 + $0x190] sm:$0xff]  ;;  %v2262_v27 = vld [vmem:[#allocation9 + $0x108] sm:$0xff] }
  0x2e   :  { %173 = vmatpush.msra.mxu0 %v84_v58  ;;  %193 = vmatpush.msra.mxu1 %v85_v59  ;;  %v2264_v28 = vld [vmem:[#allocation9 + $0x118] sm:$0xff]  ;;  %v2268_v29 = vld [vmem:[#allocation9 + $0xe0] sm:$0xff]  ;;  %v2270_v30 = vld [vmem:[#allocation9 + $0x170] sm:$0xff] }
  0x2f   :  { %233 = vmatpush.msra.mxu3 %v87_v60  ;;  %211 = vmatpush.msra.mxu2 %v94_v1  ;;  %v2274_v31 = vld [vmem:[#allocation9 + $0xe8] sm:$0xff]  ;;  %v2276_v32 = vld [vmem:[#allocation9 + $0xf8] sm:$0xff]  ;;  %v2280_v33 = vld [vmem:[#allocation9 + $0xc0] sm:$0xff] }
  0x30   :  { %306 = vmatpush.msrb.mxu0 %v2185_v61  ;;  %326 = vmatpush.msrb.mxu1 %v2187_v62  ;;  %v2282_v34 = vld [vmem:[#allocation9 + $0x150] sm:$0xff]  ;;  %v2286_v35 = vld [vmem:[#allocation9 + $0xc8] sm:$0xff]  ;;  %v2288_v36 = vld [vmem:[#allocation9 + $0xd8] sm:$0xff] }
  0x31   :  { %366 = vmatpush.msrb.mxu3 %v2189_v63  ;;  %212 = vmatpush.msra.mxu2 %v90_v5  ;;  %3349 = vst [vmem:[#allocation18_spill] sm:$0xff] %v2288_v36  ;;  %v2292_v37 = vld [vmem:[#allocation9 + $0xa0] sm:$0xff]  ;;  %v2294_v38 = vld [vmem:[#allocation9 + $0x130] sm:$0xff]  ;;  %v2298_v39 = vld [vmem:[#allocation9 + $0xa8] sm:$0xff] }
  0x32   :  { %307 = vmatpush.msrb.mxu0 %v2191_v0  ;;  %327 = vmatpush.msrb.mxu1 %v2194_v2  ;;  %3350 = vst [vmem:[#allocation19_spill] sm:$0xff] %v2292_v37  ;;  %v2300_v40 = vld [vmem:[#allocation9 + $0xb8] sm:$0xff]  ;;  %v2304_v41 = vld [vmem:[#allocation9 + $0x80] sm:$0xff]  ;;  %v2308_v43 = vld [vmem:[#allocation9 + $0x88] sm:$0xff] }
  0x33   :  { %367 = vmatpush.msrb.mxu3 %v2196_v3  ;;  %213 = vmatpush.msra.mxu2 %v86_v9  ;;  %3351 = vst [vmem:[#allocation20_spill] sm:$0xff] %v2298_v39  ;;  %v83_v42 = vld [vmem:[#allocation4] sm:$0xff]  ;;  %v2315_v45 = vld [vmem:[#allocation9 + $0x110] sm:$0xff]  ;;  %v2317_v46 = vld [vmem:[#allocation9 + $0x60] sm:$0xff] }
  0x34   :  { %308 = vmatpush.msrb.mxu0 %v2200_v4  ;;  %328 = vmatpush.msrb.mxu1 %v2203_v6  ;;  %3352 = vst [vmem:[#allocation21_spill] sm:$0xff] %v2300_v40  ;;  %v2310_v44 = vld [vmem:[#allocation9 + $0x98] sm:$0xff]  ;;  %v2321_v47 = vld [vmem:[#allocation9 + $0x68] sm:$0xff]  ;;  %v2325_v49 = vld [vmem:[#allocation9 + $0xf0] sm:$0xff] }
  0x35   :  { %368 = vmatpush.msrb.mxu3 %v2205_v7  ;;  %346 = vmatpush.msrb.mxu2 %v2220_v13  ;;  %3353 = vst [vmem:[#allocation22_spill] sm:$0xff] %v2304_v41  ;;  %v2323_v48 = vld [vmem:[#allocation9 + $0x78] sm:$0xff]  ;;  %v2327_v50 = vld [vmem:[#allocation9 + $0x40] sm:$0xff]  ;;  %v2331_v51 = vld [vmem:[#allocation9 + $0x48] sm:$0xff] }
  0x36   :  { %309 = vmatpush.msrb.mxu0 %v2209_v8  ;;  %329 = vmatpush.msrb.mxu1 %v2212_v10  ;;  %3354 = vst [vmem:[#allocation23_spill] sm:$0xff] %v2308_v43  ;;  %v2333_v52 = vld [vmem:[#allocation9 + $0x58] sm:$0xff]  ;;  %v2337_v53 = vld [vmem:[#allocation9 + $0xd0] sm:$0xff]  ;;  %v2339_v54 = vld [vmem:[#allocation9 + $0x20] sm:$0xff] }
  0x37   :  { %369 = vmatpush.msrb.mxu3 %v2214_v11  ;;  %347 = vmatpush.msrb.mxu2 %v2231_v17  ;;  %3355 = vst [vmem:[#allocation24_spill] sm:$0xff] %v2310_v44  ;;  %v2343_v55 = vld [vmem:[#allocation9 + $0x28] sm:$0xff]  ;;  %v2345_v56 = vld [vmem:[#allocation9 + $0x38] sm:$0xff]  ;;  %v2349_v57 = vld [vmem:[#allocation9 + $0xb0] sm:$0xff] }
  0x38   :  { %310 = vmatpush.msrb.mxu0 %v2218_v12  ;;  %330 = vmatpush.msrb.mxu1 %v2223_v14  ;;  %3356 = vst [vmem:[#allocation25_spill] sm:$0xff] %v2317_v46  ;;  %v2351_v58 = vld [vmem:[#allocation9] sm:$0xff]  ;;  %v2355_v59 = vld [vmem:[#allocation9 + $0x8] sm:$0xff]  ;;  %v2357_v60 = vld [vmem:[#allocation9 + $0x18] sm:$0xff] }
  0x39   :  { %370 = vmatpush.msrb.mxu3 %v2225_v15  ;;  %348 = vmatpush.msrb.mxu2 %v2243_v21  ;;  %3357 = vst [vmem:[#allocation26_spill] sm:$0xff] %v2321_v47  ;;  %v2361_v1 = vld [vmem:[#allocation11] sm:$0x1]  ;;  %v2365_v5 = vld [vmem:[#allocation9 + $0x90] sm:$0xff] }
  0x3a   :  { %311 = vmatpush.msrb.mxu0 %v2229_v16  ;;  %331 = vmatpush.msrb.mxu1 %v2235_v18  ;;  %3358 = vst [vmem:[#allocation27_spill] sm:$0xff] %v2323_v48  ;;  %v2371_v9 = vld [vmem:[#allocation9 + $0x70] sm:$0xff] }
  0x3b   :  { %371 = vmatpush.msrb.mxu3 %v2237_v19  ;;  %349 = vmatpush.msrb.mxu2 %v2258_v26  ;;  %3359 = vst [vmem:[#allocation28_spill] sm:$0xff] %v2327_v50  ;;  %v2375_v22 = vld [vmem:[#allocation9 + $0x50] sm:$0xff] }
  0x3c   :  { %312 = vmatpush.msrb.mxu0 %v2241_v20  ;;  %332 = vmatpush.msrb.mxu1 %v2250_v23  ;;  %3360 = vst [vmem:[#allocation29_spill] sm:$0xff] %v2331_v51 }
  0x3d   :  { %372 = vmatpush.msrb.mxu3 %v2252_v24  ;;  %350 = vmatpush.msrb.mxu2 %v2270_v30  ;;  %3361 = vst [vmem:[#allocation30_spill] sm:$0xff] %v2333_v52 }
  0x3e   :  { %313 = vmatpush.msrb.mxu0 %v2256_v25  ;;  %333 = vmatpush.msrb.mxu1 %v2262_v27  ;;  %3362 = vst [vmem:[#allocation31_spill] sm:$0xff] %v2339_v54 }
  0x3f   :  { %373 = vmatpush.msrb.mxu3 %v2264_v28  ;;  %351 = vmatpush.msrb.mxu2 %v2282_v34  ;;  %3363 = vst [vmem:[#allocation32_spill] sm:$0xff] %v2343_v55 }
  0x40   :  { %314 = vmatpush.msrb.mxu0 %v2268_v29  ;;  %334 = vmatpush.msrb.mxu1 %v2274_v31  ;;  %3364 = vst [vmem:[#allocation33_spill] sm:$0xff] %v2345_v56 }
  0x41   :  { %374 = vmatpush.msrb.mxu3 %v2276_v32  ;;  %352 = vmatpush.msrb.mxu2 %v2294_v38  ;;  %3365 = vst [vmem:[#allocation34_spill] sm:$0xff] %v2349_v57 }
  0x42   :  { %315 = vmatpush.msrb.mxu0 %v2280_v33  ;;  %335 = vmatpush.msrb.mxu1 %v2286_v35  ;;  %3366 = vst [vmem:[#allocation35_spill] sm:$0xff] %v2351_v58 }
  0x43   :  { %375 = vmatpush.msrb.mxu3 %v2288_v36  ;;  %194 = vmatmul.f32.vlgmr.msra.gmra.mxu1 %v83_v42  ;;  %3367 = vst [vmem:[#allocation36_spill] sm:$0xff] %v2355_v59 }
  0x44   :  { %316 = vmatpush.msrb.mxu0 %v2292_v37  ;;  %336 = vmatpush.msrb.mxu1 %v2298_v39  ;;  %3368 = vst [vmem:[#allocation37_spill] sm:$0xff] %v2357_v60 }
  0x45   :  { %376 = vmatpush.msrb.mxu3 %v2300_v40  ;;  %174 = vmatmul.f32.vlgmr.msra.gmra.mxu0 %v83_v42  ;;  %3369 = vst [vmem:[#allocation38_spill] sm:$0xff] %v2361_v1 }
  0x46   :  { %317 = vmatpush.msrb.mxu0 %v2304_v41  ;;  %337 = vmatpush.msrb.mxu1 %v2308_v43  ;;  %3370 = vst [vmem:[#allocation39_spill] sm:$0xff] %v2365_v5 }
  0x47   :  { %377 = vmatpush.msrb.mxu3 %v2310_v44  ;;  %353 = vmatpush.msrb.mxu2 %v2315_v45  ;;  %3371 = vst [vmem:[#allocation40_spill] sm:$0xff] %v2371_v9 }
  0x48   :  { %234 = vmatmul.f32.vlgmr.msra.gmra.mxu3 %v83_v42  ;;  %318 = vmatpush.msrb.mxu0 %v2317_v46  ;;  %3372 = vst [vmem:[#allocation41_spill] sm:$0xff] %v2375_v22 }
  0x49   :  { %338 = vmatpush.msrb.mxu1 %v2321_v47  ;;  %378 = vmatpush.msrb.mxu3 %v2323_v48 }
  0x4a   :  { %354 = vmatpush.msrb.mxu2 %v2325_v49  ;;  %319 = vmatpush.msrb.mxu0 %v2327_v50 }
  0x4b   :  { %339 = vmatpush.msrb.mxu1 %v2331_v51  ;;  %379 = vmatpush.msrb.mxu3 %v2333_v52 }
  0x4c   :  { %355 = vmatpush.msrb.mxu2 %v2337_v53  ;;  %320 = vmatpush.msrb.mxu0 %v2339_v54 }
  0x4d   :  { %340 = vmatpush.msrb.mxu1 %v2343_v55  ;;  %380 = vmatpush.msrb.mxu3 %v2345_v56 }
  0x4e   :  { %356 = vmatpush.msrb.mxu2 %v2349_v57  ;;  %321 = vmatpush.msrb.mxu0 %v2351_v58 }
  0x4f   :  { %341 = vmatpush.msrb.mxu1 %v2355_v59  ;;  %381 = vmatpush.msrb.mxu3 %v2357_v60  ;;  %v2380_v60 = vld [vmem:[#allocation9 + $0x30] sm:$0xff] }
  0x50   :  { %322 = vmatmul.f32.vlgmr.msrb.gmra.mxu0 %v2361_v1  ;;  %342 = vmatmul.f32.vlgmr.msrb.gmra.mxu1 %v2361_v1  ;;  %3373 = vst [vmem:[#allocation42_spill] sm:$0xff] %v2380_v60  ;;  %v2386_v59 = vld [vmem:[#allocation9 + $0x10] sm:$0xff] }
  0x51   :  { %357 = vmatpush.msrb.mxu2 %v2365_v5  ;;  %382 = vmatmul.f32.vlgmr.msrb.gmra.mxu3 %v2361_v1  ;;  %3374 = vst [vmem:[#allocation43_spill] sm:$0xff] %v2386_v59 }
  0x52   :  { %214 = vmatmul.f32.vlgmr.msra.gmra.mxu2 %v83_v42  ;;  %460 = vmatpush.msra.mxu0 %v2185_v61  ;;  %v3375_v42 = vld [vmem:[#allocation36_spill] sm:$0xff] }
  0x53   :  { %358 = vmatpush.msrb.mxu2 %v2371_v9  ;;  %480 = vmatpush.msra.mxu1 %v2187_v62 }
  0x54   :  { %520 = vmatpush.msra.mxu3 %v2189_v63  ;;  %461 = vmatpush.msra.mxu0 %v2191_v0 }
  0x55   :  { %359 = vmatpush.msrb.mxu2 %v2375_v22  ;;  %481 = vmatpush.msra.mxu1 %v2194_v2 }
  0x56   :  { %521 = vmatpush.msra.mxu3 %v2196_v3  ;;  %462 = vmatpush.msra.mxu0 %v2200_v4 }
  0x57   :  { %360 = vmatpush.msrb.mxu2 %v2380_v60  ;;  %482 = vmatpush.msra.mxu1 %v2203_v6 }
  0x58   :  { %522 = vmatpush.msra.mxu3 %v2205_v7  ;;  %463 = vmatpush.msra.mxu0 %v2209_v8 }
  0x59   :  { %361 = vmatpush.msrb.mxu2 %v2386_v59  ;;  %483 = vmatpush.msra.mxu1 %v2212_v10 }
  0x5a   :  { %362 = vmatmul.f32.vlgmr.msrb.gmra.mxu2 %v2361_v1  ;;  %523 = vmatpush.msra.mxu3 %v2214_v11  ;;  %v3376_v1 = vld [vmem:[#allocation37_spill] sm:$0xff] }
  0x5b   :  { %500 = vmatpush.msra.mxu2 %v2220_v13  ;;  %464 = vmatpush.msra.mxu0 %v2218_v12 }
  0x5c   :  { %484 = vmatpush.msra.mxu1 %v2223_v14  ;;  %524 = vmatpush.msra.mxu3 %v2225_v15 }
  0x5d   :  { %501 = vmatpush.msra.mxu2 %v2231_v17  ;;  %465 = vmatpush.msra.mxu0 %v2229_v16 }
  0x5e   :  { %485 = vmatpush.msra.mxu1 %v2235_v18  ;;  %525 = vmatpush.msra.mxu3 %v2237_v19 }
  0x5f   :  { %502 = vmatpush.msra.mxu2 %v2243_v21  ;;  %466 = vmatpush.msra.mxu0 %v2241_v20 }
  0x60   :  { %486 = vmatpush.msra.mxu1 %v2250_v23  ;;  %526 = vmatpush.msra.mxu3 %v2252_v24 }
  0x61   :  { %503 = vmatpush.msra.mxu2 %v2258_v26  ;;  %467 = vmatpush.msra.mxu0 %v2256_v25 }
  0x62   :  { %487 = vmatpush.msra.mxu1 %v2262_v27  ;;  %527 = vmatpush.msra.mxu3 %v2264_v28 }
  0x63   :  { %504 = vmatpush.msra.mxu2 %v2270_v30  ;;  %468 = vmatpush.msra.mxu0 %v2268_v29 }
  0x64   :  { %488 = vmatpush.msra.mxu1 %v2274_v31  ;;  %528 = vmatpush.msra.mxu3 %v2276_v32 }
  0x65   :  { %505 = vmatpush.msra.mxu2 %v2282_v34  ;;  %469 = vmatpush.msra.mxu0 %v2280_v33 }
  0x66   :  { %489 = vmatpush.msra.mxu1 %v2286_v35  ;;  %529 = vmatpush.msra.mxu3 %v2288_v36 }
  0x67   :  { %506 = vmatpush.msra.mxu2 %v2294_v38  ;;  %470 = vmatpush.msra.mxu0 %v2292_v37 }
  0x68   :  { %490 = vmatpush.msra.mxu1 %v2298_v39  ;;  %530 = vmatpush.msra.mxu3 %v2300_v40 }
  0x69   :  { %507 = vmatpush.msra.mxu2 %v2315_v45  ;;  %471 = vmatpush.msra.mxu0 %v2304_v41 }
  0x6a   :  { %491 = vmatpush.msra.mxu1 %v2308_v43  ;;  %531 = vmatpush.msra.mxu3 %v2310_v44 }
  0x6b   :  { %508 = vmatpush.msra.mxu2 %v2325_v49  ;;  %472 = vmatpush.msra.mxu0 %v2317_v46 }
  0x6c   :  { %492 = vmatpush.msra.mxu1 %v2321_v47  ;;  %532 = vmatpush.msra.mxu3 %v2323_v48 }
  0x6d   :  { %509 = vmatpush.msra.mxu2 %v2337_v53  ;;  %473 = vmatpush.msra.mxu0 %v2327_v50 }
  0x6e   :  { %493 = vmatpush.msra.mxu1 %v2331_v51  ;;  %533 = vmatpush.msra.mxu3 %v2333_v52 }
  0x6f   :  { %510 = vmatpush.msra.mxu2 %v2349_v57  ;;  %474 = vmatpush.msra.mxu0 %v2339_v54 }
  0x70   :  { %494 = vmatpush.msra.mxu1 %v2343_v55  ;;  %534 = vmatpush.msra.mxu3 %v2345_v56 }
  0x71   :  { %511 = vmatpush.msra.mxu2 %v2365_v5  ;;  %475 = vmatpush.msra.mxu0 %v2351_v58 }
  0x72   :  { %495 = vmatpush.msra.mxu1 %v3375_v42  ;;  %535 = vmatpush.msra.mxu3 %v3376_v1 }
  0x73   :  { %512 = vmatpush.msra.mxu2 %v2371_v9  ;;  %636 = vmatpush.msrb.mxu0 %v2185_v61 }
  0x74   :  { %656 = vmatpush.msrb.mxu1 %v2187_v62  ;;  %696 = vmatpush.msrb.mxu3 %v2189_v63 }
  0x75   :  { %513 = vmatpush.msra.mxu2 %v2375_v22  ;;  %637 = vmatpush.msrb.mxu0 %v2191_v0 }
  0x76   :  { %657 = vmatpush.msrb.mxu1 %v2194_v2  ;;  %697 = vmatpush.msrb.mxu3 %v2196_v3 }
  0x77   :  { %514 = vmatpush.msra.mxu2 %v2380_v60  ;;  %638 = vmatpush.msrb.mxu0 %v2200_v4 }
  0x78   :  { %658 = vmatpush.msrb.mxu1 %v2203_v6  ;;  %698 = vmatpush.msrb.mxu3 %v2205_v7 }
  0x79   :  { %515 = vmatpush.msra.mxu2 %v2386_v59  ;;  %639 = vmatpush.msrb.mxu0 %v2209_v8 }
  0x7a   :  { %659 = vmatpush.msrb.mxu1 %v2212_v10  ;;  %699 = vmatpush.msrb.mxu3 %v2214_v11 }
  0x7b   :  { %676 = vmatpush.msrb.mxu2 %v2220_v13  ;;  %640 = vmatpush.msrb.mxu0 %v2218_v12 }
  0x7c   :  { %660 = vmatpush.msrb.mxu1 %v2223_v14  ;;  %700 = vmatpush.msrb.mxu3 %v2225_v15 }
  0x7d   :  { %677 = vmatpush.msrb.mxu2 %v2231_v17  ;;  %641 = vmatpush.msrb.mxu0 %v2229_v16 }
  0x7e   :  { %661 = vmatpush.msrb.mxu1 %v2235_v18  ;;  %701 = vmatpush.msrb.mxu3 %v2237_v19 }
  0x7f   :  { %678 = vmatpush.msrb.mxu2 %v2243_v21  ;;  %642 = vmatpush.msrb.mxu0 %v2241_v20 }
  0x80   :  { %662 = vmatpush.msrb.mxu1 %v2250_v23  ;;  %702 = vmatpush.msrb.mxu3 %v2252_v24 }
  0x81   :  { %679 = vmatpush.msrb.mxu2 %v2258_v26  ;;  %643 = vmatpush.msrb.mxu0 %v2256_v25 }
  0x82   :  { %663 = vmatpush.msrb.mxu1 %v2262_v27  ;;  %703 = vmatpush.msrb.mxu3 %v2264_v28 }
  0x83   :  { %680 = vmatpush.msrb.mxu2 %v2270_v30  ;;  %644 = vmatpush.msrb.mxu0 %v2268_v29 }
  0x84   :  { %664 = vmatpush.msrb.mxu1 %v2274_v31  ;;  %704 = vmatpush.msrb.mxu3 %v2276_v32 }
  0x85   :  { %681 = vmatpush.msrb.mxu2 %v2282_v34  ;;  %645 = vmatpush.msrb.mxu0 %v2280_v33 }
  0x86   :  { %665 = vmatpush.msrb.mxu1 %v2286_v35  ;;  %705 = vmatpush.msrb.mxu3 %v2288_v36 }
  0x87   :  { %682 = vmatpush.msrb.mxu2 %v2294_v38  ;;  %646 = vmatpush.msrb.mxu0 %v2292_v37 }
  0x88   :  { %666 = vmatpush.msrb.mxu1 %v2298_v39  ;;  %706 = vmatpush.msrb.mxu3 %v2300_v40 }
  0x89   :  { %683 = vmatpush.msrb.mxu2 %v2315_v45  ;;  %647 = vmatpush.msrb.mxu0 %v2304_v41 }
  0x8a   :  { %667 = vmatpush.msrb.mxu1 %v2308_v43  ;;  %707 = vmatpush.msrb.mxu3 %v2310_v44 }
  0x8b   :  { %684 = vmatpush.msrb.mxu2 %v2325_v49  ;;  %648 = vmatpush.msrb.mxu0 %v2317_v46 }
  0x8c   :  { %668 = vmatpush.msrb.mxu1 %v2321_v47  ;;  %708 = vmatpush.msrb.mxu3 %v2323_v48 }
  0x8d   :  { %685 = vmatpush.msrb.mxu2 %v2337_v53  ;;  %649 = vmatpush.msrb.mxu0 %v2327_v50 }
  0x8e   :  { %669 = vmatpush.msrb.mxu1 %v2331_v51  ;;  %709 = vmatpush.msrb.mxu3 %v2333_v52 }
  0x8f   :  { %686 = vmatpush.msrb.mxu2 %v2349_v57  ;;  %650 = vmatpush.msrb.mxu0 %v2339_v54 }
  0x90   :  { %670 = vmatpush.msrb.mxu1 %v2343_v55  ;;  %710 = vmatpush.msrb.mxu3 %v2345_v56  ;;  %v81_v56 = vld [vmem:[%s3221_s3] sm:$0x1]  ;;  %s1692_s3 = sshll.u32 %s3225_s7, 4  ;;  %s1693_s3 = int_to_ptr.hbm [resolvable:$true] %s1692_s3 }
  0x91   :  { %687 = vmatpush.msrb.mxu2 %v2365_v5  ;;  %651 = vmatpush.msrb.mxu0 %v2351_v58  ;;  %v148_v58 = vld [vmem:[%s3224_s6] sm:$0xf]  ;;  %82 = vst [vmem:[#allocation13] sm:$0x1] %v81_v56  ;;  %s2124_s6 = smov [#allocation11]  }
  0x92   :  { %671 = vmatpush.msrb.mxu1 %v3375_v42  ;;  %711 = vmatpush.msrb.mxu3 %v3376_v1  ;;  %v150_v42 = vperm.slane %v148_v58, 0  ;;  %v151_v55 = vperm.slane %v148_v58, 1  ;;  %v152_v41 = vperm.slane %v148_v58, 2 }
  0x93   :  { %688 = vmatpush.msrb.mxu2 %v2371_v9 }
  0x95   :  { %689 = vmatpush.msrb.mxu2 %v2375_v22 }
  0x97   :  { %690 = vmatpush.msrb.mxu2 %v2380_v60  ;;  %v153_v60 = vperm.slane %v148_v58, 3 }
  0x99   :  { %691 = vmatpush.msrb.mxu2 %v2386_v59 }
  0xc0   :  { %v195_v54 = vpop.f32.mrf.mxu1 }
  0xc1   :  { %v2522_v22 = vadd.f32 %v195_v54, %v151_v55 }
  0xc2   :  { %v175_v52 = vpop.f32.mrf.mxu0 }
  0xc3   :  { %v2520_v51 = vadd.f32 %v175_v52, %v150_v42  ;;  %3378 = vst [vmem:[#allocation45_spill] sm:$0xff] %v2522_v22 }
  0xc5   :  { %3377 = vst [vmem:[#allocation44_spill] sm:$0xff] %v2520_v51 }
  0xcb   :  { %v235_v1 = vpop.f32.mrf.mxu3 }
  0xcc   :  { %v2526_v44 = vadd.f32 %v235_v1, %v153_v60 }
  0xcd   :  { %v323_v59 = vpop.f32.mrf.mxu0  ;;  %v343_v50 = vpop.f32.mrf.mxu1 }
  0xce   :  { %v386_v48 = vadd.f32 %v323_v59, %v2520_v51  ;;  %v387_v9 = vadd.f32 %v343_v50, %v2522_v22  ;;  %3379 = vst [vmem:[#allocation46_spill] sm:$0xff] %v2526_v44 }
  0xd0   :  { %v1734_v47 = vmul.f32 -1.442695, %v386_v48  ;;  %v1735_v46 = vmul.f32 -1.442695, %v387_v9 }
  0xd2   :  { %1774 = vpow2.f32 %v1734_v47 }
  0xd3   :  { %1776 = vpow2.f32 %v1735_v46 }
  0xd4   :  { %v383_v56 = vpop.f32.mrf.mxu3 }
  0xd5   :  { %v389_v5 = vadd.f32 %v383_v56, %v2526_v44  ;;  %v215_v52 = vpop.f32.mrf.mxu2 }
  0xd6   :  { %v2529_v50 = vadd.f32 %v215_v52, %v152_v41 }
  0xd7   :  { %v1736_v42 = vmul.f32 -1.442695, %v389_v5 }
  0xd8   :  { %v1775_v54 = vpop.eup %1774  ;;  %3380 = vst [vmem:[#allocation47_spill] sm:$0xff] %v2529_v50 }
  0xd9   :  { %v1777_v55 = vpop.eup %1776  ;;  %v393_v43 = vadd.f32 1.0, %v1775_v54  ;;  %1778 = vpow2.f32 %v1736_v42 }
  0xda   :  { %v412_v40 = vadd.f32 1.0, %v1777_v55 }
  0xdb   :  { %1780 = vrcp.f32 %v393_v43  ;;  %v405_v42 = vand.u32 2147483648, %v393_v43  ;;  %v403_v54 = vand.u32 2147483647, %v393_v43  ;;  %vm399_vm2 = vweird.f32 %v393_v43 }
  0xdc   :  { %1782 = vrcp.f32 %v412_v40  ;;  %v424_v41 = vand.u32 2147483648, %v412_v40  ;;  %vm418_vm3 = vweird.f32 %v412_v40 }
  0xdd   :  { %v363_v48 = vpop.f32.mrf.mxu2  ;;  %v406_v22 = vor.u32 1.1754944e-38, %v405_v42  ;;  %vm404_vm6 = vcmp.eq.f32.partialorder %v403_v54, 8.507059e+37  ;;  %v3403_v54 = vld [vmem:[#allocation42_spill] sm:$0xff] }
  0xde   :  { %v388_v46 = vadd.f32 %v363_v48, %v2529_v50  ;;  %v422_v48 = vand.u32 2147483647, %v412_v40 }
  0xdf   :  { %v1779_v59 = vpop.eup %1778 }
  0xe0   :  { %v432_v60 = vadd.f32 1.0, %v1779_v59  ;;  %vm423_vm7 = vcmp.eq.f32.partialorder %v422_v48, 8.507059e+37  ;;  %v3404_v48 = vld [vmem:[#allocation33_spill] sm:$0xff] }
  0xe1   :  { %v1781_v47 = vpop.eup %1780 }
  0xe2   :  { %v1783_v1 = vpop.eup %1782  ;;  %v395_v9 = vmul.f32 %v1781_v47, %v393_v43  ;;  %1784 = vrcp.f32 %v432_v60  ;;  %vm400_vm0 = vweird.f32 %v1781_v47  ;;  %vm438_vm10 = vweird.f32 %v432_v60 }
  0xe3   :  { %v414_v5 = vmul.f32 %v1783_v1, %v412_v40  ;;  %1786 = vtanh.f32 %v388_v46  ;;  %vm419_vm1 = vweird.f32 %v1783_v1  ;;  %vm401_vm4 = vmor %vm399_vm2, %vm400_vm0 }
  0xe4   :  { %v396_v58 = vsub.f32 1.0, %v395_v9  ;;  %vm420_vm5 = vmor %vm418_vm3, %vm419_vm1  ;;  %v425_v9 = vor.u32 1.1754944e-38, %v424_v41 }
  0xe5   :  { %v415_v56 = vsub.f32 1.0, %v414_v5  ;;  %v2535_v5 = vld [vmem:[#allocation13] sm:$0x1] }
  0xe6   :  { %v397_v52 = vmul.f32 %v1781_v47, %v396_v58  ;;  %v456_v58 = vstv %s455_s28  ;;  %s1701_s28 = sshll.u32 %s2124_s6, 4  ;;  %s1702_s28 = int_to_ptr.vmem [resolvable:$true] %s1701_s28 }
  0xe7   :  { %v416_v55 = vmul.f32 %v1783_v1, %v415_v56  ;;  %vm2538_vm8 = vcmp.eq.s32.totalorder %v456_v58, 1  ;;  %v3408_v58 = vld [vmem:[#allocation37_spill] sm:$0xff] }
  0xe8   :  { %v1785_v59 = vpop.eup %1784  ;;  %v398_v50 = vadd.f32 %v1781_v47, %v397_v52 }
  0xe9   :  { %v434_v44 = vmul.f32 %v1785_v59, %v432_v60  ;;  %v417_v51 = vadd.f32 %v1783_v1, %v416_v55  ;;  %v1787_v57 = vpop.eup %1786  ;;  %vm439_vm9 = vweird.f32 %v1785_v59 }
  0xea   :  { %v402_v46 = vsel %vm401_vm4, %v1781_v47, %v398_v50  ;;  %v444_v50 = vand.u32 2147483648, %v432_v60  ;;  %vm440_vm11 = vmor %vm438_vm10, %vm439_vm9  ;;  %v3383_v47 = vld [vmem:[#allocation38_spill] sm:$0xff] }
  0xeb   :  { %v435_v39 = vsub.f32 1.0, %v434_v44  ;;  %v407_v56 = vsel %vm404_vm6, %v406_v22, %v402_v46  ;;  %v421_v37 = vsel %vm420_vm5, %v1783_v1, %v417_v51  ;;  %v3407_v46 = vld [vmem:[#allocation43_spill] sm:$0xff] }
  0xec   :  { %v426_v36 = vsel %vm423_vm7, %v425_v9, %v421_v37  ;;  %v449_v52 = vmul.f32 %v1787_v57, %v407_v56  ;;  %v445_v44 = vor.u32 1.1754944e-38, %v444_v50  ;;  %v3406_v9 = vld [vmem:[#allocation36_spill] sm:$0xff] }
  0xed   :  { %v436_v43 = vmul.f32 %v1785_v59, %v435_v39  ;;  %v448_v40 = vmul.f32 %v426_v36, %v2535_v5  ;;  %v442_v39 = vand.u32 2147483647, %v432_v60  ;;  %v3402_v60 = vld [vmem:[#allocation32_spill] sm:$0xff] }
  0xef   :  { %v2542_v41 = vadd.f32 %v449_v52, %v448_v40  ;;  %v437_v55 = vadd.f32 %v1785_v59, %v436_v43  ;;  %vm443_vm12 = vcmp.eq.f32.partialorder %v442_v39, 8.507059e+37  ;;  %v3410_v39 = vld [vmem:[#allocation45_spill] sm:$0xff] }
  0xf1   :  { %1788 = vtanh.f32 %v2542_v41  ;;  %v441_v36 = vsel %vm440_vm11, %v1785_v59, %v437_v55  ;;  %v3405_v59 = vld [vmem:[#allocation35_spill] sm:$0xff]  ;;  %v3409_v55 = vld [vmem:[#allocation44_spill] sm:$0xff] }
  0xf2   :  { %v446_v57 = vsel %vm443_vm12, %v445_v44, %v441_v36 }
  0xf7   :  { %v1789_v51 = vpop.eup %1788 }
  0xf8   :  { %v452_v22 = vmul.f32 %v1789_v51, %v446_v57 }
  0xfa   :  { %453 = vst [vmem:[#allocation10] sm:$0x1] %v452_v22  ;;  %v2552_v1 = vsel %vm2538_vm8, %v452_v22, %v3383_v47  ;;  %v3411_v47 = vld [vmem:[#allocation46_spill] sm:$0xff] }
  0xfb   :  { %476 = vmatmul.f32.vlgmr.msra.gmra.mxu0 %v2552_v1  ;;  %496 = vmatmul.f32.vlgmr.msra.gmra.mxu1 %v2552_v1 }
  0xfc   :  { %516 = vmatmul.f32.vlgmr.msra.gmra.mxu2 %v2552_v1  ;;  %536 = vmatmul.f32.vlgmr.msra.gmra.mxu3 %v2552_v1 }
  0xfd   :  { %811 = vmatpush.msra.mxu0 %v2185_v61  ;;  %831 = vmatpush.msra.mxu1 %v2187_v62  ;;  %v3384_v61 = vld [vmem:[#allocation18_spill] sm:$0xff]  ;;  %v3385_v62 = vld [vmem:[#allocation19_spill] sm:$0xff] }
  0xfe   :  { %851 = vmatpush.msra.mxu2 %v2220_v13  ;;  %871 = vmatpush.msra.mxu3 %v2189_v63  ;;  %v3386_v63 = vld [vmem:[#allocation20_spill] sm:$0xff] }
  0xff   :  { %812 = vmatpush.msra.mxu0 %v2191_v0  ;;  %832 = vmatpush.msra.mxu1 %v2194_v2  ;;  %v3387_v0 = vld [vmem:[#allocation34_spill] sm:$0xff]  ;;  %v3388_v2 = vld [vmem:[#allocation21_spill] sm:$0xff] }
 0x100   :  { %852 = vmatpush.msra.mxu2 %v2231_v17  ;;  %872 = vmatpush.msra.mxu3 %v2196_v3  ;;  %v3389_v3 = vld [vmem:[#allocation22_spill] sm:$0xff] }
 0x101   :  { %813 = vmatpush.msra.mxu0 %v2200_v4  ;;  %833 = vmatpush.msra.mxu1 %v2203_v6  ;;  %v3390_v4 = vld [vmem:[#allocation23_spill] sm:$0xff] }
 0x102   :  { %853 = vmatpush.msra.mxu2 %v2243_v21  ;;  %873 = vmatpush.msra.mxu3 %v2205_v7  ;;  %v3391_v6 = vld [vmem:[#allocation39_spill] sm:$0xff]  ;;  %v3392_v7 = vld [vmem:[#allocation24_spill] sm:$0xff] }
 0x103   :  { %814 = vmatpush.msra.mxu0 %v2209_v8  ;;  %834 = vmatpush.msra.mxu1 %v2212_v10  ;;  %v3393_v8 = vld [vmem:[#allocation25_spill] sm:$0xff]  ;;  %v3394_v10 = vld [vmem:[#allocation26_spill] sm:$0xff] }
 0x104   :  { %854 = vmatpush.msra.mxu2 %v2258_v26  ;;  %874 = vmatpush.msra.mxu3 %v2214_v11  ;;  %v3395_v11 = vld [vmem:[#allocation40_spill] sm:$0xff] }
 0x105   :  { %815 = vmatpush.msra.mxu0 %v2218_v12  ;;  %835 = vmatpush.msra.mxu1 %v2223_v14  ;;  %v3396_v12 = vld [vmem:[#allocation27_spill] sm:$0xff]  ;;  %v3397_v14 = vld [vmem:[#allocation28_spill] sm:$0xff] }
 0x106   :  { %855 = vmatpush.msra.mxu2 %v2270_v30  ;;  %875 = vmatpush.msra.mxu3 %v2225_v15  ;;  %v3398_v15 = vld [vmem:[#allocation29_spill] sm:$0xff] }
 0x107   :  { %816 = vmatpush.msra.mxu0 %v2229_v16  ;;  %836 = vmatpush.msra.mxu1 %v2235_v18  ;;  %v3399_v16 = vld [vmem:[#allocation41_spill] sm:$0xff]  ;;  %v3400_v18 = vld [vmem:[#allocation30_spill] sm:$0xff] }
 0x108   :  { %856 = vmatpush.msra.mxu2 %v2282_v34  ;;  %876 = vmatpush.msra.mxu3 %v2237_v19  ;;  %v3401_v19 = vld [vmem:[#allocation31_spill] sm:$0xff] }
 0x109   :  { %817 = vmatpush.msra.mxu0 %v2241_v20  ;;  %837 = vmatpush.msra.mxu1 %v2250_v23 }
 0x10a   :  { %857 = vmatpush.msra.mxu2 %v2294_v38  ;;  %877 = vmatpush.msra.mxu3 %v2252_v24 }
 0x10b   :  { %818 = vmatpush.msra.mxu0 %v2256_v25  ;;  %838 = vmatpush.msra.mxu1 %v2262_v27 }
 0x10c   :  { %858 = vmatpush.msra.mxu2 %v2315_v45  ;;  %878 = vmatpush.msra.mxu3 %v2264_v28 }
 0x10d   :  { %819 = vmatpush.msra.mxu0 %v2268_v29  ;;  %839 = vmatpush.msra.mxu1 %v2274_v31 }
 0x10e   :  { %859 = vmatpush.msra.mxu2 %v2325_v49  ;;  %879 = vmatpush.msra.mxu3 %v2276_v32 }
 0x10f   :  { %820 = vmatpush.msra.mxu0 %v2280_v33  ;;  %840 = vmatpush.msra.mxu1 %v2286_v35 }
 0x110   :  { %860 = vmatpush.msra.mxu2 %v2337_v53  ;;  %880 = vmatpush.msra.mxu3 %v3384_v61 }
 0x111   :  { %821 = vmatpush.msra.mxu0 %v3385_v62  ;;  %841 = vmatpush.msra.mxu1 %v3386_v63 }
 0x112   :  { %861 = vmatpush.msra.mxu2 %v3387_v0  ;;  %881 = vmatpush.msra.mxu3 %v3388_v2 }
 0x113   :  { %822 = vmatpush.msra.mxu0 %v3389_v3  ;;  %842 = vmatpush.msra.mxu1 %v3390_v4 }
 0x114   :  { %862 = vmatpush.msra.mxu2 %v3391_v6  ;;  %882 = vmatpush.msra.mxu3 %v3392_v7 }
 0x115   :  { %823 = vmatpush.msra.mxu0 %v3393_v8  ;;  %843 = vmatpush.msra.mxu1 %v3394_v10 }
 0x116   :  { %863 = vmatpush.msra.mxu2 %v3395_v11  ;;  %883 = vmatpush.msra.mxu3 %v3396_v12 }
 0x117   :  { %824 = vmatpush.msra.mxu0 %v3397_v14  ;;  %844 = vmatpush.msra.mxu1 %v3398_v15 }
 0x118   :  { %864 = vmatpush.msra.mxu2 %v3399_v16  ;;  %884 = vmatpush.msra.mxu3 %v3400_v18 }
 0x119   :  { %825 = vmatpush.msra.mxu0 %v3401_v19  ;;  %845 = vmatpush.msra.mxu1 %v3402_v60  ;;  %v626_v60 = vstv %s625_s10  ;;  %s1703_s10 = sshll.u32 %s3226_s8, 4  ;;  %s1704_s10 = int_to_ptr.hbm [resolvable:$true] %s1703_s10 }
 0x11a   :  { %865 = vmatpush.msra.mxu2 %v3403_v54  ;;  %885 = vmatpush.msra.mxu3 %v3404_v48  ;;  %vm2637_vm5 = vcmp.eq.s32.totalorder %v626_v60, 1 }
 0x11b   :  { %826 = vmatpush.msra.mxu0 %v3405_v59  ;;  %846 = vmatpush.msra.mxu1 %v3406_v9 }
 0x11c   :  { %866 = vmatpush.msra.mxu2 %v3407_v46  ;;  %886 = vmatpush.msra.mxu3 %v3408_v58 }
 0x178   :  { %v477_v56 = vpop.f32.mrf.mxu0  ;;  %v497_v52 = vpop.f32.mrf.mxu1 }
 0x179   :  { %v544_v43 = vrot.slane %v477_v56, 7  ;;  %v545_v40 = vrot.slane %v497_v52, 7 }
 0x17b   :  { %v552_v50 = vadd.f32 %v544_v43, %v3409_v55  ;;  %v553_v36 = vadd.f32 %v545_v40, %v3410_v39 }
 0x17d   :  { %v1738_v44 = vmul.f32 -1.442695, %v552_v50  ;;  %v1739_v51 = vmul.f32 -1.442695, %v553_v36  ;;  %v3412_v36 = vld [vmem:[#allocation47_spill] sm:$0xff] }
 0x17f   :  { %1790 = vpow2.f32 %v1738_v44  ;;  %v537_v57 = vpop.f32.mrf.mxu3  ;;  %v517_v56 = vpop.f32.mrf.mxu2 }
 0x180   :  { %1792 = vpow2.f32 %v1739_v51  ;;  %v547_v22 = vrot.slane %v537_v57, 7  ;;  %v546_v52 = vrot.slane %v517_v56, 7 }
 0x182   :  { %v555_v37 = vadd.f32 %v547_v22, %v3411_v47  ;;  %v554_v44 = vadd.f32 %v546_v52, %v3412_v36  ;;  %v3413_v47 = vsel %vm2538_vm8, %v2542_v41, %v2535_v5 }
 0x183   :  { %v2634_v55 = vrot.slane %v3413_v47, 7 }
 0x184   :  { %v1740_v9 = vmul.f32 -1.442695, %v555_v37 }
 0x185   :  { %v1791_v46 = vpop.eup %1790 }
 0x186   :  { %v1793_v59 = vpop.eup %1792  ;;  %v559_v58 = vadd.f32 1.0, %v1791_v46  ;;  %1794 = vpow2.f32 %v1740_v9 }
 0x187   :  { %v578_v48 = vadd.f32 1.0, %v1793_v59 }
 0x188   :  { %1796 = vrcp.f32 %v559_v58  ;;  %v571_v59 = vand.u32 2147483648, %v559_v58  ;;  %v569_v56 = vand.u32 2147483647, %v559_v58  ;;  %vm565_vm15 = vweird.f32 %v559_v58 }
 0x189   :  { %1798 = vrcp.f32 %v578_v48  ;;  %v590_v57 = vand.u32 2147483648, %v578_v48  ;;  %v588_v52 = vand.u32 2147483647, %v578_v48  ;;  %vm584_vm0 = vweird.f32 %v578_v48 }
 0x18a   :  { %vm570_vm3 = vcmp.eq.f32.partialorder %v569_v56, 8.507059e+37 }
 0x18b   :  { %v591_v54 = vor.u32 1.1754944e-38, %v590_v57  ;;  %vm589_vm4 = vcmp.eq.f32.partialorder %v588_v52, 8.507059e+37 }
 0x18c   :  { %v1795_v43 = vpop.eup %1794 }
 0x18d   :  { %v598_v40 = vadd.f32 1.0, %v1795_v43 }
 0x18e   :  { %v1797_v50 = vpop.eup %1796 }
 0x18f   :  { %v1799_v39 = vpop.eup %1798  ;;  %v561_v51 = vmul.f32 %v1797_v50, %v559_v58  ;;  %1800 = vrcp.f32 %v598_v40  ;;  %vm566_vm13 = vweird.f32 %v1797_v50  ;;  %vm604_vm7 = vweird.f32 %v598_v40 }
 0x190   :  { %v580_v37 = vmul.f32 %v1799_v39, %v578_v48  ;;  %1802 = vtanh.f32 %v554_v44  ;;  %vm585_vm14 = vweird.f32 %v1799_v39  ;;  %vm567_vm1 = vmor %vm565_vm15, %vm566_vm13  ;;  %v572_v44 = vor.u32 1.1754944e-38, %v571_v59 }
 0x191   :  { %v562_v46 = vsub.f32 1.0, %v561_v51  ;;  %vm586_vm2 = vmor %vm584_vm0, %vm585_vm14 }
 0x192   :  { %v581_v9 = vsub.f32 1.0, %v580_v37 }
 0x193   :  { %v563_v22 = vmul.f32 %v1797_v50, %v562_v46 }
 0x194   :  { %v582_v43 = vmul.f32 %v1799_v39, %v581_v9 }
 0x195   :  { %v1801_v36 = vpop.eup %1800  ;;  %v564_v51 = vadd.f32 %v1797_v50, %v563_v22  ;;  %v629_v22 = vrot.slane %v2552_v1, 7  ;;  %v2661_v1 = vld [vmem:[#allocation9 + $0x1f8] sm:$0xff] }
 0x196   :  { %v583_v37 = vadd.f32 %v1799_v39, %v582_v43  ;;  %v600_v46 = vmul.f32 %v1801_v36, %v598_v40  ;;  %v1803_v19 = vpop.eup %1802  ;;  %vm605_vm6 = vweird.f32 %v1801_v36 }
 0x197   :  { %v568_v9 = vsel %vm567_vm1, %v1797_v50, %v564_v51  ;;  %v610_v50 = vand.u32 2147483648, %v598_v40  ;;  %vm606_vm8 = vmor %vm604_vm7, %vm605_vm6  ;;  %v2664_v51 = vld [vmem:[#allocation9 + $0x1c0] sm:$0xff] }
 0x198   :  { %v573_v18 = vsel %vm570_vm3, %v572_v44, %v568_v9  ;;  %v587_v42 = vsel %vm586_vm2, %v1799_v39, %v583_v37  ;;  %v601_v16 = vsub.f32 1.0, %v600_v46  ;;  %v2667_v44 = vld [vmem:[#allocation9 + $0x1c8] sm:$0xff]  ;;  %v2671_v37 = vld [vmem:[#allocation9 + $0x1d8] sm:$0xff]  ;;  %v2674_v46 = vld [vmem:[#allocation9 + $0x1a0] sm:$0xff] }
 0x199   :  { %v592_v5 = vsel %vm589_vm4, %v591_v54, %v587_v42  ;;  %v618_v41 = vmul.f32 %v1803_v19, %v573_v18  ;;  %v608_v18 = vand.u32 2147483647, %v598_v40  ;;  %v611_v19 = vor.u32 1.1754944e-38, %v610_v50  ;;  %v2654_v40 = vld [vmem:[#allocation9 + $0x1e0] sm:$0xff]  ;;  %v2681_v9 = vld [vmem:[#allocation9 + $0x1b8] sm:$0xff] }
 0x19a   :  { %v617_v47 = vmul.f32 %v2634_v55, %v592_v5  ;;  %v602_v58 = vmul.f32 %v1801_v36, %v601_v16  ;;  %v2684_v42 = vld [vmem:[#allocation9 + $0x180] sm:$0xff]  ;;  %v2691_v5 = vld [vmem:[#allocation9 + $0x198] sm:$0xff] }
 0x19b   :  { %vm609_vm9 = vcmp.eq.f32.partialorder %v608_v18, 8.507059e+37 }
 0x19c   :  { %v2641_v59 = vadd.f32 %v618_v41, %v617_v47  ;;  %v603_v57 = vadd.f32 %v1801_v36, %v602_v58  ;;  %v2694_v41 = vld [vmem:[#allocation9 + $0x160] sm:$0xff]  ;;  %v2701_v47 = vld [vmem:[#allocation9 + $0x178] sm:$0xff] }
 0x19d   :  { %v2704_v58 = vld [vmem:[#allocation9 + $0x140] sm:$0xff] }
 0x19e   :  { %1804 = vtanh.f32 %v2641_v59  ;;  %v632_v54 = vsel %vm2637_vm5, %v2641_v59, %v2634_v55  ;;  %v607_v16 = vsel %vm606_vm8, %v1801_v36, %v603_v57  ;;  %v2657_v36 = vld [vmem:[#allocation9 + $0x1e8] sm:$0xff]  ;;  %v2711_v57 = vld [vmem:[#allocation9 + $0x158] sm:$0xff] }
 0x19f   :  { %v612_v39 = vsel %vm609_vm9, %v611_v19, %v607_v16  ;;  %v3429_v16 = vld [vmem:[#allocation47_spill] sm:$0xff] }
 0x1a4   :  { %v1805_v60 = vpop.eup %1804 }
 0x1a5   :  { %v621_v56 = vmul.f32 %v1805_v60, %v612_v39 }
 0x1a7   :  { %622 = vst [vmem:[#allocation10] sm:$0x2] %v621_v56  ;;  %v2651_v43 = vsel %vm2637_vm5, %v621_v56, %v629_v22 }
 0x1a8   :  { %v634_v52 = vrot.slane %v2651_v43, 1 }
 0x1aa   :  { %652 = vmatmul.f32.vlgmr.msrb.gmra.mxu0 %v634_v52  ;;  %672 = vmatmul.f32.vlgmr.msrb.gmra.mxu1 %v634_v52 }
 0x1ab   :  { %692 = vmatmul.f32.vlgmr.msrb.gmra.mxu2 %v634_v52  ;;  %712 = vmatmul.f32.vlgmr.msrb.gmra.mxu3 %v634_v52 }
 0x1ac   :  { %986 = vmatpush.msrb.mxu0 %v2654_v40  ;;  %1006 = vmatpush.msrb.mxu1 %v2657_v36 }
 0x1ad   :  { %1026 = vmatpush.msrb.mxu2 %v2220_v13  ;;  %1046 = vmatpush.msrb.mxu3 %v2661_v1  ;;  %v2677_v13 = vld [vmem:[#allocation9 + $0x1a8] sm:$0xff] }
 0x1ae   :  { %987 = vmatpush.msrb.mxu0 %v2664_v51  ;;  %1007 = vmatpush.msrb.mxu1 %v2667_v44 }
 0x1af   :  { %1027 = vmatpush.msrb.mxu2 %v2231_v17  ;;  %1047 = vmatpush.msrb.mxu3 %v2671_v37  ;;  %v2687_v17 = vld [vmem:[#allocation9 + $0x188] sm:$0xff] }
 0x1b0   :  { %988 = vmatpush.msrb.mxu0 %v2674_v46  ;;  %1008 = vmatpush.msrb.mxu1 %v2677_v13 }
 0x1b1   :  { %1028 = vmatpush.msrb.mxu2 %v2243_v21  ;;  %1048 = vmatpush.msrb.mxu3 %v2681_v9  ;;  %v2697_v21 = vld [vmem:[#allocation9 + $0x168] sm:$0xff] }
 0x1b2   :  { %989 = vmatpush.msrb.mxu0 %v2684_v42  ;;  %1009 = vmatpush.msrb.mxu1 %v2687_v17 }
 0x1b3   :  { %1029 = vmatpush.msrb.mxu2 %v2258_v26  ;;  %1049 = vmatpush.msrb.mxu3 %v2691_v5  ;;  %v2707_v26 = vld [vmem:[#allocation9 + $0x148] sm:$0xff] }
 0x1b4   :  { %990 = vmatpush.msrb.mxu0 %v2694_v41  ;;  %1010 = vmatpush.msrb.mxu1 %v2697_v21 }
 0x1b5   :  { %1030 = vmatpush.msrb.mxu2 %v2270_v30  ;;  %1050 = vmatpush.msrb.mxu3 %v2701_v47  ;;  %v3423_v30 = vld [vmem:[#allocation36_spill] sm:$0xff] }
 0x1b6   :  { %991 = vmatpush.msrb.mxu0 %v2704_v58  ;;  %1011 = vmatpush.msrb.mxu1 %v2707_v26 }
 0x1b7   :  { %1031 = vmatpush.msrb.mxu2 %v2282_v34  ;;  %1051 = vmatpush.msrb.mxu3 %v2711_v57 }
 0x1b8   :  { %992 = vmatpush.msrb.mxu0 %v2241_v20  ;;  %1012 = vmatpush.msrb.mxu1 %v2250_v23  ;;  %v3416_v20 = vld [vmem:[#allocation41_spill] sm:$0xff]  ;;  %v3417_v23 = vld [vmem:[#allocation30_spill] sm:$0xff] }
 0x1b9   :  { %1032 = vmatpush.msrb.mxu2 %v2294_v38  ;;  %1052 = vmatpush.msrb.mxu3 %v2252_v24  ;;  %v3418_v24 = vld [vmem:[#allocation31_spill] sm:$0xff] }
 0x1ba   :  { %993 = vmatpush.msrb.mxu0 %v2256_v25  ;;  %1013 = vmatpush.msrb.mxu1 %v2262_v27  ;;  %v3419_v25 = vld [vmem:[#allocation32_spill] sm:$0xff]  ;;  %v3420_v27 = vld [vmem:[#allocation42_spill] sm:$0xff] }
 0x1bb   :  { %1033 = vmatpush.msrb.mxu2 %v2315_v45  ;;  %1053 = vmatpush.msrb.mxu3 %v2264_v28  ;;  %v3421_v28 = vld [vmem:[#allocation33_spill] sm:$0xff]  ;;  %v3426_v45 = vld [vmem:[#allocation44_spill] sm:$0xff] }
 0x1bc   :  { %994 = vmatpush.msrb.mxu0 %v2268_v29  ;;  %1014 = vmatpush.msrb.mxu1 %v2274_v31  ;;  %v3422_v29 = vld [vmem:[#allocation35_spill] sm:$0xff] }
 0x1bd   :  { %1034 = vmatpush.msrb.mxu2 %v2325_v49  ;;  %1054 = vmatpush.msrb.mxu3 %v2276_v32  ;;  %v3424_v31 = vld [vmem:[#allocation43_spill] sm:$0xff]  ;;  %v3425_v32 = vld [vmem:[#allocation37_spill] sm:$0xff] }
 0x1be   :  { %995 = vmatpush.msrb.mxu0 %v2280_v33  ;;  %1015 = vmatpush.msrb.mxu1 %v2286_v35 }
 0x1bf   :  { %1035 = vmatpush.msrb.mxu2 %v2337_v53  ;;  %1055 = vmatpush.msrb.mxu3 %v3384_v61  ;;  %v3427_v53 = vld [vmem:[#allocation45_spill] sm:$0xff] }
 0x1c0   :  { %996 = vmatpush.msrb.mxu0 %v3385_v62  ;;  %1016 = vmatpush.msrb.mxu1 %v3386_v63 }
 0x1c1   :  { %1036 = vmatpush.msrb.mxu2 %v3387_v0  ;;  %1056 = vmatpush.msrb.mxu3 %v3388_v2 }
 0x1c2   :  { %997 = vmatpush.msrb.mxu0 %v3389_v3  ;;  %1017 = vmatpush.msrb.mxu1 %v3390_v4  ;;  %v3428_v3 = vld [vmem:[#allocation46_spill] sm:$0xff] }
 0x1c3   :  { %1037 = vmatpush.msrb.mxu2 %v3391_v6  ;;  %1057 = vmatpush.msrb.mxu3 %v3392_v7 }
 0x1c4   :  { %998 = vmatpush.msrb.mxu0 %v3393_v8  ;;  %1018 = vmatpush.msrb.mxu1 %v3394_v10 }
 0x1c5   :  { %1038 = vmatpush.msrb.mxu2 %v3395_v11  ;;  %1058 = vmatpush.msrb.mxu3 %v3396_v12 }
 0x1c6   :  { %999 = vmatpush.msrb.mxu0 %v3397_v14  ;;  %1019 = vmatpush.msrb.mxu1 %v3398_v15 }
 0x1c7   :  { %1039 = vmatpush.msrb.mxu2 %v3416_v20  ;;  %1059 = vmatpush.msrb.mxu3 %v3417_v23 }
 0x1c8   :  { %1000 = vmatpush.msrb.mxu0 %v3418_v24  ;;  %1020 = vmatpush.msrb.mxu1 %v3419_v25 }
 0x1c9   :  { %1040 = vmatpush.msrb.mxu2 %v3420_v27  ;;  %1060 = vmatpush.msrb.mxu3 %v3421_v28 }
 0x1ca   :  { %1001 = vmatpush.msrb.mxu0 %v3422_v29  ;;  %1021 = vmatpush.msrb.mxu1 %v3423_v30  ;;  %v2766_v30 = vrot.slane %v632_v54, 7 }
 0x1cb   :  { %1041 = vmatpush.msrb.mxu2 %v3424_v31  ;;  %1061 = vmatpush.msrb.mxu3 %v3425_v32 }
 0x227   :  { %v653_v33 = vpop.f32.mrf.mxu0  ;;  %v673_v34 = vpop.f32.mrf.mxu1 }
 0x228   :  { %v720_v35 = vrot.slane %v653_v33, 6  ;;  %v721_v38 = vrot.slane %v673_v34, 6 }
 0x22a   :  { %v728_v49 = vadd.f32 %v720_v35, %v3426_v45  ;;  %v729_v61 = vadd.f32 %v721_v38, %v3427_v53 }
 0x22c   :  { %v1742_v62 = vmul.f32 -1.442695, %v728_v49  ;;  %v1743_v63 = vmul.f32 -1.442695, %v729_v61  ;;  %v802_v49 = vstv %s801_s13 }
 0x22d   :  { %vm2769_vm2 = vcmp.eq.s32.totalorder %v802_v49, 1  ;;  %v2858_v49 = vld [vmem:[#allocation9 + $0xc0] sm:$0xff] }
 0x22e   :  { %1806 = vpow2.f32 %v1742_v62  ;;  %v713_v0 = vpop.f32.mrf.mxu3  ;;  %v693_v12 = vpop.f32.mrf.mxu2  ;;  %3432 = vst [vmem:[#allocation38_spill] sm:$0xff] %v2858_v49 }
 0x22f   :  { %1808 = vpow2.f32 %v1743_v63  ;;  %v723_v2 = vrot.slane %v713_v0, 6  ;;  %v722_v14 = vrot.slane %v693_v12, 6 }
 0x231   :  { %v731_v4 = vadd.f32 %v723_v2, %v3428_v3  ;;  %v730_v19 = vadd.f32 %v722_v14, %v3429_v16 }
 0x233   :  { %v1744_v6 = vmul.f32 -1.442695, %v731_v4 }
 0x234   :  { %v1807_v7 = vpop.eup %1806 }
 0x235   :  { %v1809_v8 = vpop.eup %1808  ;;  %v735_v10 = vadd.f32 1.0, %v1807_v7  ;;  %1810 = vpow2.f32 %v1744_v6 }
 0x236   :  { %v754_v11 = vadd.f32 1.0, %v1809_v8  ;;  %v2915_v8 = vld [vmem:[#allocation9 + $0x58] sm:$0xff] }
 0x237   :  { %1812 = vrcp.f32 %v735_v10  ;;  %v747_v20 = vand.u32 2147483648, %v735_v10  ;;  %v745_v25 = vand.u32 2147483647, %v735_v10  ;;  %vm741_vm12 = vweird.f32 %v735_v10  ;;  %3451 = vst [vmem:[#allocation32_spill] sm:$0xff] %v2915_v8 }
 0x238   :  { %1814 = vrcp.f32 %v754_v11  ;;  %v766_v23 = vand.u32 2147483648, %v754_v11  ;;  %v764_v28 = vand.u32 2147483647, %v754_v11  ;;  %vm760_vm13 = vweird.f32 %v754_v11 }
 0x239   :  { %v748_v32 = vor.u32 1.1754944e-38, %v747_v20  ;;  %vm746_vm0 = vcmp.eq.f32.partialorder %v745_v25, 8.507059e+37  ;;  %v2818_v20 = vld [vmem:[#allocation9 + $0x150] sm:$0xff] }
 0x23a   :  { %v767_v35 = vor.u32 1.1754944e-38, %v766_v23  ;;  %vm765_vm1 = vcmp.eq.f32.partialorder %v764_v28, 8.507059e+37  ;;  %v2822_v23 = vld [vmem:[#allocation9 + $0x120] sm:$0xff]  ;;  %v2828_v25 = vld [vmem:[#allocation9 + $0x130] sm:$0xff] }
 0x23b   :  { %v1811_v15 = vpop.eup %1810  ;;  %v2834_v28 = vld [vmem:[#allocation9 + $0x100] sm:$0xff] }
 0x23c   :  { %v774_v50 = vadd.f32 1.0, %v1811_v15 }
 0x23d   :  { %v1813_v18 = vpop.eup %1812 }
 0x23e   :  { %v1815_v60 = vpop.eup %1814  ;;  %v737_v39 = vmul.f32 %v1813_v18, %v735_v10  ;;  %1816 = vrcp.f32 %v774_v50  ;;  %vm742_vm10 = vweird.f32 %v1813_v18  ;;  %v786_v7 = vand.u32 2147483648, %v774_v50 }
 0x23f   :  { %v756_v22 = vmul.f32 %v1815_v60, %v754_v11  ;;  %1818 = vtanh.f32 %v730_v19  ;;  %vm761_vm11 = vweird.f32 %v1815_v60  ;;  %vm743_vm14 = vmor %vm741_vm12, %vm742_vm10  ;;  %vm780_vm4 = vweird.f32 %v774_v50 }
 0x240   :  { %v738_v56 = vsub.f32 1.0, %v737_v39  ;;  %vm762_vm15 = vmor %vm760_vm13, %vm761_vm11  ;;  %v784_v10 = vand.u32 2147483647, %v774_v50  ;;  %v787_v12 = vor.u32 1.1754944e-38, %v786_v7  ;;  %v2888_v7 = vld [vmem:[#allocation9 + $0x90] sm:$0xff] }
 0x241   :  { %v757_v52 = vsub.f32 1.0, %v756_v22  ;;  %v2800_v22 = vld [vmem:[#allocation9 + $0x1b0] sm:$0xff]  ;;  %3442 = vst [vmem:[#allocation25_spill] sm:$0xff] %v2888_v7 }
 0x242   :  { %v739_v24 = vmul.f32 %v1813_v18, %v738_v56  ;;  %vm785_vm6 = vcmp.eq.f32.partialorder %v784_v10, 8.507059e+37  ;;  %v2806_v56 = vld [vmem:[#allocation9 + $0x190] sm:$0xff]  ;;  %v2891_v10 = vld [vmem:[#allocation9 + $0x98] sm:$0xff] }
 0x243   :  { %v758_v27 = vmul.f32 %v1815_v60, %v757_v52  ;;  %v2812_v52 = vld [vmem:[#allocation9 + $0x170] sm:$0xff]  ;;  %3443 = vst [vmem:[#allocation26_spill] sm:$0xff] %v2891_v10 }
 0x244   :  { %v1817_v29 = vpop.eup %1816  ;;  %v740_v31 = vadd.f32 %v1813_v18, %v739_v24  ;;  %v2825_v24 = vld [vmem:[#allocation9 + $0x128] sm:$0xff] }
 0x245   :  { %v759_v33 = vadd.f32 %v1815_v60, %v758_v27  ;;  %v776_v34 = vmul.f32 %v1817_v29, %v774_v50  ;;  %v1819_v61 = vpop.eup %1818  ;;  %vm781_vm3 = vweird.f32 %v1817_v29  ;;  %v2788_v50 = vld [vmem:[#allocation9 + $0x1f0] sm:$0xff]  ;;  %v2831_v27 = vld [vmem:[#allocation9 + $0x138] sm:$0xff] }
 0x246   :  { %v744_v38 = vsel %vm743_vm14, %v1813_v18, %v740_v31  ;;  %vm782_vm5 = vmor %vm780_vm4, %vm781_vm3  ;;  %v804_v18 = vrot.slane %v2651_v43, 7  ;;  %v2794_v43 = vld [vmem:[#allocation9 + $0x1d0] sm:$0xff] }
 0x247   :  { %v749_v62 = vsel %vm746_vm0, %v748_v32, %v744_v38  ;;  %v763_v48 = vsel %vm762_vm15, %v1815_v60, %v759_v33  ;;  %v777_v63 = vsub.f32 1.0, %v776_v34  ;;  %v2840_v31 = vld [vmem:[#allocation9 + $0x110] sm:$0xff]  ;;  %v2843_v32 = vld [vmem:[#allocation9 + $0x118] sm:$0xff]  ;;  %v2846_v33 = vld [vmem:[#allocation9 + $0xe0] sm:$0xff] }
 0x248   :  { %v768_v55 = vsel %vm765_vm1, %v767_v35, %v763_v48  ;;  %v794_v59 = vmul.f32 %v1819_v61, %v749_v62  ;;  %v2849_v34 = vld [vmem:[#allocation9 + $0xe8] sm:$0xff]  ;;  %v2852_v35 = vld [vmem:[#allocation9 + $0xf0] sm:$0xff]  ;;  %v2855_v38 = vld [vmem:[#allocation9 + $0xf8] sm:$0xff] }
 0x249   :  { %v793_v54 = vmul.f32 %v2766_v30, %v768_v55  ;;  %v778_v0 = vmul.f32 %v1817_v29, %v777_v63  ;;  %v2861_v61 = vld [vmem:[#allocation9 + $0xc8] sm:$0xff]  ;;  %v2864_v62 = vld [vmem:[#allocation9 + $0xd0] sm:$0xff]  ;;  %v2867_v48 = vld [vmem:[#allocation9 + $0xd8] sm:$0xff] }
 0x24a   :  { %3433 = vst [vmem:[#allocation18_spill] sm:$0xff] %v2861_v61  ;;  %v2870_v63 = vld [vmem:[#allocation9 + $0xa0] sm:$0xff]  ;;  %v2873_v55 = vld [vmem:[#allocation9 + $0xa8] sm:$0xff] }
 0x24b   :  { %v2773_v4 = vadd.f32 %v794_v59, %v793_v54  ;;  %v779_v6 = vadd.f32 %v1817_v29, %v778_v0  ;;  %3434 = vst [vmem:[#allocation19_spill] sm:$0xff] %v2864_v62  ;;  %v2876_v59 = vld [vmem:[#allocation9 + $0xb0] sm:$0xff]  ;;  %v2879_v54 = vld [vmem:[#allocation9 + $0xb8] sm:$0xff]  ;;  %v2882_v0 = vld [vmem:[#allocation9 + $0x80] sm:$0xff] }
 0x24c   :  { %3435 = vst [vmem:[#allocation20_spill] sm:$0xff] %v2867_v48 }
 0x24d   :  { %1820 = vtanh.f32 %v2773_v4  ;;  %v783_v11 = vsel %vm782_vm5, %v1817_v29, %v779_v6  ;;  %v2837_v29 = vld [vmem:[#allocation9 + $0x108] sm:$0xff]  ;;  %3436 = vst [vmem:[#allocation34_spill] sm:$0xff] %v2870_v63 }
 0x24e   :  { %v788_v15 = vsel %vm785_vm6, %v787_v12, %v783_v11  ;;  %3437 = vst [vmem:[#allocation21_spill] sm:$0xff] %v2873_v55  ;;  %v2885_v6 = vld [vmem:[#allocation9 + $0x88] sm:$0xff]  ;;  %v2894_v11 = vld [vmem:[#allocation9 + $0x60] sm:$0xff] }
 0x24f   :  { %3438 = vst [vmem:[#allocation22_spill] sm:$0xff] %v2876_v59  ;;  %v2897_v12 = vld [vmem:[#allocation9 + $0x68] sm:$0xff] }
 0x250   :  { %3439 = vst [vmem:[#allocation23_spill] sm:$0xff] %v2879_v54 }
 0x251   :  { %3440 = vst [vmem:[#allocation39_spill] sm:$0xff] %v2882_v0 }
 0x252   :  { %3441 = vst [vmem:[#allocation24_spill] sm:$0xff] %v2885_v6 }
 0x253   :  { %v1821_v14 = vpop.eup %1820  ;;  %3444 = vst [vmem:[#allocation40_spill] sm:$0xff] %v2894_v11 }
 0x254   :  { %v797_v19 = vmul.f32 %v1821_v14, %v788_v15  ;;  %3445 = vst [vmem:[#allocation27_spill] sm:$0xff] %v2897_v12  ;;  %v2900_v14 = vld [vmem:[#allocation9 + $0x70] sm:$0xff]  ;;  %v2903_v15 = vld [vmem:[#allocation9 + $0x78] sm:$0xff] }
 0x255   :  { %3446 = vst [vmem:[#allocation28_spill] sm:$0xff] %v2900_v14 }
 0x256   :  { %798 = vst [vmem:[#allocation10] sm:$0x4] %v797_v19  ;;  %v2783_v60 = vsel %vm2769_vm2, %v797_v19, %v804_v18  ;;  %v2906_v18 = vld [vmem:[#allocation9 + $0x40] sm:$0xff]  ;;  %v2909_v19 = vld [vmem:[#allocation9 + $0x48] sm:$0xff] }
 0x257   :  { %v809_v39 = vrot.slane %v2783_v60, 2  ;;  %3447 = vst [vmem:[#allocation29_spill] sm:$0xff] %v2903_v15 }
 0x258   :  { %3448 = vst [vmem:[#allocation41_spill] sm:$0xff] %v2906_v18 }
 0x259   :  { %827 = vmatmul.f32.vlgmr.msra.gmra.mxu0 %v809_v39  ;;  %847 = vmatmul.f32.vlgmr.msra.gmra.mxu1 %v809_v39  ;;  %3449 = vst [vmem:[#allocation30_spill] sm:$0xff] %v2909_v19 }
 0x25a   :  { %867 = vmatmul.f32.vlgmr.msra.gmra.mxu2 %v809_v39  ;;  %887 = vmatmul.f32.vlgmr.msra.gmra.mxu3 %v809_v39  ;;  %v2912_v39 = vld [vmem:[#allocation9 + $0x50] sm:$0xff] }
 0x25b   :  { %1161 = vmatpush.msra.mxu0 %v2654_v40  ;;  %1181 = vmatpush.msra.mxu1 %v2657_v36  ;;  %3450 = vst [vmem:[#allocation31_spill] sm:$0xff] %v2912_v39 }
 0x25c   :  { %1201 = vmatpush.msra.mxu2 %v2788_v50  ;;  %1221 = vmatpush.msra.mxu3 %v2661_v1 }
 0x25d   :  { %1162 = vmatpush.msra.mxu0 %v2664_v51  ;;  %1182 = vmatpush.msra.mxu1 %v2667_v44 }
 0x25e   :  { %1202 = vmatpush.msra.mxu2 %v2794_v43  ;;  %1222 = vmatpush.msra.mxu3 %v2671_v37 }
 0x25f   :  { %1163 = vmatpush.msra.mxu0 %v2674_v46  ;;  %1183 = vmatpush.msra.mxu1 %v2677_v13 }
 0x260   :  { %1203 = vmatpush.msra.mxu2 %v2800_v22  ;;  %1223 = vmatpush.msra.mxu3 %v2681_v9 }
 0x261   :  { %1164 = vmatpush.msra.mxu0 %v2684_v42  ;;  %1184 = vmatpush.msra.mxu1 %v2687_v17 }
 0x262   :  { %1204 = vmatpush.msra.mxu2 %v2806_v56  ;;  %1224 = vmatpush.msra.mxu3 %v2691_v5 }
 0x263   :  { %1165 = vmatpush.msra.mxu0 %v2694_v41  ;;  %1185 = vmatpush.msra.mxu1 %v2697_v21 }
 0x264   :  { %1205 = vmatpush.msra.mxu2 %v2812_v52  ;;  %1225 = vmatpush.msra.mxu3 %v2701_v47 }
 0x265   :  { %1166 = vmatpush.msra.mxu0 %v2704_v58  ;;  %1186 = vmatpush.msra.mxu1 %v2707_v26 }
 0x266   :  { %1206 = vmatpush.msra.mxu2 %v2818_v20  ;;  %1226 = vmatpush.msra.mxu3 %v2711_v57 }
 0x267   :  { %1167 = vmatpush.msra.mxu0 %v2822_v23  ;;  %1187 = vmatpush.msra.mxu1 %v2825_v24 }
 0x268   :  { %1207 = vmatpush.msra.mxu2 %v2828_v25  ;;  %1227 = vmatpush.msra.mxu3 %v2831_v27 }
 0x269   :  { %1168 = vmatpush.msra.mxu0 %v2834_v28  ;;  %1188 = vmatpush.msra.mxu1 %v2837_v29 }
 0x26a   :  { %1208 = vmatpush.msra.mxu2 %v2840_v31  ;;  %1228 = vmatpush.msra.mxu3 %v2843_v32 }
 0x26b   :  { %1169 = vmatpush.msra.mxu0 %v2846_v33  ;;  %1189 = vmatpush.msra.mxu1 %v2849_v34 }
 0x26c   :  { %1209 = vmatpush.msra.mxu2 %v2852_v35  ;;  %1229 = vmatpush.msra.mxu3 %v2855_v38 }
 0x26d   :  { %1170 = vmatpush.msra.mxu0 %v2858_v49  ;;  %1190 = vmatpush.msra.mxu1 %v2861_v61 }
 0x26e   :  { %1210 = vmatpush.msra.mxu2 %v2864_v62  ;;  %1230 = vmatpush.msra.mxu3 %v2867_v48  ;;  %v977_v48 = vstv %s976_s16 }
 0x26f   :  { %1171 = vmatpush.msra.mxu0 %v2870_v63  ;;  %1191 = vmatpush.msra.mxu1 %v2873_v55  ;;  %vm2957_vm15 = vcmp.eq.s32.totalorder %v977_v48, 1 }
 0x270   :  { %1211 = vmatpush.msra.mxu2 %v2876_v59  ;;  %1231 = vmatpush.msra.mxu3 %v2879_v54 }
 0x271   :  { %1172 = vmatpush.msra.mxu0 %v2882_v0  ;;  %1192 = vmatpush.msra.mxu1 %v2885_v6 }
 0x272   :  { %1212 = vmatpush.msra.mxu2 %v2888_v7  ;;  %1232 = vmatpush.msra.mxu3 %v2891_v10 }
 0x273   :  { %1173 = vmatpush.msra.mxu0 %v2894_v11  ;;  %1193 = vmatpush.msra.mxu1 %v2897_v12 }
 0x274   :  { %1213 = vmatpush.msra.mxu2 %v2900_v14  ;;  %1233 = vmatpush.msra.mxu3 %v2903_v15  ;;  %v2918_v14 = vld [vmem:[#allocation9 + $0x20] sm:$0xff]  ;;  %v2921_v15 = vld [vmem:[#allocation9 + $0x28] sm:$0xff] }
 0x275   :  { %1174 = vmatpush.msra.mxu0 %v2906_v18  ;;  %1194 = vmatpush.msra.mxu1 %v2909_v19  ;;  %3452 = vst [vmem:[#allocation42_spill] sm:$0xff] %v2918_v14  ;;  %v2924_v18 = vld [vmem:[#allocation9 + $0x30] sm:$0xff]  ;;  %v2927_v19 = vld [vmem:[#allocation9 + $0x38] sm:$0xff] }
 0x276   :  { %1214 = vmatpush.msra.mxu2 %v2912_v39  ;;  %1234 = vmatpush.msra.mxu3 %v2915_v8  ;;  %3453 = vst [vmem:[#allocation33_spill] sm:$0xff] %v2921_v15  ;;  %v2930_v39 = vld [vmem:[#allocation9] sm:$0xff]  ;;  %v2933_v8 = vld [vmem:[#allocation9 + $0x8] sm:$0xff] }
 0x277   :  { %1175 = vmatpush.msra.mxu0 %v2918_v14  ;;  %1195 = vmatpush.msra.mxu1 %v2921_v15  ;;  %3454 = vst [vmem:[#allocation35_spill] sm:$0xff] %v2924_v18  ;;  %v2936_v14 = vld [vmem:[#allocation9 + $0x10] sm:$0xff]  ;;  %v2939_v15 = vld [vmem:[#allocation9 + $0x18] sm:$0xff] }
 0x278   :  { %1215 = vmatpush.msra.mxu2 %v2924_v18  ;;  %3455 = vst [vmem:[#allocation36_spill] sm:$0xff] %v2927_v19  ;;  %1235 = vmatpush.msra.mxu3 %v2927_v19 }
 0x279   :  { %3456 = vst [vmem:[#allocation43_spill] sm:$0xff] %v2930_v39  ;;  %1176 = vmatpush.msra.mxu0 %v2930_v39  ;;  %1196 = vmatpush.msra.mxu1 %v2933_v8 }
 0x27a   :  { %3457 = vst [vmem:[#allocation37_spill] sm:$0xff] %v2933_v8  ;;  %1216 = vmatpush.msra.mxu2 %v2936_v14  ;;  %1236 = vmatpush.msra.mxu3 %v2939_v15 }
 0x27b   :  { %3458 = vst [vmem:[#allocation48_spill] sm:$0xff] %v2936_v14 }
 0x27c   :  { %3459 = vst [vmem:[#allocation49_spill] sm:$0xff] %v2939_v15 }
 0x2d6   :  { %v828_v18 = vpop.f32.mrf.mxu0  ;;  %v848_v12 = vpop.f32.mrf.mxu1 }
 0x2d7   :  { %v895_v11 = vrot.slane %v828_v18, 5  ;;  %v896_v19 = vrot.slane %v848_v12, 5 }
 0x2d9   :  { %v903_v10 = vadd.f32 %v895_v11, %v3426_v45  ;;  %v904_v39 = vadd.f32 %v896_v19, %v3427_v53 }
 0x2db   :  { %v1746_v7 = vmul.f32 -1.442695, %v903_v10  ;;  %v1747_v6 = vmul.f32 -1.442695, %v904_v39 }
 0x2dd   :  { %1822 = vpow2.f32 %v1746_v7  ;;  %v888_v8 = vpop.f32.mrf.mxu3  ;;  %v868_v18 = vpop.f32.mrf.mxu2 }
 0x2de   :  { %1824 = vpow2.f32 %v1747_v6  ;;  %v898_v0 = vrot.slane %v888_v8, 5  ;;  %v897_v11 = vrot.slane %v868_v18, 5 }
 0x2e0   :  { %v906_v14 = vadd.f32 %v898_v0, %v3428_v3  ;;  %v905_v7 = vadd.f32 %v897_v11, %v3429_v16  ;;  %v3460_v3 = vsel %vm2769_vm2, %v2773_v4, %v2766_v30 }
 0x2e1   :  { %v2954_v53 = vrot.slane %v3460_v3, 7 }
 0x2e2   :  { %v1748_v54 = vmul.f32 -1.442695, %v906_v14 }
 0x2e3   :  { %v1823_v59 = vpop.eup %1822 }
 0x2e4   :  { %v1825_v55 = vpop.eup %1824  ;;  %v910_v15 = vadd.f32 1.0, %v1823_v59  ;;  %1826 = vpow2.f32 %v1748_v54 }
 0x2e5   :  { %v929_v63 = vadd.f32 1.0, %v1825_v55 }
 0x2e6   :  { %1828 = vrcp.f32 %v910_v15  ;;  %v922_v55 = vand.u32 2147483648, %v910_v15  ;;  %v920_v18 = vand.u32 2147483647, %v910_v15  ;;  %vm916_vm9 = vweird.f32 %v910_v15 }
 0x2e7   :  { %1830 = vrcp.f32 %v929_v63  ;;  %v941_v0 = vand.u32 2147483648, %v929_v63  ;;  %v939_v11 = vand.u32 2147483647, %v929_v63  ;;  %vm935_vm10 = vweird.f32 %v929_v63 }
 0x2e8   :  { %vm921_vm13 = vcmp.eq.f32.partialorder %v920_v18, 8.507059e+37 }
 0x2e9   :  { %v942_v45 = vor.u32 1.1754944e-38, %v941_v0  ;;  %vm940_vm14 = vcmp.eq.f32.partialorder %v939_v11, 8.507059e+37 }
 0x2ea   :  { %v1827_v12 = vpop.eup %1826 }
 0x2eb   :  { %v949_v19 = vadd.f32 1.0, %v1827_v12 }
 0x2ec   :  { %v1829_v10 = vpop.eup %1828 }
 0x2ed   :  { %v1831_v39 = vpop.eup %1830  ;;  %v912_v6 = vmul.f32 %v1829_v10, %v910_v15  ;;  %1832 = vrcp.f32 %v949_v19  ;;  %vm917_vm7 = vweird.f32 %v1829_v10  ;;  %vm955_vm1 = vweird.f32 %v949_v19 }
 0x2ee   :  { %v931_v8 = vmul.f32 %v1831_v39, %v929_v63  ;;  %1834 = vtanh.f32 %v905_v7  ;;  %vm936_vm8 = vweird.f32 %v1831_v39  ;;  %vm918_vm11 = vmor %vm916_vm9, %vm917_vm7  ;;  %v923_v7 = vor.u32 1.1754944e-38, %v922_v55 }
 0x2ef   :  { %v913_v59 = vsub.f32 1.0, %v912_v6  ;;  %vm937_vm12 = vmor %vm935_vm10, %vm936_vm8 }
 0x2f0   :  { %v932_v54 = vsub.f32 1.0, %v931_v8 }
 0x2f1   :  { %v914_v14 = vmul.f32 %v1829_v10, %v913_v59 }
 0x2f2   :  { %v933_v12 = vmul.f32 %v1831_v39, %v932_v54 }
 0x2f3   :  { %v1833_v16 = vpop.eup %1832  ;;  %v915_v6 = vadd.f32 %v1829_v10, %v914_v14  ;;  %v979_v14 = vrot.slane %v2783_v60, 7  ;;  %v3464_v60 = vld [vmem:[#allocation18_spill] sm:$0xff] }
 0x2f4   :  { %v934_v8 = vadd.f32 %v1831_v39, %v933_v12  ;;  %v951_v59 = vmul.f32 %v1833_v16, %v949_v19  ;;  %v1835_v62 = vpop.eup %1834  ;;  %vm956_vm0 = vweird.f32 %v1833_v16 }
 0x2f5   :  { %v919_v54 = vsel %vm918_vm11, %v1829_v10, %v915_v6  ;;  %v961_v10 = vand.u32 2147483648, %v949_v19  ;;  %vm957_vm2 = vmor %vm955_vm1, %vm956_vm0  ;;  %v3466_v6 = vld [vmem:[#allocation20_spill] sm:$0xff] }
 0x2f6   :  { %v924_v61 = vsel %vm921_vm13, %v923_v7, %v919_v54  ;;  %v938_v2 = vsel %vm937_vm12, %v1831_v39, %v934_v8  ;;  %v952_v49 = vsub.f32 1.0, %v951_v59  ;;  %v3467_v7 = vld [vmem:[#allocation34_spill] sm:$0xff]  ;;  %v3468_v8 = vld [vmem:[#allocation21_spill] sm:$0xff]  ;;  %v3470_v54 = vld [vmem:[#allocation23_spill] sm:$0xff] }
 0x2f7   :  { %v943_v30 = vsel %vm940_vm14, %v942_v45, %v938_v2  ;;  %v969_v3 = vmul.f32 %v1835_v62, %v924_v61  ;;  %v959_v61 = vand.u32 2147483647, %v949_v19  ;;  %v962_v62 = vor.u32 1.1754944e-38, %v961_v10  ;;  %v3465_v19 = vld [vmem:[#allocation19_spill] sm:$0xff]  ;;  %v3469_v59 = vld [vmem:[#allocation22_spill] sm:$0xff]  ;;  %v3477_v10 = vld [vmem:[#allocation28_spill] sm:$0xff] }
 0x2f8   :  { %v968_v4 = vmul.f32 %v2954_v53, %v943_v30  ;;  %v953_v15 = vmul.f32 %v1833_v16, %v952_v49  ;;  %v3471_v2 = vld [vmem:[#allocation39_spill] sm:$0xff]  ;;  %v3472_v30 = vld [vmem:[#allocation24_spill] sm:$0xff] }
 0x2f9   :  { %vm960_vm3 = vcmp.eq.f32.partialorder %v959_v61, 8.507059e+37  ;;  %v3478_v61 = vld [vmem:[#allocation29_spill] sm:$0xff]  ;;  %v3486_v45 = vld [vmem:[#allocation36_spill] sm:$0xff] }
 0x2fa   :  { %v2961_v55 = vadd.f32 %v969_v3, %v968_v4  ;;  %v954_v0 = vadd.f32 %v1833_v16, %v953_v15  ;;  %v3473_v3 = vld [vmem:[#allocation25_spill] sm:$0xff]  ;;  %v3474_v4 = vld [vmem:[#allocation26_spill] sm:$0xff]  ;;  %v3475_v15 = vld [vmem:[#allocation40_spill] sm:$0xff] }
 0x2fc   :  { %1836 = vtanh.f32 %v2961_v55  ;;  %v958_v49 = vsel %vm957_vm2, %v1833_v16, %v954_v0  ;;  %v3463_v16 = vld [vmem:[#allocation38_spill] sm:$0xff]  ;;  %v3476_v0 = vld [vmem:[#allocation27_spill] sm:$0xff] }
 0x2fd   :  { %v963_v39 = vsel %vm960_vm3, %v962_v62, %v958_v49  ;;  %v3479_v49 = vld [vmem:[#allocation41_spill] sm:$0xff]  ;;  %v3480_v62 = vld [vmem:[#allocation30_spill] sm:$0xff] }
 0x302   :  { %v1837_v48 = vpop.eup %1836 }
 0x303   :  { %v972_v18 = vmul.f32 %v1837_v48, %v963_v39  ;;  %v3481_v48 = vld [vmem:[#allocation31_spill] sm:$0xff]  ;;  %v3482_v39 = vld [vmem:[#allocation32_spill] sm:$0xff] }
 0x305   :  { %973 = vst [vmem:[#allocation10] sm:$0x8] %v972_v18  ;;  %v2971_v12 = vsel %vm2957_vm15, %v972_v18, %v979_v14  ;;  %v3483_v14 = vld [vmem:[#allocation42_spill] sm:$0xff]  ;;  %v3484_v18 = vld [vmem:[#allocation33_spill] sm:$0xff] }
 0x306   :  { %v984_v11 = vrot.slane %v2971_v12, 3 }
 0x308   :  { %1002 = vmatmul.f32.vlgmr.msrb.gmra.mxu0 %v984_v11  ;;  %1022 = vmatmul.f32.vlgmr.msrb.gmra.mxu1 %v984_v11 }
 0x309   :  { %1042 = vmatmul.f32.vlgmr.msrb.gmra.mxu2 %v984_v11  ;;  %1062 = vmatmul.f32.vlgmr.msrb.gmra.mxu3 %v984_v11  ;;  %v3485_v11 = vld [vmem:[#allocation35_spill] sm:$0xff] }
 0x30a   :  { %1336 = vmatpush.msrb.mxu0 %v2654_v40  ;;  %1356 = vmatpush.msrb.mxu1 %v2657_v36 }
 0x30b   :  { %1376 = vmatpush.msrb.mxu2 %v2788_v50  ;;  %1396 = vmatpush.msrb.mxu3 %v2661_v1 }
 0x30c   :  { %1337 = vmatpush.msrb.mxu0 %v2664_v51  ;;  %1357 = vmatpush.msrb.mxu1 %v2667_v44 }
 0x30d   :  { %1377 = vmatpush.msrb.mxu2 %v2794_v43  ;;  %1397 = vmatpush.msrb.mxu3 %v2671_v37 }
 0x30e   :  { %1338 = vmatpush.msrb.mxu0 %v2674_v46  ;;  %1358 = vmatpush.msrb.mxu1 %v2677_v13 }
 0x30f   :  { %1378 = vmatpush.msrb.mxu2 %v2800_v22  ;;  %1398 = vmatpush.msrb.mxu3 %v2681_v9 }
 0x310   :  { %1339 = vmatpush.msrb.mxu0 %v2684_v42  ;;  %1359 = vmatpush.msrb.mxu1 %v2687_v17 }
 0x311   :  { %1379 = vmatpush.msrb.mxu2 %v2806_v56  ;;  %1399 = vmatpush.msrb.mxu3 %v2691_v5 }
 0x312   :  { %1340 = vmatpush.msrb.mxu0 %v2694_v41  ;;  %1360 = vmatpush.msrb.mxu1 %v2697_v21 }
 0x313   :  { %1380 = vmatpush.msrb.mxu2 %v2812_v52  ;;  %1400 = vmatpush.msrb.mxu3 %v2701_v47 }
 0x314   :  { %1341 = vmatpush.msrb.mxu0 %v2704_v58  ;;  %1361 = vmatpush.msrb.mxu1 %v2707_v26 }
 0x315   :  { %1381 = vmatpush.msrb.mxu2 %v2818_v20  ;;  %1401 = vmatpush.msrb.mxu3 %v2711_v57 }
 0x316   :  { %1342 = vmatpush.msrb.mxu0 %v2822_v23  ;;  %1362 = vmatpush.msrb.mxu1 %v2825_v24 }
 0x317   :  { %1382 = vmatpush.msrb.mxu2 %v2828_v25  ;;  %1402 = vmatpush.msrb.mxu3 %v2831_v27 }
 0x318   :  { %1343 = vmatpush.msrb.mxu0 %v2834_v28  ;;  %1363 = vmatpush.msrb.mxu1 %v2837_v29 }
 0x319   :  { %1383 = vmatpush.msrb.mxu2 %v2840_v31  ;;  %1403 = vmatpush.msrb.mxu3 %v2843_v32 }
 0x31a   :  { %1344 = vmatpush.msrb.mxu0 %v2846_v33  ;;  %1364 = vmatpush.msrb.mxu1 %v2849_v34 }
 0x31b   :  { %1384 = vmatpush.msrb.mxu2 %v2852_v35  ;;  %1404 = vmatpush.msrb.mxu3 %v2855_v38 }
 0x31c   :  { %1345 = vmatpush.msrb.mxu0 %v3463_v16  ;;  %1365 = vmatpush.msrb.mxu1 %v3464_v60 }
 0x31d   :  { %1385 = vmatpush.msrb.mxu2 %v3465_v19  ;;  %1405 = vmatpush.msrb.mxu3 %v3466_v6  ;;  %v1152_v6 = vstv %s1151_s19 }
 0x31e   :  { %1346 = vmatpush.msrb.mxu0 %v3467_v7  ;;  %1366 = vmatpush.msrb.mxu1 %v3468_v8  ;;  %vm3053_vm12 = vcmp.eq.s32.totalorder %v1152_v6, 1 }
 0x31f   :  { %1386 = vmatpush.msrb.mxu2 %v3469_v59  ;;  %1406 = vmatpush.msrb.mxu3 %v3470_v54 }
 0x320   :  { %1347 = vmatpush.msrb.mxu0 %v3471_v2  ;;  %1367 = vmatpush.msrb.mxu1 %v3472_v30  ;;  %v3493_v2 = vld [vmem:[#allocation46_spill] sm:$0xff] }
 0x321   :  { %1387 = vmatpush.msrb.mxu2 %v3473_v3  ;;  %1407 = vmatpush.msrb.mxu3 %v3474_v4  ;;  %v3491_v4 = vld [vmem:[#allocation44_spill] sm:$0xff]  ;;  %v3492_v3 = vld [vmem:[#allocation45_spill] sm:$0xff] }
 0x322   :  { %1348 = vmatpush.msrb.mxu0 %v3475_v15  ;;  %1368 = vmatpush.msrb.mxu1 %v3476_v0  ;;  %v3487_v0 = vld [vmem:[#allocation43_spill] sm:$0xff] }
 0x323   :  { %1388 = vmatpush.msrb.mxu2 %v3477_v10  ;;  %1408 = vmatpush.msrb.mxu3 %v3478_v61  ;;  %v3488_v10 = vld [vmem:[#allocation37_spill] sm:$0xff]  ;;  %v3489_v61 = vld [vmem:[#allocation48_spill] sm:$0xff] }
 0x324   :  { %1349 = vmatpush.msrb.mxu0 %v3479_v49  ;;  %1369 = vmatpush.msrb.mxu1 %v3480_v62  ;;  %v3490_v49 = vld [vmem:[#allocation49_spill] sm:$0xff] }
 0x325   :  { %1389 = vmatpush.msrb.mxu2 %v3481_v48  ;;  %1409 = vmatpush.msrb.mxu3 %v3482_v39 }
 0x326   :  { %1350 = vmatpush.msrb.mxu0 %v3483_v14  ;;  %1370 = vmatpush.msrb.mxu1 %v3484_v18 }
 0x327   :  { %1390 = vmatpush.msrb.mxu2 %v3485_v11  ;;  %1410 = vmatpush.msrb.mxu3 %v3486_v45 }
 0x328   :  { %1351 = vmatpush.msrb.mxu0 %v3487_v0  ;;  %1371 = vmatpush.msrb.mxu1 %v3488_v10 }
 0x329   :  { %1391 = vmatpush.msrb.mxu2 %v3489_v61  ;;  %1411 = vmatpush.msrb.mxu3 %v3490_v49 }
 0x385   :  { %v1003_v62 = vpop.f32.mrf.mxu0  ;;  %v1023_v48 = vpop.f32.mrf.mxu1 }
 0x386   :  { %v1070_v15 = vrot.slane %v1003_v62, 4  ;;  %v1071_v39 = vrot.slane %v1023_v48, 4 }
 0x388   :  { %v1078_v14 = vadd.f32 %v1070_v15, %v3491_v4  ;;  %v1079_v18 = vadd.f32 %v1071_v39, %v3492_v3 }
 0x38a   :  { %v1750_v30 = vmul.f32 -1.442695, %v1078_v14  ;;  %v1751_v11 = vmul.f32 -1.442695, %v1079_v18  ;;  %v3494_v18 = vld [vmem:[#allocation47_spill] sm:$0xff] }
 0x38c   :  { %1838 = vpow2.f32 %v1750_v30  ;;  %v1063_v45 = vpop.f32.mrf.mxu3  ;;  %v1043_v62 = vpop.f32.mrf.mxu2 }
 0x38d   :  { %1840 = vpow2.f32 %v1751_v11  ;;  %v1073_v0 = vrot.slane %v1063_v45, 4  ;;  %v1072_v15 = vrot.slane %v1043_v62, 4 }
 0x38f   :  { %v1081_v10 = vadd.f32 %v1073_v0, %v3493_v2  ;;  %v1080_v30 = vadd.f32 %v1072_v15, %v3494_v18  ;;  %v3495_v2 = vsel %vm2957_vm15, %v2961_v55, %v2954_v53 }
 0x390   :  { %v3050_v4 = vrot.slane %v3495_v2, 7 }
 0x391   :  { %v1752_v54 = vmul.f32 -1.442695, %v1081_v10 }
 0x392   :  { %v1839_v61 = vpop.eup %1838 }
 0x393   :  { %v1841_v59 = vpop.eup %1840  ;;  %v1085_v49 = vadd.f32 1.0, %v1839_v61  ;;  %1842 = vpow2.f32 %v1752_v54 }
 0x394   :  { %v1104_v8 = vadd.f32 1.0, %v1841_v59 }
 0x395   :  { %1844 = vrcp.f32 %v1085_v49  ;;  %v1097_v59 = vand.u32 2147483648, %v1085_v49  ;;  %v1095_v62 = vand.u32 2147483647, %v1085_v49  ;;  %vm1091_vm6 = vweird.f32 %v1085_v49 }
 0x396   :  { %1846 = vrcp.f32 %v1104_v8  ;;  %v1116_v10 = vand.u32 2147483648, %v1104_v8  ;;  %v1114_v15 = vand.u32 2147483647, %v1104_v8  ;;  %vm1110_vm7 = vweird.f32 %v1104_v8 }
 0x397   :  { %vm1096_vm10 = vcmp.eq.f32.partialorder %v1095_v62, 8.507059e+37 }
 0x398   :  { %v1117_v7 = vor.u32 1.1754944e-38, %v1116_v10  ;;  %vm1115_vm11 = vcmp.eq.f32.partialorder %v1114_v15, 8.507059e+37 }
 0x399   :  { %v1843_v48 = vpop.eup %1842 }
 0x39a   :  { %v1124_v39 = vadd.f32 1.0, %v1843_v48 }
 0x39b   :  { %v1845_v14 = vpop.eup %1844 }
 0x39c   :  { %v1847_v3 = vpop.eup %1846  ;;  %v1087_v11 = vmul.f32 %v1845_v14, %v1085_v49  ;;  %1848 = vrcp.f32 %v1124_v39  ;;  %vm1092_vm4 = vweird.f32 %v1845_v14  ;;  %vm1130_vm14 = vweird.f32 %v1124_v39 }
 0x39d   :  { %v1106_v45 = vmul.f32 %v1847_v3, %v1104_v8  ;;  %1850 = vtanh.f32 %v1080_v30  ;;  %vm1111_vm5 = vweird.f32 %v1847_v3  ;;  %vm1093_vm8 = vmor %vm1091_vm6, %vm1092_vm4  ;;  %v1098_v30 = vor.u32 1.1754944e-38, %v1097_v59 }
 0x39e   :  { %v1088_v0 = vsub.f32 1.0, %v1087_v11  ;;  %vm1112_vm9 = vmor %vm1110_vm7, %vm1111_vm5 }
 0x39f   :  { %v1107_v54 = vsub.f32 1.0, %v1106_v45 }
 0x3a0   :  { %v1089_v61 = vmul.f32 %v1845_v14, %v1088_v0 }
 0x3a1   :  { %v1108_v48 = vmul.f32 %v1847_v3, %v1107_v54 }
 0x3a2   :  { %v1849_v18 = vpop.eup %1848  ;;  %v1090_v11 = vadd.f32 %v1845_v14, %v1089_v61  ;;  %v1154_v61 = vrot.slane %v2971_v12, 7 }
 0x3a3   :  { %v1109_v45 = vadd.f32 %v1847_v3, %v1108_v48  ;;  %v1126_v0 = vmul.f32 %v1849_v18, %v1124_v39  ;;  %v1851_v19 = vpop.eup %1850  ;;  %vm1131_vm13 = vweird.f32 %v1849_v18 }
 0x3a4   :  { %v1094_v54 = vsel %vm1093_vm8, %v1845_v14, %v1090_v11  ;;  %v1136_v14 = vand.u32 2147483648, %v1124_v39  ;;  %vm1132_vm15 = vmor %vm1130_vm14, %vm1131_vm13 }
 0x3a5   :  { %v1099_v60 = vsel %vm1096_vm10, %v1098_v30, %v1094_v54  ;;  %v1113_v63 = vsel %vm1112_vm9, %v1847_v3, %v1109_v45  ;;  %v1127_v16 = vsub.f32 1.0, %v1126_v0  ;;  %v3528_v30 = vld [vmem:[#allocation46_spill] sm:$0xff] }
 0x3a6   :  { %v1118_v53 = vsel %vm1115_vm11, %v1117_v7, %v1113_v63  ;;  %v1144_v55 = vmul.f32 %v1851_v19, %v1099_v60  ;;  %v1134_v60 = vand.u32 2147483647, %v1124_v39  ;;  %v1137_v19 = vor.u32 1.1754944e-38, %v1136_v14 }
 0x3a7   :  { %v1143_v2 = vmul.f32 %v3050_v4, %v1118_v53  ;;  %v1128_v49 = vmul.f32 %v1849_v18, %v1127_v16 }
 0x3a8   :  { %vm1135_vm0 = vcmp.eq.f32.partialorder %v1134_v60, 8.507059e+37 }
 0x3a9   :  { %v3057_v59 = vadd.f32 %v1144_v55, %v1143_v2  ;;  %v1129_v10 = vadd.f32 %v1849_v18, %v1128_v49 }
 0x3ab   :  { %1852 = vtanh.f32 %v3057_v59  ;;  %v1157_v7 = vsel %vm3053_vm12, %v3057_v59, %v3050_v4  ;;  %v1133_v16 = vsel %vm1132_vm15, %v1849_v18, %v1129_v10 }
 0x3ac   :  { %v1138_v3 = vsel %vm1135_vm0, %v1137_v19, %v1133_v16  ;;  %v3529_v16 = vld [vmem:[#allocation47_spill] sm:$0xff] }
 0x3b1   :  { %v1853_v6 = vpop.eup %1852 }
 0x3b2   :  { %v1147_v62 = vmul.f32 %v1853_v6, %v1138_v3 }
 0x3b4   :  { %1148 = vst [vmem:[#allocation10] sm:$0x10] %v1147_v62  ;;  %v3067_v48 = vsel %vm3053_vm12, %v1147_v62, %v1154_v61 }
 0x3b5   :  { %v1159_v15 = vrot.slane %v3067_v48, 4 }
 0x3b7   :  { %1177 = vmatmul.f32.vlgmr.msra.gmra.mxu0 %v1159_v15  ;;  %1197 = vmatmul.f32.vlgmr.msra.gmra.mxu1 %v1159_v15 }
 0x3b8   :  { %1217 = vmatmul.f32.vlgmr.msra.gmra.mxu2 %v1159_v15  ;;  %1237 = vmatmul.f32.vlgmr.msra.gmra.mxu3 %v1159_v15 }
 0x3b9   :  { %1511 = vmatpush.msra.mxu0 %v2654_v40  ;;  %1531 = vmatpush.msra.mxu1 %v2657_v36  ;;  %v3498_v40 = vld [vmem:[#allocation38_spill] sm:$0xff] }
 0x3ba   :  { %1551 = vmatpush.msra.mxu2 %v2788_v50  ;;  %1571 = vmatpush.msra.mxu3 %v2661_v1  ;;  %v3499_v36 = vld [vmem:[#allocation18_spill] sm:$0xff]  ;;  %v3500_v1 = vld [vmem:[#allocation19_spill] sm:$0xff] }
 0x3bb   :  { %1512 = vmatpush.msra.mxu0 %v2664_v51  ;;  %1532 = vmatpush.msra.mxu1 %v2667_v44  ;;  %v3501_v51 = vld [vmem:[#allocation20_spill] sm:$0xff]  ;;  %v3502_v44 = vld [vmem:[#allocation34_spill] sm:$0xff]  ;;  %v3516_v50 = vld [vmem:[#allocation31_spill] sm:$0xff] }
 0x3bc   :  { %1552 = vmatpush.msra.mxu2 %v2794_v43  ;;  %1572 = vmatpush.msra.mxu3 %v2671_v37  ;;  %v3503_v37 = vld [vmem:[#allocation21_spill] sm:$0xff]  ;;  %v3517_v43 = vld [vmem:[#allocation32_spill] sm:$0xff] }
 0x3bd   :  { %1513 = vmatpush.msra.mxu0 %v2674_v46  ;;  %1533 = vmatpush.msra.mxu1 %v2677_v13  ;;  %v3504_v46 = vld [vmem:[#allocation22_spill] sm:$0xff]  ;;  %v3505_v13 = vld [vmem:[#allocation23_spill] sm:$0xff] }
 0x3be   :  { %1553 = vmatpush.msra.mxu2 %v2800_v22  ;;  %1573 = vmatpush.msra.mxu3 %v2681_v9  ;;  %v3506_v9 = vld [vmem:[#allocation39_spill] sm:$0xff]  ;;  %v3518_v22 = vld [vmem:[#allocation42_spill] sm:$0xff] }
 0x3bf   :  { %1514 = vmatpush.msra.mxu0 %v2684_v42  ;;  %1534 = vmatpush.msra.mxu1 %v2687_v17  ;;  %v3507_v42 = vld [vmem:[#allocation24_spill] sm:$0xff]  ;;  %v3508_v17 = vld [vmem:[#allocation25_spill] sm:$0xff] }
 0x3c0   :  { %1554 = vmatpush.msra.mxu2 %v2806_v56  ;;  %1574 = vmatpush.msra.mxu3 %v2691_v5  ;;  %v3509_v5 = vld [vmem:[#allocation26_spill] sm:$0xff]  ;;  %v3519_v56 = vld [vmem:[#allocation33_spill] sm:$0xff] }
 0x3c1   :  { %1515 = vmatpush.msra.mxu0 %v2694_v41  ;;  %1535 = vmatpush.msra.mxu1 %v2697_v21  ;;  %v3510_v41 = vld [vmem:[#allocation40_spill] sm:$0xff]  ;;  %v3511_v21 = vld [vmem:[#allocation27_spill] sm:$0xff] }
 0x3c2   :  { %1555 = vmatpush.msra.mxu2 %v2812_v52  ;;  %1575 = vmatpush.msra.mxu3 %v2701_v47  ;;  %v3512_v47 = vld [vmem:[#allocation28_spill] sm:$0xff]  ;;  %v3520_v52 = vld [vmem:[#allocation35_spill] sm:$0xff] }
 0x3c3   :  { %1516 = vmatpush.msra.mxu0 %v2704_v58  ;;  %1536 = vmatpush.msra.mxu1 %v2707_v26  ;;  %v3513_v58 = vld [vmem:[#allocation29_spill] sm:$0xff] }
 0x3c4   :  { %1556 = vmatpush.msra.mxu2 %v2818_v20  ;;  %1576 = vmatpush.msra.mxu3 %v2711_v57  ;;  %v3514_v26 = vld [vmem:[#allocation41_spill] sm:$0xff]  ;;  %v3515_v57 = vld [vmem:[#allocation30_spill] sm:$0xff]  ;;  %v3521_v20 = vld [vmem:[#allocation36_spill] sm:$0xff] }
 0x3c5   :  { %1517 = vmatpush.msra.mxu0 %v2822_v23  ;;  %1537 = vmatpush.msra.mxu1 %v2825_v24  ;;  %v3522_v23 = vld [vmem:[#allocation43_spill] sm:$0xff]  ;;  %v3523_v24 = vld [vmem:[#allocation37_spill] sm:$0xff] }
 0x3c6   :  { %1557 = vmatpush.msra.mxu2 %v2828_v25  ;;  %1577 = vmatpush.msra.mxu3 %v2831_v27  ;;  %v3524_v25 = vld [vmem:[#allocation48_spill] sm:$0xff]  ;;  %v3525_v27 = vld [vmem:[#allocation49_spill] sm:$0xff] }
 0x3c7   :  { %1518 = vmatpush.msra.mxu0 %v2834_v28  ;;  %1538 = vmatpush.msra.mxu1 %v2837_v29 }
 0x3c8   :  { %1558 = vmatpush.msra.mxu2 %v2840_v31  ;;  %1578 = vmatpush.msra.mxu3 %v2843_v32 }
 0x3c9   :  { %1519 = vmatpush.msra.mxu0 %v2846_v33  ;;  %1539 = vmatpush.msra.mxu1 %v2849_v34  ;;  %v3526_v33 = vld [vmem:[#allocation44_spill] sm:$0xff] }
 0x3ca   :  { %1559 = vmatpush.msra.mxu2 %v2852_v35  ;;  %1579 = vmatpush.msra.mxu3 %v2855_v38  ;;  %v3527_v35 = vld [vmem:[#allocation45_spill] sm:$0xff] }
 0x3cb   :  { %1520 = vmatpush.msra.mxu0 %v3498_v40  ;;  %1540 = vmatpush.msra.mxu1 %v3499_v36 }
 0x3cc   :  { %1560 = vmatpush.msra.mxu2 %v3500_v1  ;;  %1580 = vmatpush.msra.mxu3 %v3501_v51 }
 0x3cd   :  { %1521 = vmatpush.msra.mxu0 %v3502_v44  ;;  %1541 = vmatpush.msra.mxu1 %v3503_v37 }
 0x3ce   :  { %1561 = vmatpush.msra.mxu2 %v3504_v46  ;;  %1581 = vmatpush.msra.mxu3 %v3505_v13  ;;  %v3146_v13 = vrot.slane %v1157_v7, 7 }
 0x3cf   :  { %1522 = vmatpush.msra.mxu0 %v3506_v9  ;;  %1542 = vmatpush.msra.mxu1 %v3507_v42 }
 0x3d0   :  { %1562 = vmatpush.msra.mxu2 %v3508_v17  ;;  %1582 = vmatpush.msra.mxu3 %v3509_v5 }
 0x3d1   :  { %1523 = vmatpush.msra.mxu0 %v3510_v41  ;;  %1543 = vmatpush.msra.mxu1 %v3511_v21 }
 0x3d2   :  { %1563 = vmatpush.msra.mxu2 %v3512_v47  ;;  %1583 = vmatpush.msra.mxu3 %v3513_v58  ;;  %v1327_v47 = vstv %s1326_s22 }
 0x3d3   :  { %1524 = vmatpush.msra.mxu0 %v3514_v26  ;;  %1544 = vmatpush.msra.mxu1 %v3515_v57  ;;  %vm3149_vm9 = vcmp.eq.s32.totalorder %v1327_v47, 1 }
 0x3d4   :  { %1564 = vmatpush.msra.mxu2 %v3516_v50  ;;  %1584 = vmatpush.msra.mxu3 %v3517_v43 }
 0x3d5   :  { %1525 = vmatpush.msra.mxu0 %v3518_v22  ;;  %1545 = vmatpush.msra.mxu1 %v3519_v56 }
 0x3d6   :  { %1565 = vmatpush.msra.mxu2 %v3520_v52  ;;  %1585 = vmatpush.msra.mxu3 %v3521_v20 }
 0x3d7   :  { %1526 = vmatpush.msra.mxu0 %v3522_v23  ;;  %1546 = vmatpush.msra.mxu1 %v3523_v24 }
 0x3d8   :  { %1566 = vmatpush.msra.mxu2 %v3524_v25  ;;  %1586 = vmatpush.msra.mxu3 %v3525_v27 }
 0x434   :  { %v1178_v28 = vpop.f32.mrf.mxu0  ;;  %v1198_v29 = vpop.f32.mrf.mxu1 }
 0x435   :  { %v1245_v31 = vrot.slane %v1178_v28, 3  ;;  %v1246_v32 = vrot.slane %v1198_v29, 3  ;;  %v1329_v29 = vrot.slane %v3067_v48, 7 }
 0x437   :  { %v1253_v34 = vadd.f32 %v1245_v31, %v3526_v33  ;;  %v1254_v38 = vadd.f32 %v1246_v32, %v3527_v35 }
 0x439   :  { %v1754_v12 = vmul.f32 -1.442695, %v1253_v34  ;;  %v1755_v39 = vmul.f32 -1.442695, %v1254_v38 }
 0x43b   :  { %1854 = vpow2.f32 %v1754_v12  ;;  %v1238_v18 = vpop.f32.mrf.mxu3  ;;  %v1218_v2 = vpop.f32.mrf.mxu2 }
 0x43c   :  { %1856 = vpow2.f32 %v1755_v39  ;;  %v1248_v11 = vrot.slane %v1238_v18, 3  ;;  %v1247_v49 = vrot.slane %v1218_v2, 3 }
 0x43e   :  { %v1256_v45 = vadd.f32 %v1248_v11, %v3528_v30  ;;  %v1255_v19 = vadd.f32 %v1247_v49, %v3529_v16 }
 0x440   :  { %v1756_v0 = vmul.f32 -1.442695, %v1256_v45 }
 0x441   :  { %v1855_v54 = vpop.eup %1854 }
 0x442   :  { %v1857_v63 = vpop.eup %1856  ;;  %v1260_v53 = vadd.f32 1.0, %v1855_v54  ;;  %1858 = vpow2.f32 %v1756_v0 }
 0x443   :  { %v1279_v55 = vadd.f32 1.0, %v1857_v63 }
 0x444   :  { %1860 = vrcp.f32 %v1260_v53  ;;  %v1272_v40 = vand.u32 2147483648, %v1260_v53  ;;  %v1270_v51 = vand.u32 2147483647, %v1260_v53  ;;  %vm1266_vm3 = vweird.f32 %v1260_v53 }
 0x445   :  { %1862 = vrcp.f32 %v1279_v55  ;;  %v1291_v36 = vand.u32 2147483648, %v1279_v55  ;;  %v1289_v37 = vand.u32 2147483647, %v1279_v55  ;;  %vm1285_vm4 = vweird.f32 %v1279_v55 }
 0x446   :  { %v1273_v42 = vor.u32 1.1754944e-38, %v1272_v40  ;;  %vm1271_vm7 = vcmp.eq.f32.partialorder %v1270_v51, 8.507059e+37 }
 0x447   :  { %v1292_v41 = vor.u32 1.1754944e-38, %v1291_v36  ;;  %vm1290_vm8 = vcmp.eq.f32.partialorder %v1289_v37, 8.507059e+37 }
 0x448   :  { %v1859_v10 = vpop.eup %1858 }
 0x449   :  { %v1299_v14 = vadd.f32 1.0, %v1859_v10 }
 0x44a   :  { %v1861_v60 = vpop.eup %1860 }
 0x44b   :  { %v1863_v6 = vpop.eup %1862  ;;  %v1262_v3 = vmul.f32 %v1861_v60, %v1260_v53  ;;  %1864 = vrcp.f32 %v1299_v14  ;;  %vm1267_vm1 = vweird.f32 %v1861_v60  ;;  %v1311_v52 = vand.u32 2147483648, %v1299_v14 }
 0x44c   :  { %v1281_v61 = vmul.f32 %v1863_v6, %v1279_v55  ;;  %1866 = vtanh.f32 %v1255_v19  ;;  %vm1286_vm2 = vweird.f32 %v1863_v6  ;;  %vm1268_vm5 = vmor %vm1266_vm3, %vm1267_vm1  ;;  %vm1305_vm11 = vweird.f32 %v1299_v14 }
 0x44d   :  { %v1263_v62 = vsub.f32 1.0, %v1262_v3  ;;  %vm1287_vm6 = vmor %vm1285_vm4, %vm1286_vm2  ;;  %v1309_v23 = vand.u32 2147483647, %v1299_v14  ;;  %v1312_v25 = vor.u32 1.1754944e-38, %v1311_v52 }
 0x44e   :  { %v1282_v15 = vsub.f32 1.0, %v1281_v61 }
 0x44f   :  { %v1264_v1 = vmul.f32 %v1861_v60, %v1263_v62  ;;  %vm1310_vm13 = vcmp.eq.f32.partialorder %v1309_v23, 8.507059e+37 }
 0x450   :  { %v1283_v44 = vmul.f32 %v1863_v6, %v1282_v15 }
 0x451   :  { %v1865_v46 = vpop.eup %1864  ;;  %v1265_v9 = vadd.f32 %v1861_v60, %v1264_v1 }
 0x452   :  { %v1284_v17 = vadd.f32 %v1863_v6, %v1283_v44  ;;  %v1301_v5 = vmul.f32 %v1865_v46, %v1299_v14  ;;  %v1867_v58 = vpop.eup %1866  ;;  %vm1306_vm10 = vweird.f32 %v1865_v46 }
 0x453   :  { %v1269_v21 = vsel %vm1268_vm5, %v1861_v60, %v1265_v9  ;;  %vm1307_vm12 = vmor %vm1305_vm11, %vm1306_vm10 }
 0x454   :  { %v1274_v26 = vsel %vm1271_vm7, %v1273_v42, %v1269_v21  ;;  %v1288_v8 = vsel %vm1287_vm6, %v1863_v6, %v1284_v17  ;;  %v1302_v57 = vsub.f32 1.0, %v1301_v5 }
 0x455   :  { %v1293_v4 = vsel %vm1290_vm8, %v1292_v41, %v1288_v8  ;;  %v1319_v59 = vmul.f32 %v1867_v58, %v1274_v26 }
 0x456   :  { %v1318_v7 = vmul.f32 %v3146_v13, %v1293_v4  ;;  %v1303_v50 = vmul.f32 %v1865_v46, %v1302_v57  ;;  %v1502_v57 = vstv %s1501_s24 }
 0x457   :  { %vm3176_vm6 = vcmp.eq.s32.totalorder %v1502_v57, 1  ;;  %v1677_v57 = vstv %s1676_s2 }
 0x458   :  { %v3153_v22 = vadd.f32 %v1319_v59, %v1318_v7  ;;  %v1304_v56 = vadd.f32 %v1865_v46, %v1303_v50 }
 0x45a   :  { %1868 = vtanh.f32 %v3153_v22  ;;  %v1332_v20 = vsel %vm3149_vm9, %v3153_v22, %v3146_v13  ;;  %v1308_v24 = vsel %vm1307_vm12, %v1865_v46, %v1304_v56 }
 0x45b   :  { %v1313_v28 = vsel %vm1310_vm13, %v1312_v25, %v1308_v24  ;;  %v3173_v5 = vrot.slane %v1332_v20, 7 }
 0x460   :  { %v1869_v27 = vpop.eup %1868 }
 0x461   :  { %v1322_v31 = vmul.f32 %v1869_v27, %v1313_v28 }
 0x463   :  { %1323 = vst [vmem:[#allocation10] sm:$0x20] %v1322_v31  ;;  %v3163_v32 = vsel %vm3149_vm9, %v1322_v31, %v1329_v29 }
 0x464   :  { %v1334_v34 = vrot.slane %v3163_v32, 5 }
 0x466   :  { %1352 = vmatmul.f32.vlgmr.msrb.gmra.mxu0 %v1334_v34  ;;  %1372 = vmatmul.f32.vlgmr.msrb.gmra.mxu1 %v1334_v34 }
 0x467   :  { %1392 = vmatmul.f32.vlgmr.msrb.gmra.mxu2 %v1334_v34  ;;  %1412 = vmatmul.f32.vlgmr.msrb.gmra.mxu3 %v1334_v34 }
 0x4e3   :  { %v1353_v38 = vpop.f32.mrf.mxu0  ;;  %v1373_v12 = vpop.f32.mrf.mxu1 }
 0x4e4   :  { %v1420_v39 = vrot.slane %v1353_v38, 2  ;;  %v1421_v18 = vrot.slane %v1373_v12, 2  ;;  %v1504_v12 = vrot.slane %v3163_v32, 7 }
 0x4e6   :  { %v1428_v11 = vadd.f32 %v1420_v39, %v3526_v33  ;;  %v1429_v48 = vadd.f32 %v1421_v18, %v3527_v35 }
 0x4e8   :  { %v1758_v45 = vmul.f32 -1.442695, %v1428_v11  ;;  %v1759_v0 = vmul.f32 -1.442695, %v1429_v48 }
 0x4ea   :  { %1870 = vpow2.f32 %v1758_v45  ;;  %v1413_v54 = vpop.f32.mrf.mxu3  ;;  %v1393_v60 = vpop.f32.mrf.mxu2 }
 0x4eb   :  { %1872 = vpow2.f32 %v1759_v0  ;;  %v1423_v63 = vrot.slane %v1413_v54, 2  ;;  %v1422_v19 = vrot.slane %v1393_v60, 2 }
 0x4ed   :  { %v1431_v53 = vadd.f32 %v1423_v63, %v3528_v30  ;;  %v1430_v62 = vadd.f32 %v1422_v19, %v3529_v16 }
 0x4ef   :  { %v1760_v55 = vmul.f32 -1.442695, %v1431_v53 }
 0x4f0   :  { %v1871_v2 = vpop.eup %1870 }
 0x4f1   :  { %v1873_v49 = vpop.eup %1872  ;;  %v1435_v10 = vadd.f32 1.0, %v1871_v2  ;;  %1874 = vpow2.f32 %v1760_v55 }
 0x4f2   :  { %v1454_v14 = vadd.f32 1.0, %v1873_v49 }
 0x4f3   :  { %1876 = vrcp.f32 %v1435_v10  ;;  %v1447_v44 = vand.u32 2147483648, %v1435_v10  ;;  %v1445_v13 = vand.u32 2147483647, %v1435_v10  ;;  %vm1441_vm0 = vweird.f32 %v1435_v10 }
 0x4f4   :  { %1878 = vrcp.f32 %v1454_v14  ;;  %v1466_v37 = vand.u32 2147483648, %v1454_v14  ;;  %v1464_v42 = vand.u32 2147483647, %v1454_v14  ;;  %vm1460_vm1 = vweird.f32 %v1454_v14 }
 0x4f5   :  { %v1448_v21 = vor.u32 1.1754944e-38, %v1447_v44  ;;  %vm1446_vm4 = vcmp.eq.f32.partialorder %v1445_v13, 8.507059e+37 }
 0x4f6   :  { %v1467_v26 = vor.u32 1.1754944e-38, %v1466_v37  ;;  %vm1465_vm5 = vcmp.eq.f32.partialorder %v1464_v42, 8.507059e+37 }
 0x4f7   :  { %v1875_v6 = vpop.eup %1874 }
 0x4f8   :  { %v1474_v3 = vadd.f32 1.0, %v1875_v6 }
 0x4f9   :  { %v1877_v61 = vpop.eup %1876 }
 0x4fa   :  { %v1879_v15 = vpop.eup %1878  ;;  %v1437_v40 = vmul.f32 %v1877_v61, %v1435_v10  ;;  %1880 = vrcp.f32 %v1474_v3  ;;  %vm1442_vm14 = vweird.f32 %v1877_v61  ;;  %v1486_v25 = vand.u32 2147483648, %v1474_v3 }
 0x4fb   :  { %v1456_v36 = vmul.f32 %v1879_v15, %v1454_v14  ;;  %1882 = vtanh.f32 %v1430_v62  ;;  %vm1461_vm15 = vweird.f32 %v1879_v15  ;;  %vm1443_vm2 = vmor %vm1441_vm0, %vm1442_vm14  ;;  %vm1480_vm8 = vweird.f32 %v1474_v3 }
 0x4fc   :  { %v1438_v1 = vsub.f32 1.0, %v1437_v40  ;;  %vm1462_vm3 = vmor %vm1460_vm1, %vm1461_vm15  ;;  %v1484_v28 = vand.u32 2147483647, %v1474_v3  ;;  %v1487_v31 = vor.u32 1.1754944e-38, %v1486_v25 }
 0x4fd   :  { %v1457_v51 = vsub.f32 1.0, %v1456_v36 }
 0x4fe   :  { %v1439_v46 = vmul.f32 %v1877_v61, %v1438_v1  ;;  %vm1485_vm10 = vcmp.eq.f32.partialorder %v1484_v28, 8.507059e+37 }
 0x4ff   :  { %v1458_v9 = vmul.f32 %v1879_v15, %v1457_v51 }
 0x500   :  { %v1881_v17 = vpop.eup %1880  ;;  %v1440_v41 = vadd.f32 %v1877_v61, %v1439_v46 }
 0x501   :  { %v1459_v47 = vadd.f32 %v1879_v15, %v1458_v9  ;;  %v1476_v58 = vmul.f32 %v1881_v17, %v1474_v3  ;;  %v1883_v4 = vpop.eup %1882  ;;  %vm1481_vm7 = vweird.f32 %v1881_v17 }
 0x502   :  { %v1444_v8 = vsel %vm1443_vm2, %v1877_v61, %v1440_v41  ;;  %vm1482_vm9 = vmor %vm1480_vm8, %vm1481_vm7 }
 0x503   :  { %v1449_v59 = vsel %vm1446_vm4, %v1448_v21, %v1444_v8  ;;  %v1463_v7 = vsel %vm1462_vm3, %v1879_v15, %v1459_v47  ;;  %v1477_v50 = vsub.f32 1.0, %v1476_v58  ;;  %vm3200_vm3 = vcmp.eq.s32.totalorder %v1677_v57, 1 }
 0x504   :  { %v1468_v43 = vsel %vm1465_vm5, %v1467_v26, %v1463_v7  ;;  %v1494_v22 = vmul.f32 %v1883_v4, %v1449_v59 }
 0x505   :  { %v1493_v56 = vmul.f32 %v3173_v5, %v1468_v43  ;;  %v1478_v52 = vmul.f32 %v1881_v17, %v1477_v50 }
 0x507   :  { %v3180_v23 = vadd.f32 %v1494_v22, %v1493_v56  ;;  %v1479_v24 = vadd.f32 %v1881_v17, %v1478_v52 }
 0x509   :  { %1884 = vtanh.f32 %v3180_v23  ;;  %v1507_v27 = vsel %vm3176_vm6, %v3180_v23, %v3173_v5  ;;  %v1483_v29 = vsel %vm1482_vm9, %v1881_v17, %v1479_v24 }
 0x50a   :  { %v1488_v38 = vsel %vm1485_vm10, %v1487_v31, %v1483_v29  ;;  %v1666_v5 = vrot.slane %v1507_v27, 7 }
 0x50f   :  { %v1885_v34 = vpop.eup %1884 }
 0x510   :  { %v1497_v39 = vmul.f32 %v1885_v34, %v1488_v38 }
 0x512   :  { %1498 = vst [vmem:[#allocation10] sm:$0x40] %v1497_v39  ;;  %v3190_v18 = vsel %vm3176_vm6, %v1497_v39, %v1504_v12 }
 0x513   :  { %v1509_v11 = vrot.slane %v3190_v18, 6  ;;  %v1679_v12 = vrot.slane %v3190_v18, 7 }
 0x515   :  { %1527 = vmatmul.f32.vlgmr.msra.gmra.mxu0 %v1509_v11  ;;  %1547 = vmatmul.f32.vlgmr.msra.gmra.mxu1 %v1509_v11 }
 0x516   :  { %1567 = vmatmul.f32.vlgmr.msra.gmra.mxu2 %v1509_v11  ;;  %1587 = vmatmul.f32.vlgmr.msra.gmra.mxu3 %v1509_v11 }
 0x592   :  { %v1528_v48 = vpop.f32.mrf.mxu0  ;;  %v1548_v45 = vpop.f32.mrf.mxu1 }
 0x593   :  { %v1595_v0 = vrot.slane %v1528_v48, 1  ;;  %v1596_v54 = vrot.slane %v1548_v45, 1 }
 0x595   :  { %v1603_v63 = vadd.f32 %v1595_v0, %v3526_v33  ;;  %v1604_v32 = vadd.f32 %v1596_v54, %v3527_v35 }
 0x597   :  { %v1762_v53 = vmul.f32 -1.442695, %v1603_v63  ;;  %v1763_v55 = vmul.f32 -1.442695, %v1604_v32 }
 0x599   :  { %1886 = vpow2.f32 %v1762_v53  ;;  %v1588_v2 = vpop.f32.mrf.mxu3  ;;  %v1568_v61 = vpop.f32.mrf.mxu2 }
 0x59a   :  { %1888 = vpow2.f32 %v1763_v55  ;;  %v1598_v49 = vrot.slane %v1588_v2, 1  ;;  %v1597_v33 = vrot.slane %v1568_v61, 1 }
 0x59c   :  { %v1606_v10 = vadd.f32 %v1598_v49, %v3528_v30  ;;  %v1605_v40 = vadd.f32 %v1597_v33, %v3529_v16 }
 0x59e   :  { %v1764_v14 = vmul.f32 -1.442695, %v1606_v10 }
 0x59f   :  { %v1887_v60 = vpop.eup %1886 }
 0x5a0   :  { %v1889_v19 = vpop.eup %1888  ;;  %v1610_v6 = vadd.f32 1.0, %v1887_v60  ;;  %1890 = vpow2.f32 %v1764_v14 }
 0x5a1   :  { %v1629_v3 = vadd.f32 1.0, %v1889_v19 }
 0x5a2   :  { %1892 = vrcp.f32 %v1610_v6  ;;  %v1622_v37 = vand.u32 2147483648, %v1610_v6  ;;  %v1620_v9 = vand.u32 2147483647, %v1610_v6  ;;  %vm1616_vm13 = vweird.f32 %v1610_v6 }
 0x5a3   :  { %1894 = vrcp.f32 %v1629_v3  ;;  %v1641_v46 = vand.u32 2147483648, %v1629_v3  ;;  %v1639_v16 = vand.u32 2147483647, %v1629_v3  ;;  %vm1635_vm14 = vweird.f32 %v1629_v3 }
 0x5a4   :  { %v1623_v21 = vor.u32 1.1754944e-38, %v1622_v37  ;;  %vm1621_vm1 = vcmp.eq.f32.partialorder %v1620_v9, 8.507059e+37 }
 0x5a5   :  { %v1642_v26 = vor.u32 1.1754944e-38, %v1641_v46  ;;  %vm1640_vm2 = vcmp.eq.f32.partialorder %v1639_v16, 8.507059e+37 }
 0x5a6   :  { %v1891_v62 = vpop.eup %1890 }
 0x5a7   :  { %v1649_v35 = vadd.f32 1.0, %v1891_v62 }
 0x5a8   :  { %v1893_v15 = vpop.eup %1892 }
 0x5a9   :  { %v1895_v36 = vpop.eup %1894  ;;  %v1612_v1 = vmul.f32 %v1893_v15, %v1610_v6  ;;  %1896 = vrcp.f32 %v1649_v35  ;;  %vm1617_vm11 = vweird.f32 %v1893_v15  ;;  %v1661_v25 = vand.u32 2147483648, %v1649_v35 }
 0x5aa   :  { %v1631_v30 = vmul.f32 %v1895_v36, %v1629_v3  ;;  %1898 = vtanh.f32 %v1605_v40  ;;  %vm1636_vm12 = vweird.f32 %v1895_v36  ;;  %vm1618_vm15 = vmor %vm1616_vm13, %vm1617_vm11  ;;  %vm1655_vm5 = vweird.f32 %v1649_v35 }
 0x5ab   :  { %v1613_v51 = vsub.f32 1.0, %v1612_v1  ;;  %vm1637_vm0 = vmor %vm1635_vm14, %vm1636_vm12  ;;  %v1659_v28 = vand.u32 2147483647, %v1649_v35  ;;  %v1662_v31 = vor.u32 1.1754944e-38, %v1661_v25 }
 0x5ac   :  { %v1632_v44 = vsub.f32 1.0, %v1631_v30 }
 0x5ad   :  { %v1614_v13 = vmul.f32 %v1893_v15, %v1613_v51  ;;  %vm1660_vm7 = vcmp.eq.f32.partialorder %v1659_v28, 8.507059e+37 }
 0x5ae   :  { %v1633_v42 = vmul.f32 %v1895_v36, %v1632_v44 }
 0x5af   :  { %v1897_v17 = vpop.eup %1896  ;;  %v1615_v41 = vadd.f32 %v1893_v15, %v1614_v13 }
 0x5b0   :  { %v1634_v47 = vadd.f32 %v1895_v36, %v1633_v42  ;;  %v1651_v58 = vmul.f32 %v1897_v17, %v1649_v35  ;;  %v1899_v4 = vpop.eup %1898  ;;  %vm1656_vm4 = vweird.f32 %v1897_v17 }
 0x5b1   :  { %v1619_v8 = vsel %vm1618_vm15, %v1893_v15, %v1615_v41  ;;  %vm1657_vm6 = vmor %vm1655_vm5, %vm1656_vm4 }
 0x5b2   :  { %v1624_v59 = vsel %vm1621_vm1, %v1623_v21, %v1619_v8  ;;  %v1638_v7 = vsel %vm1637_vm0, %v1895_v36, %v1634_v47  ;;  %v1652_v50 = vsub.f32 1.0, %v1651_v58 }
 0x5b3   :  { %v1643_v43 = vsel %vm1640_vm2, %v1642_v26, %v1638_v7  ;;  %v1669_v22 = vmul.f32 %v1899_v4, %v1624_v59 }
 0x5b4   :  { %v1668_v56 = vmul.f32 %v1666_v5, %v1643_v43  ;;  %v1653_v52 = vmul.f32 %v1897_v17, %v1652_v50 }
 0x5b6   :  { %v1670_v23 = vadd.f32 %v1669_v22, %v1668_v56  ;;  %v1654_v24 = vadd.f32 %v1897_v17, %v1653_v52 }
 0x5b8   :  { %1900 = vtanh.f32 %v1670_v23  ;;  %v1682_v27 = vsel %vm3200_vm3, %v1670_v23, %v1666_v5  ;;  %v1658_v29 = vsel %vm1657_vm6, %v1897_v17, %v1654_v24 }
 0x5b9   :  { %1684 = vst [vmem:[#allocation13 - $0x7] sm:$0x80] %v1682_v27  ;;  %v1663_v38 = vsel %vm1660_vm7, %v1662_v31, %v1658_v29 }
 0x5be   :  { %v1901_v34 = vpop.eup %1900 }
 0x5bf   :  { %v1672_v39 = vmul.f32 %v1901_v34, %v1663_v38 }
 0x5c1   :  { %1673 = vst [vmem:[#allocation10] sm:$0x80] %v1672_v39  ;;  %v1681_v11 = vsel %vm3200_vm3, %v1672_v39, %v1679_v12 }
 0x5c2   :  { %1683 = vst [vmem:[#allocation11 - $0x7] sm:$0x80] %v1681_v11  ;;  %1695 = dma.vmem_to_hbm [thread:$0]  %s1691_s25, 128, %s1693_s3, [#allocation6]  }
 0x5c3   :  { %1706 = dma.vmem_to_hbm [thread:$0]  %s1702_s28, 16, %s1704_s10, [#allocation12]  }
 0x5c4   :  { %1717 = dma.vmem_to_hbm [thread:$0]  %s1713_s12, 16, %s1715_s15, [#allocation12]  }
 0x5c5   :  { %2114 = dma.done.wait [#allocation6], 128  }
 0x5c6   :  { %2115 = vsyncadd [#allocation6], 4294967168 }
 0x5c7   :  { %2116 = dma.done.wait [#allocation12], 32  }
 0x5c8   :  { %2117 = vsyncadd [#allocation12], 4294967264 }
 0x5c9   :  { %1730 = vsyncpa [#allocation5], 1 }
 0x5ca   :  { %1731 = vsyncpa [#allocation8], 1 }
 0x5cb   :  { %1732 = vsyncpa [#allocation6], 1 }
 0x5cc   :  { %1733 = vsyncpa [#allocation12], 1 }

</bundles_post_ra>
